<compile_context>
chip_gen: v7x
topology: tpu7x:2x2x1
jax: 0.10.0
libtpu: 0.0.40
codegen_flags: <defaults>
</compile_context>

<pallas_src>
import numpy as np
import jax
import jax.numpy as jnp
from jax.experimental import pallas as pl
from jax.experimental.pallas import tpu as pltpu

EPS = 1e-5  # nn.BatchNorm2d default


# ---------------------------------------------------------------------------
# Host-side (trace-time) operator builders.  All spatial bookkeeping matrices
# are tiny 0/1 numpy constants; weight-scatter matrices are built from the
# (traced) conv weights with small einsums.
# ---------------------------------------------------------------------------
def _row_shift(n, hs, dh):
    """(N*Hs, N*Hs) 0/1: out row (n,h) <- in row (n,h+dh), zero at boundaries."""
    m = np.zeros((n * hs, n * hs), np.float32)
    for b in range(n):
        for h in range(hs):
            hh = h + dh
            if 0 <= hh < hs:
                m[b * hs + h, b * hs + hh] = 1.0
    return m


def _conv_lane_mats(wt, ws):
    """Per-dh weight matrices for a 3x3 conv (padding=1).

    wt: (Cout, Cin, 3, 3).  Returns [B(dh=-1), B(0), B(+1)], each of shape
    (Cin*Ws, Cout*Ws) with B[(ci,wi),(co,wo)] = wt[co,ci,dh+1,dw+1] for
    wi = wo+dw (zero outside -> zero padding).
    """
    p = np.zeros((3, ws, ws), np.float32)
    for di, dw in enumerate((-1, 0, 1)):
        for wo in range(ws):
            wi = wo + dw
            if 0 <= wi < ws:
                p[di, wi, wo] = 1.0
    cout, cin = wt.shape[0], wt.shape[1]
    mats = []
    for dhi in range(3):
        b = jnp.einsum('oid,dxy->ixoy', wt[:, :, dhi, :], p)
        mats.append(b.reshape(cin * ws, cout * ws).astype(jnp.float32))
    return mats


def _bn_avg(c, ws, rows):
    """(C*Ws, C*Ws) block matrix averaging (rows*Ws elems) within each channel."""
    blk = np.ones((ws, ws), np.float32) / float(rows * ws)
    m = np.zeros((c * ws, c * ws), np.float32)
    for ci in range(c):
        m[ci * ws:(ci + 1) * ws, ci * ws:(ci + 1) * ws] = blk
    return m


def _rep(v, ws):
    """Per-channel vector -> (1, C*Ws) lane layout (channel-major)."""
    return jnp.repeat(v, ws).reshape(1, -1).astype(jnp.float32)


def _pool_row_sel(n, hs, off):
    """(N*Hs/2, N*Hs) 0/1: out row (n,h') <- in row (n, 2h'+off)."""
    ho = hs // 2
    m = np.zeros((n * ho, n * hs), np.float32)
    for b in range(n):
        for h in range(ho):
            m[b * ho + h, b * hs + 2 * h + off] = 1.0
    return m


def _pool_lane_sel(c, ws, off):
    """(C*Ws, C*Ws/2) 0/1: out lane (c,w') <- in lane (c, 2w'+off)."""
    wo = ws // 2
    m = np.zeros((c * ws, c * wo), np.float32)
    for ci in range(c):
        for w in range(wo):
            m[ci * ws + 2 * w + off, ci * wo + w] = 1.0
    return m


def _convt_row_mats(n, hs):
    """[Rt(kh=0), Rt(kh=1)], each (N*2Hs, N*Hs): out row (n,2h+kh) <- in row (n,h)."""
    ho = 2 * hs
    mats = []
    for kh in range(2):
        m = np.zeros((n * ho, n * hs), np.float32)
        for b in range(n):
            for h in range(hs):
                m[b * ho + 2 * h + kh, b * hs + h] = 1.0
        mats.append(m)
    return mats


def _convt_lane_mats(wt, ws):
    """Per-kh weight matrices for ConvTranspose2d(k=2, s=2).

    wt: (Cin, Cout, 2, 2).  Returns [Bt(kh=0), Bt(kh=1)], each of shape
    (Cin*Ws, Cout*2Ws) with Bt[(ci,w),(co,2w+kw)] = wt[ci,co,kh,kw].
    """
    cin, cout = wt.shape[0], wt.shape[1]
    wo = 2 * ws
    pt = np.zeros((2, ws, wo), np.float32)
    for kw in range(2):
        for w in range(ws):
            pt[kw, w, 2 * w + kw] = 1.0
    mats = []
    for kh in range(2):
        b = jnp.einsum('iok,kxy->ixoy', wt[:, :, kh, :], pt)
        mats.append(b.reshape(cin * ws, cout * wo).astype(jnp.float32))
    return mats


# ---------------------------------------------------------------------------
# Fused whole-network Pallas kernel.  The operand list is consumed in exactly
# the order the wrapper builds it (see autoencoder_forward).
# ---------------------------------------------------------------------------
def _kernel(*refs):
    o_ref = refs[-1]
    it = iter(refs[:-1])
    nxt = lambda: next(it)[...]
    f32 = jnp.float32

    def mm(a, b):
        return jnp.dot(a, b, preferred_element_type=f32)

    def bn_relu(z):
        mavg, g, b = (nxt() for _ in range(3))
        mean = mm(jnp.sum(z, axis=0, keepdims=True), mavg)
        d = z - mean
        var = mm(jnp.sum(d * d, axis=0, keepdims=True), mavg)
        return jnp.maximum(d * (g * jax.lax.rsqrt(var + EPS)) + b, 0.0)

    def conv_bn_relu(a):
        rm, rp, bm, b0, bp = (nxt() for _ in range(5))
        z = mm(a, b0) + mm(mm(rm, a), bm) + mm(mm(rp, a), bp)
        return bn_relu(z)

    def maxpool(a):
        pra, prb, pca, pcb = (nxt() for _ in range(4))
        m1 = jnp.maximum(mm(pra, a), mm(prb, a))
        return jnp.maximum(mm(m1, pca), mm(m1, pcb))

    def convt(a):
        rt0, rt1, bt0, bt1 = (nxt() for _ in range(4))
        return mm(mm(rt0, a), bt0) + mm(mm(rt1, a), bt1)

    # ------------------------- encoder -------------------------
    a = nxt()                    # input slab (N*H, W)
    a = conv_bn_relu(a)          # Conv2d(1->16) + BN + ReLU
    a = maxpool(a)               # MaxPool2d(2)
    a = conv_bn_relu(a)          # Conv2d(16->8) + BN + ReLU
    a = maxpool(a)               # MaxPool2d(2)
    a = conv_bn_relu(a)          # Conv2d(8->4) + BN + ReLU
    # ------------------------- decoder -------------------------
    a = conv_bn_relu(a)          # Conv2d(4->8) + BN + ReLU
    a = bn_relu(convt(a))        # ConvTranspose2d(8->16, k2 s2) + BN + ReLU
    z = convt(a)                 # ConvTranspose2d(16->1, k2 s2)
    bias = nxt()
    z = z + bias
    o_ref[...] = 1.0 / (1.0 + jnp.exp(-z))   # Sigmoid

    # Trace-time consistency check: every operand must have been consumed.
    assert sum(1 for _ in it) == 0


# ---------------------------------------------------------------------------
# Parameters + full forward
# ---------------------------------------------------------------------------
def init_params(key):
    keys = jax.random.split(key, 6)

    def uinit(k, shape, fan_in, n_bias):
        kw, kb = jax.random.split(k)
        bound = 1.0 / (fan_in ** 0.5)   # PyTorch default conv init bound
        w = jax.random.uniform(kw, shape, jnp.float32, -bound, bound)
        b = jax.random.uniform(kb, (n_bias,), jnp.float32, -bound, bound)
        return w, b

    p = {}
    # encoder  (conv biases before train-mode BN cancel exactly; kept for parity)
    p['e1_w'], p['e1_b'] = uinit(keys[0], (16, 1, 3, 3), 1 * 9, 16)
    p['e1_g'], p['e1_be'] = jnp.ones(16, jnp.float32), jnp.zeros(16, jnp.float32)
    p['e2_w'], p['e2_b'] = uinit(keys[1], (8, 16, 3, 3), 16 * 9, 8)
    p['e2_g'], p['e2_be'] = jnp.ones(8, jnp.float32), jnp.zeros(8, jnp.float32)
    p['e3_w'], p['e3_b'] = uinit(keys[2], (4, 8, 3, 3), 8 * 9, 4)
    p['e3_g'], p['e3_be'] = jnp.ones(4, jnp.float32), jnp.zeros(4, jnp.float32)
    # decoder
    p['d1_w'], p['d1_b'] = uinit(keys[3], (8, 4, 3, 3), 4 * 9, 8)
    p['d1_g'], p['d1_be'] = jnp.ones(8, jnp.float32), jnp.zeros(8, jnp.float32)
    p['d2_w'], p['d2_b'] = uinit(keys[4], (8, 16, 2, 2), 8 * 4, 16)   # ConvT: (Cin,Cout,2,2)
    p['d2_g'], p['d2_be'] = jnp.ones(16, jnp.float32), jnp.zeros(16, jnp.float32)
    p['d3_w'], p['d3_b'] = uinit(keys[5], (16, 1, 2, 2), 16 * 4, 1)
    return p


@jax.jit
def autoencoder_forward(x_nchw, p):
    n, cin, h, w = x_nchw.shape
    assert cin == 1 and h % 4 == 0 and w % 4 == 0
    h1, w1 = h, w
    h2, w2 = h // 2, w // 2
    h3, w3 = h // 4, w // 4

    # Activation slab layout: rows = (n, h), lanes = (c, w) channel-major.
    x_slab = x_nchw.astype(jnp.float32).reshape(n * h, w)
    inputs = [x_slab]

    def add_conv(wt, gamma, beta, hs, ws):
        cout = wt.shape[0]
        inputs.append(_row_shift(n, hs, -1))
        inputs.append(_row_shift(n, hs, +1))
        inputs.extend(_conv_lane_mats(wt, ws))              # [dh=-1, 0, +1]
        inputs.append(_bn_avg(cout, ws, n * hs))
        inputs.append(_rep(gamma, ws))
        inputs.append(_rep(beta, ws))

    def add_pool(c, hs, ws):
        inputs.append(_pool_row_sel(n, hs, 0))
        inputs.append(_pool_row_sel(n, hs, 1))
        inputs.append(_pool_lane_sel(c, ws, 0))
        inputs.append(_pool_lane_sel(c, ws, 1))

    def add_convt(wt, hs, ws, gamma=None, beta=None):
        cout = wt.shape[1]
        inputs.extend(_convt_row_mats(n, hs))               # [kh=0, kh=1]
        inputs.extend(_convt_lane_mats(wt, ws))             # [kh=0, kh=1]
        if gamma is not None:
            inputs.append(_bn_avg(cout, 2 * ws, n * 2 * hs))
            inputs.append(_rep(gamma, 2 * ws))
            inputs.append(_rep(beta, 2 * ws))

    # encoder
    add_conv(p['e1_w'], p['e1_g'], p['e1_be'], h1, w1)
    add_pool(16, h1, w1)
    add_conv(p['e2_w'], p['e2_g'], p['e2_be'], h2, w2)
    add_pool(8, h2, w2)
    add_conv(p['e3_w'], p['e3_g'], p['e3_be'], h3, w3)
    # decoder
    add_conv(p['d1_w'], p['d1_g'], p['d1_be'], h3, w3)
    add_convt(p['d2_w'], h3, w3, p['d2_g'], p['d2_be'])
    add_convt(p['d3_w'], h2, w2)
    inputs.append(p['d3_b'].reshape(1, 1).astype(jnp.float32))

    out = pl.pallas_call(
        _kernel,
        out_shape=jax.ShapeDtypeStruct((n * h, w), jnp.float32),
        in_specs=[pl.BlockSpec(memory_space=pltpu.MemorySpace.VMEM)] * len(inputs),
        out_specs=pl.BlockSpec(memory_space=pltpu.MemorySpace.VMEM),
        compiler_params=pltpu.CompilerParams(vmem_limit_bytes=32 * 1024 * 1024),
    )(*inputs)

    # Metadata-only reshape: rows are already (n, h_out), lanes are w_out.
    return out.reshape(n, 1, h, w)


if __name__ == "__main__":
    key = jax.random.PRNGKey(0)
    kx, kp = jax.random.split(key)
    x = jax.random.uniform(kx, (2, 1, 16, 16), jnp.float32)   # NCHW, like the PyTorch module
    params = init_params(kp)
    y = autoencoder_forward(x, params)
    jax.block_until_ready(y)
    assert y.shape == (2, 1, 16, 16), y.shape
    assert bool(jnp.all(jnp.isfinite(y)))
    assert bool(jnp.all((y >= 0.0) & (y <= 1.0)))   # Sigmoid output range
    print("KERNEL_OK")
</pallas_src>

<mosaic_0001>
module attributes {stable_mosaic.version = 11 : i64} {
  func.func @_kernel(%arg0: memref<32x16xf32, #tpu.memory_space<vmem>>, %arg1: memref<32x32xf32, #tpu.memory_space<vmem>>, %arg2: memref<32x32xf32, #tpu.memory_space<vmem>>, %arg3: memref<16x256xf32, #tpu.memory_space<vmem>>, %arg4: memref<16x256xf32, #tpu.memory_space<vmem>>, %arg5: memref<16x256xf32, #tpu.memory_space<vmem>>, %arg6: memref<256x256xf32, #tpu.memory_space<vmem>>, %arg7: memref<1x256xf32, #tpu.memory_space<vmem>>, %arg8: memref<1x256xf32, #tpu.memory_space<vmem>>, %arg9: memref<16x32xf32, #tpu.memory_space<vmem>>, %arg10: memref<16x32xf32, #tpu.memory_space<vmem>>, %arg11: memref<256x128xf32, #tpu.memory_space<vmem>>, %arg12: memref<256x128xf32, #tpu.memory_space<vmem>>, %arg13: memref<16x16xf32, #tpu.memory_space<vmem>>, %arg14: memref<16x16xf32, #tpu.memory_space<vmem>>, %arg15: memref<128x64xf32, #tpu.memory_space<vmem>>, %arg16: memref<128x64xf32, #tpu.memory_space<vmem>>, %arg17: memref<128x64xf32, #tpu.memory_space<vmem>>, %arg18: memref<64x64xf32, #tpu.memory_space<vmem>>, %arg19: memref<1x64xf32, #tpu.memory_space<vmem>>, %arg20: memref<1x64xf32, #tpu.memory_space<vmem>>, %arg21: memref<8x16xf32, #tpu.memory_space<vmem>>, %arg22: memref<8x16xf32, #tpu.memory_space<vmem>>, %arg23: memref<64x32xf32, #tpu.memory_space<vmem>>, %arg24: memref<64x32xf32, #tpu.memory_space<vmem>>, %arg25: memref<8x8xf32, #tpu.memory_space<vmem>>, %arg26: memref<8x8xf32, #tpu.memory_space<vmem>>, %arg27: memref<32x16xf32, #tpu.memory_space<vmem>>, %arg28: memref<32x16xf32, #tpu.memory_space<vmem>>, %arg29: memref<32x16xf32, #tpu.memory_space<vmem>>, %arg30: memref<16x16xf32, #tpu.memory_space<vmem>>, %arg31: memref<1x16xf32, #tpu.memory_space<vmem>>, %arg32: memref<1x16xf32, #tpu.memory_space<vmem>>, %arg33: memref<8x8xf32, #tpu.memory_space<vmem>>, %arg34: memref<8x8xf32, #tpu.memory_space<vmem>>, %arg35: memref<16x32xf32, #tpu.memory_space<vmem>>, %arg36: memref<16x32xf32, #tpu.memory_space<vmem>>, %arg37: memref<16x32xf32, #tpu.memory_space<vmem>>, %arg38: memref<32x32xf32, #tpu.memory_space<vmem>>, %arg39: memref<1x32xf32, #tpu.memory_space<vmem>>, %arg40: memref<1x32xf32, #tpu.memory_space<vmem>>, %arg41: memref<16x8xf32, #tpu.memory_space<vmem>>, %arg42: memref<16x8xf32, #tpu.memory_space<vmem>>, %arg43: memref<32x128xf32, #tpu.memory_space<vmem>>, %arg44: memref<32x128xf32, #tpu.memory_space<vmem>>, %arg45: memref<128x128xf32, #tpu.memory_space<vmem>>, %arg46: memref<1x128xf32, #tpu.memory_space<vmem>>, %arg47: memref<1x128xf32, #tpu.memory_space<vmem>>, %arg48: memref<32x16xf32, #tpu.memory_space<vmem>>, %arg49: memref<32x16xf32, #tpu.memory_space<vmem>>, %arg50: memref<128x16xf32, #tpu.memory_space<vmem>>, %arg51: memref<128x16xf32, #tpu.memory_space<vmem>>, %arg52: memref<1x1xf32, #tpu.memory_space<vmem>>, %arg53: memref<32x16xf32, #tpu.memory_space<vmem>>) attributes {dimension_semantics = [], scalar_prefetch = 0 : i64, scratch_operands = 0 : i64, tpu.core_type = #tpu.core_type<tc>} {
    %c0 = arith.constant 0 : index
    %c0_0 = arith.constant 0 : index
    %0 = vector.load %arg0[%c0, %c0_0] : memref<32x16xf32, #tpu.memory_space<vmem>>, vector<32x16xf32>
    %c0_1 = arith.constant 0 : index
    %c0_2 = arith.constant 0 : index
    %1 = vector.load %arg1[%c0_1, %c0_2] : memref<32x32xf32, #tpu.memory_space<vmem>>, vector<32x32xf32>
    %c0_3 = arith.constant 0 : index
    %c0_4 = arith.constant 0 : index
    %2 = vector.load %arg2[%c0_3, %c0_4] : memref<32x32xf32, #tpu.memory_space<vmem>>, vector<32x32xf32>
    %c0_5 = arith.constant 0 : index
    %c0_6 = arith.constant 0 : index
    %3 = vector.load %arg3[%c0_5, %c0_6] : memref<16x256xf32, #tpu.memory_space<vmem>>, vector<16x256xf32>
    %c0_7 = arith.constant 0 : index
    %c0_8 = arith.constant 0 : index
    %4 = vector.load %arg4[%c0_7, %c0_8] : memref<16x256xf32, #tpu.memory_space<vmem>>, vector<16x256xf32>
    %c0_9 = arith.constant 0 : index
    %c0_10 = arith.constant 0 : index
    %5 = vector.load %arg5[%c0_9, %c0_10] : memref<16x256xf32, #tpu.memory_space<vmem>>, vector<16x256xf32>
    %cst = arith.constant dense<0.000000e+00> : vector<32x256xf32>
    %6 = tpu.matmul %0, %4, %cst {dimension_numbers = #tpu.dot_dimension_numbers<[1], [0], [0], [1], [0, 0, 1, 1], [], []>} : vector<32x16xf32>, vector<16x256xf32>, vector<32x256xf32> -> vector<32x256xf32>
    %cst_11 = arith.constant dense<0.000000e+00> : vector<32x16xf32>
    %7 = tpu.matmul %1, %0, %cst_11 {dimension_numbers = #tpu.dot_dimension_numbers<[1], [0], [0], [1], [0, 0, 1, 1], [], []>} : vector<32x32xf32>, vector<32x16xf32>, vector<32x16xf32> -> vector<32x16xf32>
    %cst_12 = arith.constant dense<0.000000e+00> : vector<32x256xf32>
    %8 = tpu.matmul %7, %3, %cst_12 {dimension_numbers = #tpu.dot_dimension_numbers<[1], [0], [0], [1], [0, 0, 1, 1], [], []>} : vector<32x16xf32>, vector<16x256xf32>, vector<32x256xf32> -> vector<32x256xf32>
    %9 = arith.addf %6, %8 : vector<32x256xf32>
    %cst_13 = arith.constant dense<0.000000e+00> : vector<32x16xf32>
    %10 = tpu.matmul %2, %0, %cst_13 {dimension_numbers = #tpu.dot_dimension_numbers<[1], [0], [0], [1], [0, 0, 1, 1], [], []>} : vector<32x32xf32>, vector<32x16xf32>, vector<32x16xf32> -> vector<32x16xf32>
    %cst_14 = arith.constant dense<0.000000e+00> : vector<32x256xf32>
    %11 = tpu.matmul %10, %5, %cst_14 {dimension_numbers = #tpu.dot_dimension_numbers<[1], [0], [0], [1], [0, 0, 1, 1], [], []>} : vector<32x16xf32>, vector<16x256xf32>, vector<32x256xf32> -> vector<32x256xf32>
    %12 = arith.addf %9, %11 : vector<32x256xf32>
    %c0_15 = arith.constant 0 : index
    %c0_16 = arith.constant 0 : index
    %13 = vector.load %arg6[%c0_15, %c0_16] : memref<256x256xf32, #tpu.memory_space<vmem>>, vector<256x256xf32>
    %c0_17 = arith.constant 0 : index
    %c0_18 = arith.constant 0 : index
    %14 = vector.load %arg7[%c0_17, %c0_18] : memref<1x256xf32, #tpu.memory_space<vmem>>, vector<1x256xf32>
    %c0_19 = arith.constant 0 : index
    %c0_20 = arith.constant 0 : index
    %15 = vector.load %arg8[%c0_19, %c0_20] : memref<1x256xf32, #tpu.memory_space<vmem>>, vector<1x256xf32>
    %cst_21 = arith.constant dense<0.000000e+00> : vector<256xf32>
    %16 = vector.multi_reduction <add>, %12, %cst_21 [0] : vector<32x256xf32> to vector<256xf32>
    %17 = vector.shape_cast %16 : vector<256xf32> to vector<1x256xf32>
    %cst_22 = arith.constant dense<0.000000e+00> : vector<1x256xf32>
    %18 = tpu.matmul %17, %13, %cst_22 {dimension_numbers = #tpu.dot_dimension_numbers<[1], [0], [0], [1], [0, 0, 1, 1], [], []>} : vector<1x256xf32>, vector<256x256xf32>, vector<1x256xf32> -> vector<1x256xf32>
    %19 = vector.broadcast %18 : vector<1x256xf32> to vector<32x256xf32>
    %20 = arith.subf %12, %19 : vector<32x256xf32>
    %21 = arith.mulf %20, %20 : vector<32x256xf32>
    %cst_23 = arith.constant dense<0.000000e+00> : vector<256xf32>
    %22 = vector.multi_reduction <add>, %21, %cst_23 [0] : vector<32x256xf32> to vector<256xf32>
    %23 = vector.shape_cast %22 : vector<256xf32> to vector<1x256xf32>
    %cst_24 = arith.constant dense<0.000000e+00> : vector<1x256xf32>
    %24 = tpu.matmul %23, %13, %cst_24 {dimension_numbers = #tpu.dot_dimension_numbers<[1], [0], [0], [1], [0, 0, 1, 1], [], []>} : vector<1x256xf32>, vector<256x256xf32>, vector<1x256xf32> -> vector<1x256xf32>
    %cst_25 = arith.constant 9.99999974E-6 : f32
    %25 = vector.broadcast %cst_25 : f32 to vector<1x256xf32>
    %26 = arith.addf %24, %25 : vector<1x256xf32>
    %27 = math.rsqrt %26 : vector<1x256xf32>
    %28 = arith.mulf %14, %27 : vector<1x256xf32>
    %29 = vector.broadcast %28 : vector<1x256xf32> to vector<32x256xf32>
    %30 = arith.mulf %20, %29 : vector<32x256xf32>
    %31 = vector.broadcast %15 : vector<1x256xf32> to vector<32x256xf32>
    %32 = arith.addf %30, %31 : vector<32x256xf32>
    %cst_26 = arith.constant 0.000000e+00 : f32
    %33 = vector.broadcast %cst_26 : f32 to vector<32x256xf32>
    %34 = arith.maximumf %32, %33 : vector<32x256xf32>
    %c0_27 = arith.constant 0 : index
    %c0_28 = arith.constant 0 : index
    %35 = vector.load %arg9[%c0_27, %c0_28] : memref<16x32xf32, #tpu.memory_space<vmem>>, vector<16x32xf32>
    %c0_29 = arith.constant 0 : index
    %c0_30 = arith.constant 0 : index
    %36 = vector.load %arg10[%c0_29, %c0_30] : memref<16x32xf32, #tpu.memory_space<vmem>>, vector<16x32xf32>
    %c0_31 = arith.constant 0 : index
    %c0_32 = arith.constant 0 : index
    %37 = vector.load %arg11[%c0_31, %c0_32] : memref<256x128xf32, #tpu.memory_space<vmem>>, vector<256x128xf32>
    %c0_33 = arith.constant 0 : index
    %c0_34 = arith.constant 0 : index
    %38 = vector.load %arg12[%c0_33, %c0_34] : memref<256x128xf32, #tpu.memory_space<vmem>>, vector<256x128xf32>
    %cst_35 = arith.constant dense<0.000000e+00> : vector<16x256xf32>
    %39 = tpu.matmul %35, %34, %cst_35 {dimension_numbers = #tpu.dot_dimension_numbers<[1], [0], [0], [1], [0, 0, 1, 1], [], []>} : vector<16x32xf32>, vector<32x256xf32>, vector<16x256xf32> -> vector<16x256xf32>
    %cst_36 = arith.constant dense<0.000000e+00> : vector<16x256xf32>
    %40 = tpu.matmul %36, %34, %cst_36 {dimension_numbers = #tpu.dot_dimension_numbers<[1], [0], [0], [1], [0, 0, 1, 1], [], []>} : vector<16x32xf32>, vector<32x256xf32>, vector<16x256xf32> -> vector<16x256xf32>
    %41 = arith.maximumf %39, %40 : vector<16x256xf32>
    %cst_37 = arith.constant dense<0.000000e+00> : vector<16x128xf32>
    %42 = tpu.matmul %41, %37, %cst_37 {dimension_numbers = #tpu.dot_dimension_numbers<[1], [0], [0], [1], [0, 0, 1, 1], [], []>} : vector<16x256xf32>, vector<256x128xf32>, vector<16x128xf32> -> vector<16x128xf32>
    %cst_38 = arith.constant dense<0.000000e+00> : vector<16x128xf32>
    %43 = tpu.matmul %41, %38, %cst_38 {dimension_numbers = #tpu.dot_dimension_numbers<[1], [0], [0], [1], [0, 0, 1, 1], [], []>} : vector<16x256xf32>, vector<256x128xf32>, vector<16x128xf32> -> vector<16x128xf32>
    %44 = arith.maximumf %42, %43 : vector<16x128xf32>
    %c0_39 = arith.constant 0 : index
    %c0_40 = arith.constant 0 : index
    %45 = vector.load %arg13[%c0_39, %c0_40] : memref<16x16xf32, #tpu.memory_space<vmem>>, vector<16x16xf32>
    %c0_41 = arith.constant 0 : index
    %c0_42 = arith.constant 0 : index
    %46 = vector.load %arg14[%c0_41, %c0_42] : memref<16x16xf32, #tpu.memory_space<vmem>>, vector<16x16xf32>
    %c0_43 = arith.constant 0 : index
    %c0_44 = arith.constant 0 : index
    %47 = vector.load %arg15[%c0_43, %c0_44] : memref<128x64xf32, #tpu.memory_space<vmem>>, vector<128x64xf32>
    %c0_45 = arith.constant 0 : index
    %c0_46 = arith.constant 0 : index
    %48 = vector.load %arg16[%c0_45, %c0_46] : memref<128x64xf32, #tpu.memory_space<vmem>>, vector<128x64xf32>
    %c0_47 = arith.constant 0 : index
    %c0_48 = arith.constant 0 : index
    %49 = vector.load %arg17[%c0_47, %c0_48] : memref<128x64xf32, #tpu.memory_space<vmem>>, vector<128x64xf32>
    %cst_49 = arith.constant dense<0.000000e+00> : vector<16x64xf32>
    %50 = tpu.matmul %44, %48, %cst_49 {dimension_numbers = #tpu.dot_dimension_numbers<[1], [0], [0], [1], [0, 0, 1, 1], [], []>} : vector<16x128xf32>, vector<128x64xf32>, vector<16x64xf32> -> vector<16x64xf32>
    %cst_50 = arith.constant dense<0.000000e+00> : vector<16x128xf32>
    %51 = tpu.matmul %45, %44, %cst_50 {dimension_numbers = #tpu.dot_dimension_numbers<[1], [0], [0], [1], [0, 0, 1, 1], [], []>} : vector<16x16xf32>, vector<16x128xf32>, vector<16x128xf32> -> vector<16x128xf32>
    %cst_51 = arith.constant dense<0.000000e+00> : vector<16x64xf32>
    %52 = tpu.matmul %51, %47, %cst_51 {dimension_numbers = #tpu.dot_dimension_numbers<[1], [0], [0], [1], [0, 0, 1, 1], [], []>} : vector<16x128xf32>, vector<128x64xf32>, vector<16x64xf32> -> vector<16x64xf32>
    %53 = arith.addf %50, %52 : vector<16x64xf32>
    %cst_52 = arith.constant dense<0.000000e+00> : vector<16x128xf32>
    %54 = tpu.matmul %46, %44, %cst_52 {dimension_numbers = #tpu.dot_dimension_numbers<[1], [0], [0], [1], [0, 0, 1, 1], [], []>} : vector<16x16xf32>, vector<16x128xf32>, vector<16x128xf32> -> vector<16x128xf32>
    %cst_53 = arith.constant dense<0.000000e+00> : vector<16x64xf32>
    %55 = tpu.matmul %54, %49, %cst_53 {dimension_numbers = #tpu.dot_dimension_numbers<[1], [0], [0], [1], [0, 0, 1, 1], [], []>} : vector<16x128xf32>, vector<128x64xf32>, vector<16x64xf32> -> vector<16x64xf32>
    %56 = arith.addf %53, %55 : vector<16x64xf32>
    %c0_54 = arith.constant 0 : index
    %c0_55 = arith.constant 0 : index
    %57 = vector.load %arg18[%c0_54, %c0_55] : memref<64x64xf32, #tpu.memory_space<vmem>>, vector<64x64xf32>
    %c0_56 = arith.constant 0 : index
    %c0_57 = arith.constant 0 : index
    %58 = vector.load %arg19[%c0_56, %c0_57] : memref<1x64xf32, #tpu.memory_space<vmem>>, vector<1x64xf32>
    %c0_58 = arith.constant 0 : index
    %c0_59 = arith.constant 0 : index
    %59 = vector.load %arg20[%c0_58, %c0_59] : memref<1x64xf32, #tpu.memory_space<vmem>>, vector<1x64xf32>
    %cst_60 = arith.constant dense<0.000000e+00> : vector<64xf32>
    %60 = vector.multi_reduction <add>, %56, %cst_60 [0] : vector<16x64xf32> to vector<64xf32>
    %61 = vector.shape_cast %60 : vector<64xf32> to vector<1x64xf32>
    %cst_61 = arith.constant dense<0.000000e+00> : vector<1x64xf32>
    %62 = tpu.matmul %61, %57, %cst_61 {dimension_numbers = #tpu.dot_dimension_numbers<[1], [0], [0], [1], [0, 0, 1, 1], [], []>} : vector<1x64xf32>, vector<64x64xf32>, vector<1x64xf32> -> vector<1x64xf32>
    %63 = vector.broadcast %62 : vector<1x64xf32> to vector<16x64xf32>
    %64 = arith.subf %56, %63 : vector<16x64xf32>
    %65 = arith.mulf %64, %64 : vector<16x64xf32>
    %cst_62 = arith.constant dense<0.000000e+00> : vector<64xf32>
    %66 = vector.multi_reduction <add>, %65, %cst_62 [0] : vector<16x64xf32> to vector<64xf32>
    %67 = vector.shape_cast %66 : vector<64xf32> to vector<1x64xf32>
    %cst_63 = arith.constant dense<0.000000e+00> : vector<1x64xf32>
    %68 = tpu.matmul %67, %57, %cst_63 {dimension_numbers = #tpu.dot_dimension_numbers<[1], [0], [0], [1], [0, 0, 1, 1], [], []>} : vector<1x64xf32>, vector<64x64xf32>, vector<1x64xf32> -> vector<1x64xf32>
    %cst_64 = arith.constant 9.99999974E-6 : f32
    %69 = vector.broadcast %cst_64 : f32 to vector<1x64xf32>
    %70 = arith.addf %68, %69 : vector<1x64xf32>
    %71 = math.rsqrt %70 : vector<1x64xf32>
    %72 = arith.mulf %58, %71 : vector<1x64xf32>
    %73 = vector.broadcast %72 : vector<1x64xf32> to vector<16x64xf32>
    %74 = arith.mulf %64, %73 : vector<16x64xf32>
    %75 = vector.broadcast %59 : vector<1x64xf32> to vector<16x64xf32>
    %76 = arith.addf %74, %75 : vector<16x64xf32>
    %cst_65 = arith.constant 0.000000e+00 : f32
    %77 = vector.broadcast %cst_65 : f32 to vector<16x64xf32>
    %78 = arith.maximumf %76, %77 : vector<16x64xf32>
    %c0_66 = arith.constant 0 : index
    %c0_67 = arith.constant 0 : index
    %79 = vector.load %arg21[%c0_66, %c0_67] : memref<8x16xf32, #tpu.memory_space<vmem>>, vector<8x16xf32>
    %c0_68 = arith.constant 0 : index
    %c0_69 = arith.constant 0 : index
    %80 = vector.load %arg22[%c0_68, %c0_69] : memref<8x16xf32, #tpu.memory_space<vmem>>, vector<8x16xf32>
    %c0_70 = arith.constant 0 : index
    %c0_71 = arith.constant 0 : index
    %81 = vector.load %arg23[%c0_70, %c0_71] : memref<64x32xf32, #tpu.memory_space<vmem>>, vector<64x32xf32>
    %c0_72 = arith.constant 0 : index
    %c0_73 = arith.constant 0 : index
    %82 = vector.load %arg24[%c0_72, %c0_73] : memref<64x32xf32, #tpu.memory_space<vmem>>, vector<64x32xf32>
    %cst_74 = arith.constant dense<0.000000e+00> : vector<8x64xf32>
    %83 = tpu.matmul %79, %78, %cst_74 {dimension_numbers = #tpu.dot_dimension_numbers<[1], [0], [0], [1], [0, 0, 1, 1], [], []>} : vector<8x16xf32>, vector<16x64xf32>, vector<8x64xf32> -> vector<8x64xf32>
    %cst_75 = arith.constant dense<0.000000e+00> : vector<8x64xf32>
    %84 = tpu.matmul %80, %78, %cst_75 {dimension_numbers = #tpu.dot_dimension_numbers<[1], [0], [0], [1], [0, 0, 1, 1], [], []>} : vector<8x16xf32>, vector<16x64xf32>, vector<8x64xf32> -> vector<8x64xf32>
    %85 = arith.maximumf %83, %84 : vector<8x64xf32>
    %cst_76 = arith.constant dense<0.000000e+00> : vector<8x32xf32>
    %86 = tpu.matmul %85, %81, %cst_76 {dimension_numbers = #tpu.dot_dimension_numbers<[1], [0], [0], [1], [0, 0, 1, 1], [], []>} : vector<8x64xf32>, vector<64x32xf32>, vector<8x32xf32> -> vector<8x32xf32>
    %cst_77 = arith.constant dense<0.000000e+00> : vector<8x32xf32>
    %87 = tpu.matmul %85, %82, %cst_77 {dimension_numbers = #tpu.dot_dimension_numbers<[1], [0], [0], [1], [0, 0, 1, 1], [], []>} : vector<8x64xf32>, vector<64x32xf32>, vector<8x32xf32> -> vector<8x32xf32>
    %88 = arith.maximumf %86, %87 : vector<8x32xf32>
    %c0_78 = arith.constant 0 : index
    %c0_79 = arith.constant 0 : index
    %89 = vector.load %arg25[%c0_78, %c0_79] : memref<8x8xf32, #tpu.memory_space<vmem>>, vector<8x8xf32>
    %c0_80 = arith.constant 0 : index
    %c0_81 = arith.constant 0 : index
    %90 = vector.load %arg26[%c0_80, %c0_81] : memref<8x8xf32, #tpu.memory_space<vmem>>, vector<8x8xf32>
    %c0_82 = arith.constant 0 : index
    %c0_83 = arith.constant 0 : index
    %91 = vector.load %arg27[%c0_82, %c0_83] : memref<32x16xf32, #tpu.memory_space<vmem>>, vector<32x16xf32>
    %c0_84 = arith.constant 0 : index
    %c0_85 = arith.constant 0 : index
    %92 = vector.load %arg28[%c0_84, %c0_85] : memref<32x16xf32, #tpu.memory_space<vmem>>, vector<32x16xf32>
    %c0_86 = arith.constant 0 : index
    %c0_87 = arith.constant 0 : index
    %93 = vector.load %arg29[%c0_86, %c0_87] : memref<32x16xf32, #tpu.memory_space<vmem>>, vector<32x16xf32>
    %cst_88 = arith.constant dense<0.000000e+00> : vector<8x16xf32>
    %94 = tpu.matmul %88, %92, %cst_88 {dimension_numbers = #tpu.dot_dimension_numbers<[1], [0], [0], [1], [0, 0, 1, 1], [], []>} : vector<8x32xf32>, vector<32x16xf32>, vector<8x16xf32> -> vector<8x16xf32>
    %cst_89 = arith.constant dense<0.000000e+00> : vector<8x32xf32>
    %95 = tpu.matmul %89, %88, %cst_89 {dimension_numbers = #tpu.dot_dimension_numbers<[1], [0], [0], [1], [0, 0, 1, 1], [], []>} : vector<8x8xf32>, vector<8x32xf32>, vector<8x32xf32> -> vector<8x32xf32>
    %cst_90 = arith.constant dense<0.000000e+00> : vector<8x16xf32>
    %96 = tpu.matmul %95, %91, %cst_90 {dimension_numbers = #tpu.dot_dimension_numbers<[1], [0], [0], [1], [0, 0, 1, 1], [], []>} : vector<8x32xf32>, vector<32x16xf32>, vector<8x16xf32> -> vector<8x16xf32>
    %97 = arith.addf %94, %96 : vector<8x16xf32>
    %cst_91 = arith.constant dense<0.000000e+00> : vector<8x32xf32>
    %98 = tpu.matmul %90, %88, %cst_91 {dimension_numbers = #tpu.dot_dimension_numbers<[1], [0], [0], [1], [0, 0, 1, 1], [], []>} : vector<8x8xf32>, vector<8x32xf32>, vector<8x32xf32> -> vector<8x32xf32>
    %cst_92 = arith.constant dense<0.000000e+00> : vector<8x16xf32>
    %99 = tpu.matmul %98, %93, %cst_92 {dimension_numbers = #tpu.dot_dimension_numbers<[1], [0], [0], [1], [0, 0, 1, 1], [], []>} : vector<8x32xf32>, vector<32x16xf32>, vector<8x16xf32> -> vector<8x16xf32>
    %100 = arith.addf %97, %99 : vector<8x16xf32>
    %c0_93 = arith.constant 0 : index
    %c0_94 = arith.constant 0 : index
    %101 = vector.load %arg30[%c0_93, %c0_94] : memref<16x16xf32, #tpu.memory_space<vmem>>, vector<16x16xf32>
    %c0_95 = arith.constant 0 : index
    %c0_96 = arith.constant 0 : index
    %102 = vector.load %arg31[%c0_95, %c0_96] : memref<1x16xf32, #tpu.memory_space<vmem>>, vector<1x16xf32>
    %c0_97 = arith.constant 0 : index
    %c0_98 = arith.constant 0 : index
    %103 = vector.load %arg32[%c0_97, %c0_98] : memref<1x16xf32, #tpu.memory_space<vmem>>, vector<1x16xf32>
    %cst_99 = arith.constant dense<0.000000e+00> : vector<16xf32>
    %104 = vector.multi_reduction <add>, %100, %cst_99 [0] : vector<8x16xf32> to vector<16xf32>
    %105 = vector.shape_cast %104 : vector<16xf32> to vector<1x16xf32>
    %cst_100 = arith.constant dense<0.000000e+00> : vector<1x16xf32>
    %106 = tpu.matmul %105, %101, %cst_100 {dimension_numbers = #tpu.dot_dimension_numbers<[1], [0], [0], [1], [0, 0, 1, 1], [], []>} : vector<1x16xf32>, vector<16x16xf32>, vector<1x16xf32> -> vector<1x16xf32>
    %107 = vector.broadcast %106 : vector<1x16xf32> to vector<8x16xf32>
    %108 = arith.subf %100, %107 : vector<8x16xf32>
    %109 = arith.mulf %108, %108 : vector<8x16xf32>
    %cst_101 = arith.constant dense<0.000000e+00> : vector<16xf32>
    %110 = vector.multi_reduction <add>, %109, %cst_101 [0] : vector<8x16xf32> to vector<16xf32>
    %111 = vector.shape_cast %110 : vector<16xf32> to vector<1x16xf32>
    %cst_102 = arith.constant dense<0.000000e+00> : vector<1x16xf32>
    %112 = tpu.matmul %111, %101, %cst_102 {dimension_numbers = #tpu.dot_dimension_numbers<[1], [0], [0], [1], [0, 0, 1, 1], [], []>} : vector<1x16xf32>, vector<16x16xf32>, vector<1x16xf32> -> vector<1x16xf32>
    %cst_103 = arith.constant 9.99999974E-6 : f32
    %113 = vector.broadcast %cst_103 : f32 to vector<1x16xf32>
    %114 = arith.addf %112, %113 : vector<1x16xf32>
    %115 = math.rsqrt %114 : vector<1x16xf32>
    %116 = arith.mulf %102, %115 : vector<1x16xf32>
    %117 = vector.broadcast %116 : vector<1x16xf32> to vector<8x16xf32>
    %118 = arith.mulf %108, %117 : vector<8x16xf32>
    %119 = vector.broadcast %103 : vector<1x16xf32> to vector<8x16xf32>
    %120 = arith.addf %118, %119 : vector<8x16xf32>
    %cst_104 = arith.constant 0.000000e+00 : f32
    %121 = vector.broadcast %cst_104 : f32 to vector<8x16xf32>
    %122 = arith.maximumf %120, %121 : vector<8x16xf32>
    %c0_105 = arith.constant 0 : index
    %c0_106 = arith.constant 0 : index
    %123 = vector.load %arg33[%c0_105, %c0_106] : memref<8x8xf32, #tpu.memory_space<vmem>>, vector<8x8xf32>
    %c0_107 = arith.constant 0 : index
    %c0_108 = arith.constant 0 : index
    %124 = vector.load %arg34[%c0_107, %c0_108] : memref<8x8xf32, #tpu.memory_space<vmem>>, vector<8x8xf32>
    %c0_109 = arith.constant 0 : index
    %c0_110 = arith.constant 0 : index
    %125 = vector.load %arg35[%c0_109, %c0_110] : memref<16x32xf32, #tpu.memory_space<vmem>>, vector<16x32xf32>
    %c0_111 = arith.constant 0 : index
    %c0_112 = arith.constant 0 : index
    %126 = vector.load %arg36[%c0_111, %c0_112] : memref<16x32xf32, #tpu.memory_space<vmem>>, vector<16x32xf32>
    %c0_113 = arith.constant 0 : index
    %c0_114 = arith.constant 0 : index
    %127 = vector.load %arg37[%c0_113, %c0_114] : memref<16x32xf32, #tpu.memory_space<vmem>>, vector<16x32xf32>
    %cst_115 = arith.constant dense<0.000000e+00> : vector<8x32xf32>
    %128 = tpu.matmul %122, %126, %cst_115 {dimension_numbers = #tpu.dot_dimension_numbers<[1], [0], [0], [1], [0, 0, 1, 1], [], []>} : vector<8x16xf32>, vector<16x32xf32>, vector<8x32xf32> -> vector<8x32xf32>
    %cst_116 = arith.constant dense<0.000000e+00> : vector<8x16xf32>
    %129 = tpu.matmul %123, %122, %cst_116 {dimension_numbers = #tpu.dot_dimension_numbers<[1], [0], [0], [1], [0, 0, 1, 1], [], []>} : vector<8x8xf32>, vector<8x16xf32>, vector<8x16xf32> -> vector<8x16xf32>
    %cst_117 = arith.constant dense<0.000000e+00> : vector<8x32xf32>
    %130 = tpu.matmul %129, %125, %cst_117 {dimension_numbers = #tpu.dot_dimension_numbers<[1], [0], [0], [1], [0, 0, 1, 1], [], []>} : vector<8x16xf32>, vector<16x32xf32>, vector<8x32xf32> -> vector<8x32xf32>
    %131 = arith.addf %128, %130 : vector<8x32xf32>
    %cst_118 = arith.constant dense<0.000000e+00> : vector<8x16xf32>
    %132 = tpu.matmul %124, %122, %cst_118 {dimension_numbers = #tpu.dot_dimension_numbers<[1], [0], [0], [1], [0, 0, 1, 1], [], []>} : vector<8x8xf32>, vector<8x16xf32>, vector<8x16xf32> -> vector<8x16xf32>
    %cst_119 = arith.constant dense<0.000000e+00> : vector<8x32xf32>
    %133 = tpu.matmul %132, %127, %cst_119 {dimension_numbers = #tpu.dot_dimension_numbers<[1], [0], [0], [1], [0, 0, 1, 1], [], []>} : vector<8x16xf32>, vector<16x32xf32>, vector<8x32xf32> -> vector<8x32xf32>
    %134 = arith.addf %131, %133 : vector<8x32xf32>
    %c0_120 = arith.constant 0 : index
    %c0_121 = arith.constant 0 : index
    %135 = vector.load %arg38[%c0_120, %c0_121] : memref<32x32xf32, #tpu.memory_space<vmem>>, vector<32x32xf32>
    %c0_122 = arith.constant 0 : index
    %c0_123 = arith.constant 0 : index
    %136 = vector.load %arg39[%c0_122, %c0_123] : memref<1x32xf32, #tpu.memory_space<vmem>>, vector<1x32xf32>
    %c0_124 = arith.constant 0 : index
    %c0_125 = arith.constant 0 : index
    %137 = vector.load %arg40[%c0_124, %c0_125] : memref<1x32xf32, #tpu.memory_space<vmem>>, vector<1x32xf32>
    %cst_126 = arith.constant dense<0.000000e+00> : vector<32xf32>
    %138 = vector.multi_reduction <add>, %134, %cst_126 [0] : vector<8x32xf32> to vector<32xf32>
    %139 = vector.shape_cast %138 : vector<32xf32> to vector<1x32xf32>
    %cst_127 = arith.constant dense<0.000000e+00> : vector<1x32xf32>
    %140 = tpu.matmul %139, %135, %cst_127 {dimension_numbers = #tpu.dot_dimension_numbers<[1], [0], [0], [1], [0, 0, 1, 1], [], []>} : vector<1x32xf32>, vector<32x32xf32>, vector<1x32xf32> -> vector<1x32xf32>
    %141 = vector.broadcast %140 : vector<1x32xf32> to vector<8x32xf32>
    %142 = arith.subf %134, %141 : vector<8x32xf32>
    %143 = arith.mulf %142, %142 : vector<8x32xf32>
    %cst_128 = arith.constant dense<0.000000e+00> : vector<32xf32>
    %144 = vector.multi_reduction <add>, %143, %cst_128 [0] : vector<8x32xf32> to vector<32xf32>
    %145 = vector.shape_cast %144 : vector<32xf32> to vector<1x32xf32>
    %cst_129 = arith.constant dense<0.000000e+00> : vector<1x32xf32>
    %146 = tpu.matmul %145, %135, %cst_129 {dimension_numbers = #tpu.dot_dimension_numbers<[1], [0], [0], [1], [0, 0, 1, 1], [], []>} : vector<1x32xf32>, vector<32x32xf32>, vector<1x32xf32> -> vector<1x32xf32>
    %cst_130 = arith.constant 9.99999974E-6 : f32
    %147 = vector.broadcast %cst_130 : f32 to vector<1x32xf32>
    %148 = arith.addf %146, %147 : vector<1x32xf32>
    %149 = math.rsqrt %148 : vector<1x32xf32>
    %150 = arith.mulf %136, %149 : vector<1x32xf32>
    %151 = vector.broadcast %150 : vector<1x32xf32> to vector<8x32xf32>
    %152 = arith.mulf %142, %151 : vector<8x32xf32>
    %153 = vector.broadcast %137 : vector<1x32xf32> to vector<8x32xf32>
    %154 = arith.addf %152, %153 : vector<8x32xf32>
    %cst_131 = arith.constant 0.000000e+00 : f32
    %155 = vector.broadcast %cst_131 : f32 to vector<8x32xf32>
    %156 = arith.maximumf %154, %155 : vector<8x32xf32>
    %c0_132 = arith.constant 0 : index
    %c0_133 = arith.constant 0 : index
    %157 = vector.load %arg41[%c0_132, %c0_133] : memref<16x8xf32, #tpu.memory_space<vmem>>, vector<16x8xf32>
    %c0_134 = arith.constant 0 : index
    %c0_135 = arith.constant 0 : index
    %158 = vector.load %arg42[%c0_134, %c0_135] : memref<16x8xf32, #tpu.memory_space<vmem>>, vector<16x8xf32>
    %c0_136 = arith.constant 0 : index
    %c0_137 = arith.constant 0 : index
    %159 = vector.load %arg43[%c0_136, %c0_137] : memref<32x128xf32, #tpu.memory_space<vmem>>, vector<32x128xf32>
    %c0_138 = arith.constant 0 : index
    %c0_139 = arith.constant 0 : index
    %160 = vector.load %arg44[%c0_138, %c0_139] : memref<32x128xf32, #tpu.memory_space<vmem>>, vector<32x128xf32>
    %cst_140 = arith.constant dense<0.000000e+00> : vector<16x32xf32>
    %161 = tpu.matmul %157, %156, %cst_140 {dimension_numbers = #tpu.dot_dimension_numbers<[1], [0], [0], [1], [0, 0, 1, 1], [], []>} : vector<16x8xf32>, vector<8x32xf32>, vector<16x32xf32> -> vector<16x32xf32>
    %cst_141 = arith.constant dense<0.000000e+00> : vector<16x128xf32>
    %162 = tpu.matmul %161, %159, %cst_141 {dimension_numbers = #tpu.dot_dimension_numbers<[1], [0], [0], [1], [0, 0, 1, 1], [], []>} : vector<16x32xf32>, vector<32x128xf32>, vector<16x128xf32> -> vector<16x128xf32>
    %cst_142 = arith.constant dense<0.000000e+00> : vector<16x32xf32>
    %163 = tpu.matmul %158, %156, %cst_142 {dimension_numbers = #tpu.dot_dimension_numbers<[1], [0], [0], [1], [0, 0, 1, 1], [], []>} : vector<16x8xf32>, vector<8x32xf32>, vector<16x32xf32> -> vector<16x32xf32>
    %cst_143 = arith.constant dense<0.000000e+00> : vector<16x128xf32>
    %164 = tpu.matmul %163, %160, %cst_143 {dimension_numbers = #tpu.dot_dimension_numbers<[1], [0], [0], [1], [0, 0, 1, 1], [], []>} : vector<16x32xf32>, vector<32x128xf32>, vector<16x128xf32> -> vector<16x128xf32>
    %165 = arith.addf %162, %164 : vector<16x128xf32>
    %c0_144 = arith.constant 0 : index
    %c0_145 = arith.constant 0 : index
    %166 = vector.load %arg45[%c0_144, %c0_145] : memref<128x128xf32, #tpu.memory_space<vmem>>, vector<128x128xf32>
    %c0_146 = arith.constant 0 : index
    %c0_147 = arith.constant 0 : index
    %167 = vector.load %arg46[%c0_146, %c0_147] : memref<1x128xf32, #tpu.memory_space<vmem>>, vector<1x128xf32>
    %c0_148 = arith.constant 0 : index
    %c0_149 = arith.constant 0 : index
    %168 = vector.load %arg47[%c0_148, %c0_149] : memref<1x128xf32, #tpu.memory_space<vmem>>, vector<1x128xf32>
    %cst_150 = arith.constant dense<0.000000e+00> : vector<128xf32>
    %169 = vector.multi_reduction <add>, %165, %cst_150 [0] : vector<16x128xf32> to vector<128xf32>
    %170 = vector.shape_cast %169 : vector<128xf32> to vector<1x128xf32>
    %cst_151 = arith.constant dense<0.000000e+00> : vector<1x128xf32>
    %171 = tpu.matmul %170, %166, %cst_151 {dimension_numbers = #tpu.dot_dimension_numbers<[1], [0], [0], [1], [0, 0, 1, 1], [], []>} : vector<1x128xf32>, vector<128x128xf32>, vector<1x128xf32> -> vector<1x128xf32>
    %172 = vector.broadcast %171 : vector<1x128xf32> to vector<16x128xf32>
    %173 = arith.subf %165, %172 : vector<16x128xf32>
    %174 = arith.mulf %173, %173 : vector<16x128xf32>
    %cst_152 = arith.constant dense<0.000000e+00> : vector<128xf32>
    %175 = vector.multi_reduction <add>, %174, %cst_152 [0] : vector<16x128xf32> to vector<128xf32>
    %176 = vector.shape_cast %175 : vector<128xf32> to vector<1x128xf32>
    %cst_153 = arith.constant dense<0.000000e+00> : vector<1x128xf32>
    %177 = tpu.matmul %176, %166, %cst_153 {dimension_numbers = #tpu.dot_dimension_numbers<[1], [0], [0], [1], [0, 0, 1, 1], [], []>} : vector<1x128xf32>, vector<128x128xf32>, vector<1x128xf32> -> vector<1x128xf32>
    %cst_154 = arith.constant 9.99999974E-6 : f32
    %178 = vector.broadcast %cst_154 : f32 to vector<1x128xf32>
    %179 = arith.addf %177, %178 : vector<1x128xf32>
    %180 = math.rsqrt %179 : vector<1x128xf32>
    %181 = arith.mulf %167, %180 : vector<1x128xf32>
    %182 = vector.broadcast %181 : vector<1x128xf32> to vector<16x128xf32>
    %183 = arith.mulf %173, %182 : vector<16x128xf32>
    %184 = vector.broadcast %168 : vector<1x128xf32> to vector<16x128xf32>
    %185 = arith.addf %183, %184 : vector<16x128xf32>
    %cst_155 = arith.constant 0.000000e+00 : f32
    %186 = vector.broadcast %cst_155 : f32 to vector<16x128xf32>
    %187 = arith.maximumf %185, %186 : vector<16x128xf32>
    %c0_156 = arith.constant 0 : index
    %c0_157 = arith.constant 0 : index
    %188 = vector.load %arg48[%c0_156, %c0_157] : memref<32x16xf32, #tpu.memory_space<vmem>>, vector<32x16xf32>
    %c0_158 = arith.constant 0 : index
    %c0_159 = arith.constant 0 : index
    %189 = vector.load %arg49[%c0_158, %c0_159] : memref<32x16xf32, #tpu.memory_space<vmem>>, vector<32x16xf32>
    %c0_160 = arith.constant 0 : index
    %c0_161 = arith.constant 0 : index
    %190 = vector.load %arg50[%c0_160, %c0_161] : memref<128x16xf32, #tpu.memory_space<vmem>>, vector<128x16xf32>
    %c0_162 = arith.constant 0 : index
    %c0_163 = arith.constant 0 : index
    %191 = vector.load %arg51[%c0_162, %c0_163] : memref<128x16xf32, #tpu.memory_space<vmem>>, vector<128x16xf32>
    %cst_164 = arith.constant dense<0.000000e+00> : vector<32x128xf32>
    %192 = tpu.matmul %188, %187, %cst_164 {dimension_numbers = #tpu.dot_dimension_numbers<[1], [0], [0], [1], [0, 0, 1, 1], [], []>} : vector<32x16xf32>, vector<16x128xf32>, vector<32x128xf32> -> vector<32x128xf32>
    %cst_165 = arith.constant dense<0.000000e+00> : vector<32x16xf32>
    %193 = tpu.matmul %192, %190, %cst_165 {dimension_numbers = #tpu.dot_dimension_numbers<[1], [0], [0], [1], [0, 0, 1, 1], [], []>} : vector<32x128xf32>, vector<128x16xf32>, vector<32x16xf32> -> vector<32x16xf32>
    %cst_166 = arith.constant dense<0.000000e+00> : vector<32x128xf32>
    %194 = tpu.matmul %189, %187, %cst_166 {dimension_numbers = #tpu.dot_dimension_numbers<[1], [0], [0], [1], [0, 0, 1, 1], [], []>} : vector<32x16xf32>, vector<16x128xf32>, vector<32x128xf32> -> vector<32x128xf32>
    %cst_167 = arith.constant dense<0.000000e+00> : vector<32x16xf32>
    %195 = tpu.matmul %194, %191, %cst_167 {dimension_numbers = #tpu.dot_dimension_numbers<[1], [0], [0], [1], [0, 0, 1, 1], [], []>} : vector<32x128xf32>, vector<128x16xf32>, vector<32x16xf32> -> vector<32x16xf32>
    %196 = arith.addf %193, %195 : vector<32x16xf32>
    %c0_168 = arith.constant 0 : index
    %c0_169 = arith.constant 0 : index
    %197 = vector.load %arg52[%c0_168, %c0_169] : memref<1x1xf32, #tpu.memory_space<vmem>>, vector<1x1xf32>
    %198 = vector.broadcast %197 : vector<1x1xf32> to vector<32x16xf32>
    %199 = arith.addf %196, %198 : vector<32x16xf32>
    %cst_170 = arith.constant 0.000000e+00 : f32
    %200 = vector.broadcast %cst_170 : f32 to vector<32x16xf32>
    %201 = arith.subf %200, %199 : vector<32x16xf32>
    %202 = math.exp %201 : vector<32x16xf32>
    %cst_171 = arith.constant 1.000000e+00 : f32
    %203 = vector.broadcast %cst_171 : f32 to vector<32x16xf32>
    %204 = arith.addf %203, %202 : vector<32x16xf32>
    %cst_172 = arith.constant 1.000000e+00 : f32
    %205 = vector.broadcast %cst_172 : f32 to vector<32x16xf32>
    %206 = arith.divf %205, %204 : vector<32x16xf32>
    %c0_173 = arith.constant 0 : index
    %c0_174 = arith.constant 0 : index
    %207 = vector.load %arg53[%c0_173, %c0_174] : memref<32x16xf32, #tpu.memory_space<vmem>>, vector<32x16xf32>
    tpu.vector_store %arg53[%c0_173, %c0_174], %206 {strides = array<i32>} : memref<32x16xf32, #tpu.memory_space<vmem>>, vector<32x16xf32>,
    return
  }
}

</mosaic_0001>

<bundles_post_ra>
// kernel: autoencoder_forward.1
= control target key start
LH: loop header
LB: loop body
LE: loop exit
PB: predicated region body
PF: predicated region fallthrough
CT: control target
= control target key end

     0   :  { %s6297_s6 = smov 1   ;;  %s6298_s10 = smov 2   ;;  %s7322_s0 = inlined_call_operand.smem [shape: u32[54], index: -1, kind: input, shape index: {}] }
   0x1   :  { %s6366_s5 = sld [smem:[%s7322_s0]]   ;;  %s6299_s14 = smov 3  }
   0x2   :  { %s6371_s9 = sld [smem:[%s7322_s0 + %s6297_s6]]   ;;  %s6300_s18 = smov 4  }
   0x3   :  { %s6376_s13 = sld [smem:[%s7322_s0 + %s6298_s10]]   ;;  %s6301_s22 = smov 5  }
   0x4   :  { %s6381_s17 = sld [smem:[%s7322_s0 + %s6299_s14]]   ;;  %s6302_s26 = smov 6  }
   0x5   :  { %s6386_s21 = sld [smem:[%s7322_s0 + %s6300_s18]]   ;;  %s6303_s30 = smov 7  }
   0x6   :  { %s6391_s25 = sld [smem:[%s7322_s0 + %s6301_s22]]   ;;  %s6304_s4 = smov 8  }
   0x7   :  { %s6396_s29 = sld [smem:[%s7322_s0 + %s6302_s26]]   ;;  %s6305_s10 = smov 9  }
   0x8   :  { %s6401_s3 = sld [smem:[%s7322_s0 + %s6303_s30]]   ;;  %s6306_s15 = smov 10  }
   0x9   :  { %s6406_s8 = sld [smem:[%s7322_s0 + %s6304_s4]]   ;;  %s6307_s20 = smov 11  }
   0xa   :  { %s6411_s14 = sld [smem:[%s7322_s0 + %s6305_s10]]   ;;  %s6308_s26 = smov 12  }
   0xb   :  { %s6416_s19 = sld [smem:[%s7322_s0 + %s6306_s15]]   ;;  %s6309_s1 = smov 13  }
   0xc   :  { %s6421_s24 = sld [smem:[%s7322_s0 + %s6307_s20]]   ;;  %s6310_s7 = smov 14  }
   0xd   :  { %s6426_s30 = sld [smem:[%s7322_s0 + %s6308_s26]]   ;;  %s6311_s15 = smov 15  }
   0xe   :  { %s6431_s6 = sld [smem:[%s7322_s0 + %s6309_s1]]   ;;  %s6312_s22 = smov 16  }
   0xf   :  { %s6436_s12 = sld [smem:[%s7322_s0 + %s6310_s7]]   ;;  %s6313_s28 = smov 17  }
  0x10   :  { %s6441_s20 = sld [smem:[%s7322_s0 + %s6311_s15]]   ;;  %s6314_s7 = smov 18  }
  0x11   :  { %s6446_s27 = sld [smem:[%s7322_s0 + %s6312_s22]]   ;;  %s6315_s15 = smov 19  }
  0x12   :  { %s6451_s4 = sld [smem:[%s7322_s0 + %s6313_s28]]   ;;  %s6316_s22 = smov 20  }
  0x13   :  { %s6317_s28 = smov 21   ;;  %s6349_s1 = smov 53  }
  0x15   :  { %7345 = sst [smem:[#allocation6_spill]] %s6436_s12 }
  0x16   :  { %7346 = sst [smem:[#allocation7_spill]] %s6441_s20 }
  0x17   :  { %7347 = sst [smem:[#allocation8_spill]] %s6446_s27 }
  0x18   :  { %7348 = sst [smem:[#allocation9_spill]] %s6451_s4 }
  0x19   :  { %s6456_s12 = sld [smem:[%s7322_s0 + %s6314_s7]]   ;;  %s6318_s7 = smov 22  }
  0x1a   :  { %s6461_s20 = sld [smem:[%s7322_s0 + %s6315_s15]]   ;;  %s6319_s15 = smov 23  }
  0x1b   :  { %s6466_s27 = sld [smem:[%s7322_s0 + %s6316_s22]]   ;;  %s6320_s22 = smov 24  }
  0x1c   :  { %s6471_s4 = sld [smem:[%s7322_s0 + %s6317_s28]]   ;;  %s6321_s28 = smov 25  }
  0x1f   :  { %7349 = sst [smem:[#allocation10_spill]] %s6456_s12 }
  0x20   :  { %7350 = sst [smem:[#allocation11_spill]] %s6461_s20 }
  0x21   :  { %7351 = sst [smem:[#allocation12_spill]] %s6466_s27 }
  0x22   :  { %7352 = sst [smem:[#allocation13_spill]] %s6471_s4 }
  0x23   :  { %s6476_s12 = sld [smem:[%s7322_s0 + %s6318_s7]]   ;;  %s6322_s7 = smov 26  }
  0x24   :  { %s6481_s20 = sld [smem:[%s7322_s0 + %s6319_s15]]   ;;  %s6323_s15 = smov 27  }
  0x25   :  { %s6486_s27 = sld [smem:[%s7322_s0 + %s6320_s22]]   ;;  %s6324_s22 = smov 28  }
  0x26   :  { %s6491_s4 = sld [smem:[%s7322_s0 + %s6321_s28]]   ;;  %s6325_s28 = smov 29  }
  0x29   :  { %7353 = sst [smem:[#allocation14_spill]] %s6476_s12 }
  0x2a   :  { %7354 = sst [smem:[#allocation15_spill]] %s6481_s20 }
  0x2b   :  { %7355 = sst [smem:[#allocation16_spill]] %s6486_s27 }
  0x2c   :  { %7356 = sst [smem:[#allocation17_spill]] %s6491_s4 }
  0x2d   :  { %s6496_s12 = sld [smem:[%s7322_s0 + %s6322_s7]]   ;;  %s6326_s7 = smov 30  }
  0x2e   :  { %s6501_s20 = sld [smem:[%s7322_s0 + %s6323_s15]]   ;;  %s6327_s15 = smov 31  }
  0x2f   :  { %s6506_s27 = sld [smem:[%s7322_s0 + %s6324_s22]]   ;;  %s6328_s22 = smov 32  }
  0x30   :  { %s6511_s4 = sld [smem:[%s7322_s0 + %s6325_s28]]   ;;  %s6329_s28 = smov 33  }
  0x33   :  { %7357 = sst [smem:[#allocation18_spill]] %s6496_s12 }
  0x34   :  { %7358 = sst [smem:[#allocation19_spill]] %s6501_s20 }
  0x35   :  { %7359 = sst [smem:[#allocation20_spill]] %s6506_s27 }
  0x36   :  { %7360 = sst [smem:[#allocation21_spill]] %s6511_s4 }
  0x37   :  { %s6516_s12 = sld [smem:[%s7322_s0 + %s6326_s7]]   ;;  %s6330_s7 = smov 34  }
  0x38   :  { %s6521_s20 = sld [smem:[%s7322_s0 + %s6327_s15]]   ;;  %s6331_s15 = smov 35  }
  0x39   :  { %s6526_s27 = sld [smem:[%s7322_s0 + %s6328_s22]]   ;;  %s6332_s22 = smov 36  }
  0x3a   :  { %s6531_s4 = sld [smem:[%s7322_s0 + %s6329_s28]]   ;;  %s6333_s28 = smov 37  }
  0x3d   :  { %7361 = sst [smem:[#allocation22_spill]] %s6516_s12 }
  0x3e   :  { %7362 = sst [smem:[#allocation23_spill]] %s6521_s20 }
  0x3f   :  { %7363 = sst [smem:[#allocation24_spill]] %s6526_s27 }
  0x40   :  { %7364 = sst [smem:[#allocation25_spill]] %s6531_s4 }
  0x41   :  { %s6536_s12 = sld [smem:[%s7322_s0 + %s6330_s7]]   ;;  %s6334_s7 = smov 38  }
  0x42   :  { %s6541_s20 = sld [smem:[%s7322_s0 + %s6331_s15]]   ;;  %s6335_s15 = smov 39  }
  0x43   :  { %s6546_s27 = sld [smem:[%s7322_s0 + %s6332_s22]]   ;;  %s6336_s22 = smov 40  }
  0x44   :  { %s6551_s4 = sld [smem:[%s7322_s0 + %s6333_s28]]   ;;  %s6337_s28 = smov 41  }
  0x47   :  { %7365 = sst [smem:[#allocation26_spill]] %s6536_s12 }
  0x48   :  { %7366 = sst [smem:[#allocation27_spill]] %s6541_s20 }
  0x49   :  { %7367 = sst [smem:[#allocation28_spill]] %s6546_s27 }
  0x4a   :  { %7368 = sst [smem:[#allocation29_spill]] %s6551_s4 }
  0x4b   :  { %s6556_s12 = sld [smem:[%s7322_s0 + %s6334_s7]]   ;;  %s6338_s7 = smov 42  }
  0x4c   :  { %s6561_s20 = sld [smem:[%s7322_s0 + %s6335_s15]]   ;;  %s6339_s15 = smov 43  }
  0x4d   :  { %s6566_s27 = sld [smem:[%s7322_s0 + %s6336_s22]]   ;;  %s6340_s22 = smov 44  }
  0x4e   :  { %s6571_s4 = sld [smem:[%s7322_s0 + %s6337_s28]]   ;;  %s6341_s28 = smov 45  }
  0x51   :  { %7369 = sst [smem:[#allocation30_spill]] %s6556_s12 }
  0x52   :  { %7370 = sst [smem:[#allocation31_spill]] %s6561_s20 }
  0x53   :  { %7371 = sst [smem:[#allocation32_spill]] %s6566_s27 }
  0x54   :  { %7372 = sst [smem:[#allocation33_spill]] %s6571_s4 }
  0x55   :  { %s6576_s12 = sld [smem:[%s7322_s0 + %s6338_s7]]   ;;  %s6342_s7 = smov 46  }
  0x56   :  { %s6581_s20 = sld [smem:[%s7322_s0 + %s6339_s15]]   ;;  %s6343_s15 = smov 47  }
  0x57   :  { %s6586_s27 = sld [smem:[%s7322_s0 + %s6340_s22]]   ;;  %s6344_s22 = smov 48  }
  0x58   :  { %s6591_s4 = sld [smem:[%s7322_s0 + %s6341_s28]]   ;;  %s6345_s28 = smov 49  }
  0x5b   :  { %7373 = sst [smem:[#allocation34_spill]] %s6576_s12 }
  0x5c   :  { %7374 = sst [smem:[#allocation35_spill]] %s6581_s20 }
  0x5d   :  { %7375 = sst [smem:[#allocation36_spill]] %s6586_s27 }
  0x5e   :  { %7376 = sst [smem:[#allocation37_spill]] %s6591_s4 }
  0x5f   :  { %s6596_s12 = sld [smem:[%s7322_s0 + %s6342_s7]]   ;;  %s6346_s7 = smov 50  }
  0x60   :  { %s6601_s20 = sld [smem:[%s7322_s0 + %s6343_s15]]   ;;  %s6347_s15 = smov 51  }
  0x61   :  { %s6606_s27 = sld [smem:[%s7322_s0 + %s6344_s22]]   ;;  %s6348_s22 = smov 52  }
  0x62   :  { %s6611_s4 = sld [smem:[%s7322_s0 + %s6345_s28]]  }
  0x65   :  { %7377 = sst [smem:[#allocation38_spill]] %s6596_s12 }
  0x66   :  { %7378 = sst [smem:[#allocation39_spill]] %s6601_s20 }
  0x67   :  { %7379 = sst [smem:[#allocation40_spill]] %s6606_s27 }
  0x68   :  { %7380 = sst [smem:[#allocation41_spill]] %s6611_s4 }
  0x69   :  { %s6616_s12 = sld [smem:[%s7322_s0 + %s6346_s7]]  }
  0x6a   :  { %s6621_s20 = sld [smem:[%s7322_s0 + %s6347_s15]]  }
  0x6b   :  { %s4610_s27 = sld [smem:[%s7322_s0 + %s6348_s22]]  }
  0x6c   :  { %s6629_s4 = sld [smem:[%s7322_s0 + %s6349_s1]]  }
  0x71   :  { %v112_v0 = vstv %s4610_s27 }
  0x72   :  { %113 = vst [vmem:[#allocation2] sm:$0x1] %v112_v0 }
  0x73   :  { %v6632_v1 = vld [vmem:[%s6366_s5] sm:$0xff]  ;;  %v6635_v2 = vld [vmem:[%s6366_s5 + $0x8] sm:$0xff]  ;;  %v6638_v3 = vld [vmem:[%s6366_s5 + $0x10] sm:$0xff]  ;;  %vm245_vm0 = vcmask 261120  }
  0x74   :  { %v5574_v4 = vpack.c.bf16 %v6635_v2, %v6632_v1  ;;  %v6643_v5 = vld [vmem:[%s6366_s5 + $0x18] sm:$0xff]  ;;  %v225_v6 = vld [vmem:[%s6371_s9] sm:$0xff]  ;;  %v234_v8 = vld [vmem:[%s6381_s17 + $0x8] sm:$0xff] }
  0x75   :  { %v5578_v7 = vpack.c.bf16 %v6643_v5, %v6638_v3  ;;  %5037 = vmatprep.mubr.msk.f32.mxu0 %vm245_vm0, %v225_v6  ;;  %v236_v9 = vld [vmem:[%s6381_s17 + $0x18] sm:$0xff]  ;;  %v233_v10 = vld [vmem:[%s6381_s17] sm:$0xff]  ;;  %v235_v12 = vld [vmem:[%s6381_s17 + $0x10] sm:$0xff] }
  0x76   :  { %5575 = vmatprep.subr.bf16.mxu0 %v5574_v4  ;;  %v5582_v11 = vpack.c.bf16 %v236_v9, %v234_v8 }
  0x77   :  { %5577 = vmatpush3.bf16.msra.mxu0 %v5574_v4 }
  0x78   :  { %5579 = vmatprep.subr.bf16.mxu0 %v5578_v7 }
  0x79   :  { %114 = vsyncpa [#allocation4], 0  ;;  %v5584_v13 = vpack.c.bf16 %v235_v12, %v233_v10  ;;  %5583 = vmatprep.subr.bf16.mxu1 %v5582_v11  ;;  %v226_v14 = vld [vmem:[%s6371_s9 + $0x8] sm:$0xff]  ;;  %v227_v15 = vld [vmem:[%s6371_s9 + $0x10] sm:$0xff]  ;;  %v6350_v21 = vmov 0.0   ;;  %vm343_vm1 = vcmask 130048  }
  0x7a   :  { %v228_v16 = vld [vmem:[%s6371_s9 + $0x18] sm:$0xff]  ;;  %v229_v17 = vld [vmem:[%s6376_s13] sm:$0xff]  ;;  %v230_v18 = vld [vmem:[%s6376_s13 + $0x8] sm:$0xff]  ;;  %420 = vmatprep.mubr.f32.mxu1 %v6350_v21  ;;  %s7381_s0 = sld [smem:[#allocation7_spill]]  ;;  %s7382_s5 = sld [smem:[#allocation6_spill]]  ;;  %vm6353_vm2 = vmmov 0  }
  0x7b   :  { %5581 = vmatpush3.bf16.msra.mxu0 %v5578_v7  ;;  %5585 = vmatpush1.bf16.msra.mxu1 %v5584_v13  ;;  %v231_v19 = vld [vmem:[%s6376_s13 + $0x10] sm:$0xff]  ;;  %v232_v20 = vld [vmem:[%s6376_s13 + $0x18] sm:$0xff]  ;;  %v238_v22 = vld [vmem:[%s6386_s21 + $0x8] sm:$0xff]  ;;  %s7383_s9 = sld [smem:[#allocation8_spill]]  ;;  %s7384_s13 = sld [smem:[#allocation9_spill]]  ;;  %vm1928_vm3 = vcmask 523264  }
  0x7c   :  { %5591 = vmatprep.subr.bf16.mxu0 %v5574_v4  ;;  %v240_v23 = vld [vmem:[%s6386_s21 + $0x18] sm:$0xff]  ;;  %v753_v25 = vld [vmem:[%s6396_s29 + $0x8] sm:$0xff]  ;;  %v752_v27 = vld [vmem:[%s6396_s29] sm:$0xff]  ;;  %s7385_s17 = sld [smem:[#allocation10_spill]]  ;;  %vm2444_vm4 = vcmask 64512   ;;  %s7396_s27 = sld [smem:[#allocation21_spill]] }
  0x7d   :  { %v5586_v24 = vpack.c.bf16 %v240_v23, %v238_v22  ;;  %v755_v26 = vld [vmem:[%s6396_s29 + $0x18] sm:$0xff]  ;;  %v754_v29 = vld [vmem:[%s6396_s29 + $0x10] sm:$0xff]  ;;  %v757_v30 = vld [vmem:[%s6396_s29 + $0x28] sm:$0xff]  ;;  %s7397_s7 = sld [smem:[#allocation22_spill]]  ;;  %s7398_s10 = sld [smem:[#allocation27_spill]] }
  0x7e   :  { %5038 = vmatmul.mubr.msk.f32.vlgmr.msra.gmra.mrb[0].mxu0 %vm245_vm0, %v226_v14  ;;  %v6673_v28 = vpack.c.bf16 %v755_v26, %v753_v25  ;;  %v759_v31 = vld [vmem:[%s6396_s29 + $0x38] sm:$0xff]  ;;  %v6678_v32 = vpack.c.bf16 %v754_v29, %v752_v27  ;;  %v756_v34 = vld [vmem:[%s6396_s29 + $0x20] sm:$0xff]  ;;  %v758_v35 = vld [vmem:[%s6396_s29 + $0x30] sm:$0xff]  ;;  %s7399_s11 = sld [smem:[#allocation23_spill]]  ;;  %s7400_s15 = sld [smem:[#allocation24_spill]] }
  0x7f   :  { %5040 = vmatprep.mubr.msk.f32.mxu0 %vm245_vm0, %v227_v15  ;;  %5593 = vmatpush3.bf16.msra.mxu0 %v5574_v4  ;;  %v6680_v33 = vpack.c.bf16 %v759_v31, %v757_v30  ;;  %v761_v36 = vld [vmem:[%s6396_s29 + $0x48] sm:$0xff]  ;;  %v763_v37 = vld [vmem:[%s6396_s29 + $0x58] sm:$0xff]  ;;  %v6688_v38 = vpack.c.bf16 %v758_v35, %v756_v34  ;;  %v760_v40 = vld [vmem:[%s6396_s29 + $0x40] sm:$0xff]  ;;  %s7401_s16 = sld [smem:[#allocation25_spill]]  ;;  %s7402_s18 = sld [smem:[#allocation26_spill]] }
  0x80   :  { %5595 = vmatprep.subr.bf16.mxu0 %v5578_v7  ;;  %5587 = vmatprep.subr.bf16.mxu1 %v5586_v24  ;;  %v6691_v39 = vpack.c.bf16 %v763_v37, %v761_v36  ;;  %v762_v41 = vld [vmem:[%s6396_s29 + $0x50] sm:$0xff]  ;;  %v765_v42 = vld [vmem:[%s6396_s29 + $0x68] sm:$0xff]  ;;  %v767_v43 = vld [vmem:[%s6396_s29 + $0x78] sm:$0xff]  ;;  %s7403_s22 = sld [smem:[#allocation28_spill]]  ;;  %s7404_s23 = sld [smem:[#allocation29_spill]] }
  0x81   :  { %v6698_v44 = vpack.c.bf16 %v762_v41, %v760_v40  ;;  %v6701_v45 = vpack.c.bf16 %v767_v43, %v765_v42  ;;  %v764_v46 = vld [vmem:[%s6396_s29 + $0x60] sm:$0xff]  ;;  %v766_v47 = vld [vmem:[%s6396_s29 + $0x70] sm:$0xff]  ;;  %v769_v48 = vld [vmem:[%s6396_s29 + $0x88] sm:$0xff]  ;;  %s7405_s26 = sld [smem:[#allocation30_spill]]  ;;  %s7406_s1 = sld [smem:[#allocation33_spill]] }
  0x82   :  { %5041 = vmatmul.mubr.msk.f32.gmra.mrb[2].mxu0 %vm245_vm0, %v228_v16  ;;  %v771_v49 = vld [vmem:[%s6396_s29 + $0x98] sm:$0xff]  ;;  %v6708_v50 = vpack.c.bf16 %v766_v47, %v764_v46  ;;  %v768_v52 = vld [vmem:[%s6396_s29 + $0x80] sm:$0xff]  ;;  %v770_v53 = vld [vmem:[%s6396_s29 + $0x90] sm:$0xff]  ;;  %s7407_s28 = sld [smem:[#allocation36_spill]]  ;;  %s7408_s2 = sld [smem:[#allocation31_spill]] }
  0x83   :  { %5597 = vmatpush3.bf16.msra.mxu0 %v5578_v7  ;;  %5051 = vmatprep.mubr.msk.f32.mxu0 %vm245_vm0, %v229_v17  ;;  %v6711_v51 = vpack.c.bf16 %v771_v49, %v769_v48  ;;  %v773_v54 = vld [vmem:[%s6396_s29 + $0xa8] sm:$0xff]  ;;  %v775_v55 = vld [vmem:[%s6396_s29 + $0xb8] sm:$0xff]  ;;  %v6718_v56 = vpack.c.bf16 %v770_v53, %v768_v52  ;;  %v772_v58 = vld [vmem:[%s6396_s29 + $0xa0] sm:$0xff] }
  0x84   :  { %5603 = vmatprep.subr.bf16.mxu0 %v6673_v28  ;;  %v6721_v57 = vpack.c.bf16 %v775_v55, %v773_v54  ;;  %v774_v59 = vld [vmem:[%s6396_s29 + $0xb0] sm:$0xff]  ;;  %v777_v60 = vld [vmem:[%s6396_s29 + $0xc8] sm:$0xff]  ;;  %v779_v61 = vld [vmem:[%s6396_s29 + $0xd8] sm:$0xff] }
  0x85   :  { %v6728_v62 = vpack.c.bf16 %v774_v59, %v772_v58  ;;  %v6731_v63 = vpack.c.bf16 %v779_v61, %v777_v60  ;;  %v776_v0 = vld [vmem:[%s6396_s29 + $0xc0] sm:$0xff]  ;;  %v778_v4 = vld [vmem:[%s6396_s29 + $0xd0] sm:$0xff]  ;;  %v781_v6 = vld [vmem:[%s6396_s29 + $0xe8] sm:$0xff] }
  0x86   :  { %5052 = vmatmul.mubr.msk.f32.vlgmr.msra.gmra.mrb[4].mxu0 %vm245_vm0, %v230_v18  ;;  %v783_v7 = vld [vmem:[%s6396_s29 + $0xf8] sm:$0xff]  ;;  %v6738_v8 = vpack.c.bf16 %v778_v4, %v776_v0  ;;  %v780_v10 = vld [vmem:[%s6396_s29 + $0xe0] sm:$0xff]  ;;  %v782_v11 = vld [vmem:[%s6396_s29 + $0xf0] sm:$0xff] }
  0x87   :  { %5054 = vmatprep.mubr.msk.f32.mxu0 %vm245_vm0, %v231_v19  ;;  %5605 = vmatpush1.bf16.msra.mxu0 %v6678_v32  ;;  %v6741_v9 = vpack.c.bf16 %v783_v7, %v781_v6  ;;  %v785_v12 = vld [vmem:[%s6396_s29 + $0x108] sm:$0xff]  ;;  %v787_v13 = vld [vmem:[%s6396_s29 + $0x118] sm:$0xff]  ;;  %v6748_v14 = vpack.c.bf16 %v782_v11, %v780_v10  ;;  %v784_v16 = vld [vmem:[%s6396_s29 + $0x100] sm:$0xff] }
  0x88   :  { %5607 = vmatprep.subr.bf16.mxu0 %v6680_v33  ;;  %v6751_v15 = vpack.c.bf16 %v787_v13, %v785_v12  ;;  %v786_v17 = vld [vmem:[%s6396_s29 + $0x110] sm:$0xff]  ;;  %v237_v19 = vld [vmem:[%s6386_s21] sm:$0xff]  ;;  %v242_v22 = vld [vmem:[%s6391_s25 + $0x8] sm:$0xff] }
  0x89   :  { %v6756_v18 = vpack.c.bf16 %v786_v17, %v784_v16  ;;  %v244_v23 = vld [vmem:[%s6391_s25 + $0x18] sm:$0xff]  ;;  %v241_v35 = vld [vmem:[%s6391_s25] sm:$0xff]  ;;  %v243_v36 = vld [vmem:[%s6391_s25 + $0x10] sm:$0xff]  ;;  %s7387_s25 = sld [smem:[#allocation12_spill]] }
  0x8a   :  { %5055 = vmatmul.mubr.msk.f32.gmra.mrb[6].mxu0 %vm245_vm0, %v232_v20  ;;  %v239_v20 = vld [vmem:[%s6386_s21 + $0x10] sm:$0xff]  ;;  %v5598_v26 = vpack.c.bf16 %v244_v23, %v242_v22  ;;  %v5600_v41 = vpack.c.bf16 %v243_v36, %v241_v35  ;;  %v792_v42 = vld [vmem:[%s6396_s29 + $0x140] sm:$0xff]  ;;  %v799_v46 = vld [vmem:[%s6396_s29 + $0x178] sm:$0xff]  ;;  %s7386_s21 = sld [smem:[#allocation11_spill]] }
  0x8b   :  { %5609 = vmatpush1.bf16.msra.mxu0 %v6688_v38  ;;  %v5588_v24 = vpack.c.bf16 %v239_v20, %v237_v19  ;;  %v794_v43 = vld [vmem:[%s6396_s29 + $0x150] sm:$0xff]  ;;  %v796_v48 = vld [vmem:[%s6396_s29 + $0x160] sm:$0xff]  ;;  %v803_v52 = vld [vmem:[%s6396_s29 + $0x198] sm:$0xff] }
  0x8c   :  { %5611 = vmatprep.subr.bf16.mxu0 %v6691_v39  ;;  %v798_v49 = vld [vmem:[%s6396_s29 + $0x170] sm:$0xff]  ;;  %v800_v54 = vld [vmem:[%s6396_s29 + $0x180] sm:$0xff]  ;;  %v807_v58 = vld [vmem:[%s6396_s29 + $0x1b8] sm:$0xff] }
  0x8d   :  { %v802_v55 = vld [vmem:[%s6396_s29 + $0x190] sm:$0xff]  ;;  %v804_v60 = vld [vmem:[%s6396_s29 + $0x1a0] sm:$0xff]  ;;  %v811_v0 = vld [vmem:[%s6396_s29 + $0x1d8] sm:$0xff] }
  0x8e   :  { %v806_v61 = vld [vmem:[%s6396_s29 + $0x1b0] sm:$0xff]  ;;  %v808_v6 = vld [vmem:[%s6396_s29 + $0x1c0] sm:$0xff]  ;;  %v815_v10 = vld [vmem:[%s6396_s29 + $0x1f8] sm:$0xff] }
  0x8f   :  { %5613 = vmatpush1.bf16.msra.mxu0 %v6698_v44  ;;  %v810_v7 = vld [vmem:[%s6396_s29 + $0x1d0] sm:$0xff]  ;;  %v812_v12 = vld [vmem:[%s6396_s29 + $0x1e0] sm:$0xff] }
  0x90   :  { %5615 = vmatprep.subr.bf16.mxu0 %v6701_v45  ;;  %v814_v13 = vld [vmem:[%s6396_s29 + $0x1f0] sm:$0xff] }
  0x93   :  { %5617 = vmatpush1.bf16.msra.mxu0 %v6708_v50 }
  0x94   :  { %5619 = vmatprep.subr.bf16.mxu0 %v6711_v51 }
  0x97   :  { %5621 = vmatpush1.bf16.msra.mxu0 %v6718_v56 }
  0x98   :  { %5623 = vmatprep.subr.bf16.mxu0 %v6721_v57 }
  0x9b   :  { %5625 = vmatpush1.bf16.msra.mxu0 %v6728_v62 }
  0x9c   :  { %5627 = vmatprep.subr.bf16.mxu0 %v6731_v63 }
  0x9f   :  { %5629 = vmatpush1.bf16.msra.mxu0 %v6738_v8 }
  0xa0   :  { %5631 = vmatprep.subr.bf16.mxu0 %v6741_v9 }
  0xa3   :  { %5633 = vmatpush1.bf16.msra.mxu0 %v6748_v14 }
  0xa4   :  { %5635 = vmatprep.subr.bf16.mxu0 %v6751_v15 }
  0xa7   :  { %5637 = vmatpush1.bf16.msra.mxu0 %v6756_v18 }
 0x151   :  { %v5039_v25 = vpop.f32.mrb[0].mxu0 }
 0x152   :  { %v324_v27 = vpop.f32.mrb[1].mxu0 }
 0x153   :  { %4616 = vmatmul.mubr.msk.f32.vlgmr.msra.gmra.mrb[0].mxu1 %vm343_vm1, %v324_v27 }
 0x154   :  { %426 = vmatprep.mubr.f32.mxu1 %v6350_v21  ;;  %5589 = vmatpush1.bf16.msra.mxu1 %v5588_v24 }
 0x155   :  { %v5042_v29 = vpop.f32.mrb[2].mxu0  ;;  %5599 = vmatprep.subr.bf16.mxu1 %v5598_v26 }
 0x156   :  { %v334_v30 = vpop.f32.mrb[3].mxu0 }
 0x157   :  { %4617 = vmatmul.mubr.msk.f32.gmra.mrb[2].mxu1 %vm343_vm1, %v5039_v25 }
 0x158   :  { %432 = vmatprep.mubr.f32.mxu1 %v6350_v21 }
 0x159   :  { %v5053_v31 = vpop.f32.mrb[4].mxu0 }
 0x15a   :  { %v624_v34 = vpop.f32.mrb[5].mxu0 }
 0x15b   :  { %4618 = vmatmul.mubr.msk.f32.gmra.mrb[4].mxu1 %vm343_vm1, %v334_v30 }
 0x15c   :  { %438 = vmatprep.mubr.f32.mxu1 %v6350_v21 }
 0x15d   :  { %v5056_v37 = vpop.f32.mrb[6].mxu0 }
 0x15e   :  { %v634_v40 = vpop.f32.mrb[7].mxu0 }
 0x15f   :  { %4619 = vmatmul.mubr.msk.f32.gmra.mrb[6].mxu1 %vm343_vm1, %v5042_v29 }
 0x160   :  { %521 = vmatprep.mubr.f32.mxu1 %v6350_v21 }
 0x163   :  { %4620 = vmatmul.mubr.msk.f32.vlgmr.msra.gmra.mrb[0].mxu1 %vm343_vm1, %v6632_v1  ;;  %v789_v1 = vld [vmem:[%s6396_s29 + $0x128] sm:$0xff] }
 0x164   :  { %527 = vmatprep.mubr.f32.mxu1 %v6350_v21  ;;  %5601 = vmatpush1.bf16.msra.mxu1 %v5600_v41 }
 0x165   :  { %5667 = vmatprep.subr.bf16.mxu1 %v6673_v28  ;;  %v790_v28 = vld [vmem:[%s6396_s29 + $0x130] sm:$0xff] }
 0x167   :  { %4621 = vmatmul.mubr.msk.f32.gmra.mrb[2].mxu1 %vm343_vm1, %v6635_v2  ;;  %v791_v2 = vld [vmem:[%s6396_s29 + $0x138] sm:$0xff] }
 0x168   :  { %533 = vmatprep.mubr.f32.mxu1 %v6350_v21 }
 0x16b   :  { %4622 = vmatmul.mubr.msk.f32.gmra.mrb[4].mxu1 %vm343_vm1, %v6638_v3  ;;  %v5638_v3 = vpack.c.bf16 %v791_v2, %v789_v1 }
 0x16c   :  { %539 = vmatprep.mubr.f32.mxu1 %v6350_v21 }
 0x16d   :  { %5639 = vmatprep.subr.bf16.mxu0 %v5638_v3 }
 0x16f   :  { %4623 = vmatmul.mubr.msk.f32.gmra.mrb[6].mxu1 %vm343_vm1, %v6643_v5  ;;  %v788_v5 = vld [vmem:[%s6396_s29 + $0x120] sm:$0xff] }
 0x170   :  { %719 = vmatprep.mubr.f32.mxu1 %v6350_v21 }
 0x173   :  { %4628 = vmatmul.mubr.msk.f32.vlgmr.msra.gmra.mrb[0].mxu1 %vm343_vm1, %v624_v34 }
 0x174   :  { %725 = vmatprep.mubr.f32.mxu1 %v6350_v21  ;;  %5669 = vmatpush1.bf16.msra.mxu1 %v6678_v32  ;;  %v5640_v32 = vpack.c.bf16 %v790_v28, %v788_v5 }
 0x175   :  { %5671 = vmatprep.subr.bf16.mxu1 %v6680_v33  ;;  %v793_v33 = vld [vmem:[%s6396_s29 + $0x148] sm:$0xff] }
 0x176   :  { %5641 = vmatpush1.bf16.msra.mxu0 %v5640_v32 }
 0x177   :  { %4629 = vmatmul.mubr.msk.f32.gmra.mrb[2].mxu1 %vm343_vm1, %v5053_v31 }
 0x178   :  { %731 = vmatprep.mubr.f32.mxu1 %v6350_v21  ;;  %5673 = vmatpush1.bf16.msra.mxu1 %v6688_v38  ;;  %v795_v38 = vld [vmem:[%s6396_s29 + $0x158] sm:$0xff] }
 0x179   :  { %5675 = vmatprep.subr.bf16.mxu1 %v6691_v39  ;;  %v5642_v39 = vpack.c.bf16 %v795_v38, %v793_v33 }
 0x17b   :  { %4630 = vmatmul.mubr.msk.f32.gmra.mrb[4].mxu1 %vm343_vm1, %v634_v40  ;;  %5643 = vmatprep.subr.bf16.mxu0 %v5642_v39 }
 0x17c   :  { %737 = vmatprep.mubr.f32.mxu1 %v6350_v21  ;;  %5677 = vmatpush1.bf16.msra.mxu1 %v6698_v44  ;;  %v5644_v44 = vpack.c.bf16 %v794_v43, %v792_v42 }
 0x17d   :  { %5679 = vmatprep.subr.bf16.mxu1 %v6701_v45  ;;  %v797_v45 = vld [vmem:[%s6396_s29 + $0x168] sm:$0xff] }
 0x17e   :  { %5645 = vmatpush1.bf16.msra.mxu0 %v5644_v44  ;;  %v5646_v47 = vpack.c.bf16 %v799_v46, %v797_v45 }
 0x17f   :  { %4631 = vmatmul.mubr.msk.f32.gmra.mrb[6].mxu1 %vm343_vm1, %v5056_v37 }
 0x180   :  { %5681 = vmatpush1.bf16.msra.mxu1 %v6708_v50  ;;  %v5648_v50 = vpack.c.bf16 %v798_v49, %v796_v48  ;;  %5647 = vmatprep.subr.bf16.mxu0 %v5646_v47 }
 0x181   :  { %5683 = vmatprep.subr.bf16.mxu1 %v6711_v51  ;;  %v801_v51 = vld [vmem:[%s6396_s29 + $0x188] sm:$0xff] }
 0x182   :  { %5649 = vmatpush1.bf16.msra.mxu0 %v5648_v50  ;;  %v5650_v53 = vpack.c.bf16 %v803_v52, %v801_v51 }
 0x184   :  { %5685 = vmatpush1.bf16.msra.mxu1 %v6718_v56  ;;  %v5652_v56 = vpack.c.bf16 %v802_v55, %v800_v54  ;;  %5651 = vmatprep.subr.bf16.mxu0 %v5650_v53 }
 0x185   :  { %5687 = vmatprep.subr.bf16.mxu1 %v6721_v57  ;;  %v805_v57 = vld [vmem:[%s6396_s29 + $0x1a8] sm:$0xff] }
 0x186   :  { %5653 = vmatpush1.bf16.msra.mxu0 %v5652_v56  ;;  %v5654_v59 = vpack.c.bf16 %v807_v58, %v805_v57 }
 0x188   :  { %5689 = vmatpush1.bf16.msra.mxu1 %v6728_v62  ;;  %v5656_v62 = vpack.c.bf16 %v806_v61, %v804_v60  ;;  %5655 = vmatprep.subr.bf16.mxu0 %v5654_v59 }
 0x189   :  { %5691 = vmatprep.subr.bf16.mxu1 %v6731_v63  ;;  %v809_v63 = vld [vmem:[%s6396_s29 + $0x1c8] sm:$0xff] }
 0x18a   :  { %5657 = vmatpush1.bf16.msra.mxu0 %v5656_v62  ;;  %v5658_v4 = vpack.c.bf16 %v811_v0, %v809_v63 }
 0x18c   :  { %5693 = vmatpush1.bf16.msra.mxu1 %v6738_v8  ;;  %v5660_v8 = vpack.c.bf16 %v810_v7, %v808_v6  ;;  %5659 = vmatprep.subr.bf16.mxu0 %v5658_v4 }
 0x18d   :  { %5695 = vmatprep.subr.bf16.mxu1 %v6741_v9  ;;  %v813_v9 = vld [vmem:[%s6396_s29 + $0x1e8] sm:$0xff]  ;;  %s7388_s29 = sld [smem:[#allocation13_spill]] }
 0x18e   :  { %5661 = vmatpush1.bf16.msra.mxu0 %v5660_v8  ;;  %v5662_v11 = vpack.c.bf16 %v815_v10, %v813_v9 }
 0x190   :  { %5697 = vmatpush1.bf16.msra.mxu1 %v6748_v14  ;;  %v5664_v14 = vpack.c.bf16 %v814_v13, %v812_v12  ;;  %5663 = vmatprep.subr.bf16.mxu0 %v5662_v11 }
 0x191   :  { %5699 = vmatprep.subr.bf16.mxu1 %v6751_v15 }
 0x192   :  { %5665 = vmatpush1.bf16.msra.mxu0 %v5664_v14 }
 0x194   :  { %5701 = vmatpush1.bf16.msra.mxu1 %v6756_v18 }
 0x195   :  { %5703 = vmatprep.subr.bf16.mxu1 %v5638_v3 }
 0x198   :  { %5705 = vmatpush1.bf16.msra.mxu1 %v5640_v32  ;;  %v907_v32 = vlaneseq }
 0x199   :  { %5707 = vmatprep.subr.bf16.mxu1 %v5642_v39 }
 0x19a   :  { %v6840_v33 = vshrl.u32 %v907_v32, 7  ;;  %v1098_v32 = vld [vmem:[%s6421_s24 + $0x38] sm:$0xff] }
 0x19c   :  { %5709 = vmatpush1.bf16.msra.mxu1 %v5644_v44  ;;  %v6843_v38 = vsub.s32 0, %v6840_v33 }
 0x19d   :  { %5711 = vmatprep.subr.bf16.mxu1 %v5646_v47 }
 0x1a0   :  { %5713 = vmatpush1.bf16.msra.mxu1 %v5648_v50 }
 0x1a1   :  { %5715 = vmatprep.subr.bf16.mxu1 %v5650_v53 }
 0x1a4   :  { %5717 = vmatpush1.bf16.msra.mxu1 %v5652_v56 }
 0x1a5   :  { %5719 = vmatprep.subr.bf16.mxu1 %v5654_v59 }
 0x1a8   :  { %5721 = vmatpush1.bf16.msra.mxu1 %v5656_v62 }
 0x1a9   :  { %5723 = vmatprep.subr.bf16.mxu1 %v5658_v4 }
 0x1ac   :  { %5725 = vmatpush1.bf16.msra.mxu1 %v5660_v8 }
 0x1ad   :  { %5727 = vmatprep.subr.bf16.mxu1 %v5662_v11 }
 0x1b0   :  { %5729 = vmatpush1.bf16.msra.mxu1 %v5664_v14 }
 0x246   :  { %v721_v15 = vpop.f32.mrb[0].mxu1 }
 0x247   :  { %v723_v16 = vpop.f32.mrb[1].mxu1 }
 0x24a   :  { %v727_v17 = vpop.f32.mrb[2].mxu1 }
 0x24b   :  { %v818_v18 = vadd.f32 %v727_v17, %v721_v15  ;;  %v729_v19 = vpop.f32.mrb[3].mxu1 }
 0x24c   :  { %v827_v20 = vadd.f32 %v729_v19, %v723_v16 }
 0x24e   :  { %v733_v22 = vpop.f32.mrb[4].mxu1 }
 0x24f   :  { %v819_v23 = vadd.f32 %v818_v18, %v733_v22  ;;  %v735_v24 = vpop.f32.mrb[5].mxu1 }
 0x250   :  { %v828_v25 = vadd.f32 %v827_v20, %v735_v24  ;;  %v1108_v20 = vld [vmem:[%s6421_s24 + $0x88] sm:$0xff] }
 0x252   :  { %v739_v26 = vpop.f32.mrb[6].mxu1 }
 0x253   :  { %v820_v27 = vadd.f32 %v819_v23, %v739_v26  ;;  %v741_v29 = vpop.f32.mrb[7].mxu1 }
 0x254   :  { %v829_v30 = vadd.f32 %v828_v25, %v741_v29  ;;  %v1109_v25 = vld [vmem:[%s6421_s24 + $0x90] sm:$0xff] }
 0x255   :  { %v821_v31 = vrot.slane %v820_v27, 4 }
 0x256   :  { %v830_v34 = vrot.slane %v829_v30, 4 }
 0x257   :  { %v822_v35 = vadd.f32 %v821_v31, %v820_v27  ;;  %v1094_v31 = vld [vmem:[%s6421_s24 + $0x18] sm:$0xff] }
 0x258   :  { %v831_v36 = vadd.f32 %v830_v34, %v829_v30  ;;  %v1093_v30 = vld [vmem:[%s6421_s24 + $0x10] sm:$0xff]  ;;  %v1111_v34 = vld [vmem:[%s6421_s24 + $0xa0] sm:$0xff] }
 0x259   :  { %v823_v37 = vrot.slane %v822_v35, 2 }
 0x25a   :  { %v832_v40 = vrot.slane %v831_v36, 2 }
 0x25b   :  { %v824_v41 = vadd.f32 %v823_v37, %v822_v35  ;;  %v1112_v35 = vld [vmem:[%s6421_s24 + $0xa8] sm:$0xff] }
 0x25c   :  { %v833_v1 = vadd.f32 %v832_v40, %v831_v36  ;;  %v5752_v36 = vpack.c.bf16 %v1094_v31, %v1093_v30  ;;  %v5754_v37 = vpack.c.bf16 %v1112_v35, %v1111_v34  ;;  %v1095_v40 = vld [vmem:[%s6421_s24 + $0x20] sm:$0xff] }
 0x25d   :  { %v825_v2 = vrot.slane %v824_v41, 1 }
 0x25e   :  { %v834_v3 = vrot.slane %v833_v1, 1 }
 0x25f   :  { %v826_v28 = vadd.f32 %v825_v2, %v824_v41  ;;  %v1096_v41 = vld [vmem:[%s6421_s24 + $0x28] sm:$0xff]  ;;  %v1114_v2 = vld [vmem:[%s6421_s24 + $0xb8] sm:$0xff] }
 0x260   :  { %v835_v5 = vadd.f32 %v834_v3, %v833_v1  ;;  %v1113_v1 = vld [vmem:[%s6421_s24 + $0xb0] sm:$0xff]  ;;  %v5756_v3 = vpack.c.bf16 %v1096_v41, %v1095_v40 }
 0x262   :  { %900 = vmatprep.mubr.f32.mxu0 %v835_v5  ;;  %v5758_v5 = vpack.c.bf16 %v1114_v2, %v1113_v1  ;;  %v1087_v1 = vld [vmem:[%s6411_s14] sm:$0xff]  ;;  %v1088_v2 = vld [vmem:[%s6411_s14 + $0x8] sm:$0xff]  ;;  %s7391_s14 = sld [smem:[#allocation16_spill]] }
 0x263   :  { %901 = vmatmul.mubr.f32.vlgmr.msra.gmra.mrb[8].mxu0 %v826_v28  ;;  %v1097_v28 = vld [vmem:[%s6421_s24 + $0x30] sm:$0xff] }
 0x264   :  { %1225 = vmatprep.mubr.f32.mxu0 %v6350_v21 }
 0x336   :  { %v902_v39 = vpop.f32.mrb[8].mxu0 }
 0x337   :  { %v910_v42 = vrot.slane %v902_v39, %v6843_v38  ;;  %v904_v43 = vpop.f32.mrb[9].mxu0  ;;  %v1115_v39 = vld [vmem:[%s6421_s24 + $0xc0] sm:$0xff] }
 0x338   :  { %v914_v44 = vrot.slane %v904_v43, %v6843_v38  ;;  %v5760_v43 = vpack.c.bf16 %v1098_v32, %v1097_v28  ;;  %v1117_v28 = vld [vmem:[%s6421_s24 + $0xd0] sm:$0xff]  ;;  %v1118_v32 = vld [vmem:[%s6421_s24 + $0xd8] sm:$0xff] }
 0x339   :  { %v6847_v45 = vsub.f32 %v721_v15, %v910_v42  ;;  %v6849_v46 = vsub.f32 %v727_v17, %v910_v42  ;;  %v6851_v47 = vsub.f32 %v733_v22, %v910_v42  ;;  %v6853_v48 = vsub.f32 %v739_v26, %v910_v42  ;;  %v1091_v22 = vld [vmem:[%s6421_s24] sm:$0xff]  ;;  %v1110_v26 = vld [vmem:[%s6421_s24 + $0x98] sm:$0xff]  ;;  %v1116_v42 = vld [vmem:[%s6421_s24 + $0xc8] sm:$0xff] }
 0x33a   :  { %v6855_v49 = vsub.f32 %v723_v16, %v914_v44  ;;  %v6857_v50 = vsub.f32 %v729_v19, %v914_v44  ;;  %v6859_v51 = vsub.f32 %v735_v24, %v914_v44  ;;  %v6861_v52 = vsub.f32 %v741_v29, %v914_v44  ;;  %v1107_v19 = vld [vmem:[%s6421_s24 + $0x80] sm:$0xff]  ;;  %v1092_v24 = vld [vmem:[%s6421_s24 + $0x8] sm:$0xff] }
 0x33b   :  { %v923_v53 = vmul.f32 %v6847_v45, %v6847_v45  ;;  %v925_v54 = vmul.f32 %v6849_v46, %v6849_v46  ;;  %v927_v57 = vmul.f32 %v6851_v47, %v6851_v47  ;;  %v929_v61 = vmul.f32 %v6853_v48, %v6853_v48 }
 0x33c   :  { %v924_v55 = vmul.f32 %v6855_v49, %v6855_v49  ;;  %v926_v56 = vmul.f32 %v6857_v50, %v6857_v50  ;;  %v928_v59 = vmul.f32 %v6859_v51, %v6859_v51  ;;  %v930_v63 = vmul.f32 %v6861_v52, %v6861_v52 }
 0x33d   :  { %v931_v58 = vadd.f32 %v925_v54, %v923_v53  ;;  %v5746_v23 = vpack.c.bf16 %v1108_v20, %v1107_v19  ;;  %v5748_v27 = vpack.c.bf16 %v1092_v24, %v1091_v22  ;;  %v5750_v29 = vpack.c.bf16 %v1110_v26, %v1109_v25  ;;  %v1099_v53 = vld [vmem:[%s6421_s24 + $0x40] sm:$0xff]  ;;  %v1100_v54 = vld [vmem:[%s6421_s24 + $0x48] sm:$0xff] }
 0x33e   :  { %v940_v60 = vadd.f32 %v926_v56, %v924_v55  ;;  %v5762_v44 = vpack.c.bf16 %v1116_v42, %v1115_v39  ;;  %v5764_v55 = vpack.c.bf16 %v1100_v54, %v1099_v53  ;;  %v5766_v39 = vpack.c.bf16 %v1118_v32, %v1117_v28  ;;  %v1101_v42 = vld [vmem:[%s6421_s24 + $0x50] sm:$0xff]  ;;  %v1119_v53 = vld [vmem:[%s6421_s24 + $0xe0] sm:$0xff]  ;;  %v1120_v54 = vld [vmem:[%s6421_s24 + $0xe8] sm:$0xff] }
 0x33f   :  { %v932_v62 = vadd.f32 %v931_v58, %v927_v57  ;;  %5747 = vmatprep.subr.bf16.mxu1 %v5746_v23  ;;  %v1133_v32 = vld [vmem:[%s6426_s30 + $0x50] sm:$0xff] }
 0x340   :  { %v941_v0 = vadd.f32 %v940_v60, %v928_v59  ;;  %v6351_v60 = vmov 1966171168  }
 0x341   :  { %v933_v4 = vadd.f32 %v932_v62, %v929_v61  ;;  %v1026_v61 = vunpack.c.l.s4 %v6351_v60  ;;  %v1122_v60 = vld [vmem:[%s6421_s24 + $0xf8] sm:$0xff] }
 0x342   :  { %v942_v6 = vadd.f32 %v941_v0, %v930_v63 }
 0x343   :  { %v934_v7 = vrot.slane %v933_v4, 4  ;;  %v1027_v62 = vunpack.c.0.s8 %v1026_v61 }
 0x344   :  { %v943_v8 = vrot.slane %v942_v6, 4 }
 0x345   :  { %v935_v9 = vadd.f32 %v934_v7, %v933_v4  ;;  %v1030_v0 = vsub.s32 %v1027_v62, %v6840_v33  ;;  %v1105_v62 = vld [vmem:[%s6421_s24 + $0x70] sm:$0xff] }
 0x346   :  { %v944_v10 = vadd.f32 %v943_v8, %v942_v6  ;;  %v816_v8 = vld [vmem:[%s6401_s3] sm:$0x3]  ;;  %s7389_s3 = sld [smem:[#allocation15_spill]] }
 0x347   :  { %v936_v11 = vrot.slane %v935_v9, 2 }
 0x348   :  { %v945_v12 = vrot.slane %v944_v10, 2 }
 0x349   :  { %v937_v13 = vadd.f32 %v936_v11, %v935_v9  ;;  %v817_v11 = vld [vmem:[%s6406_s8] sm:$0x3]  ;;  %s7390_s8 = sld [smem:[#allocation14_spill]] }
 0x34a   :  { %v946_v14 = vadd.f32 %v945_v12, %v944_v10  ;;  %v1048_v10 = vsub.s32 1, %v6840_v33 }
 0x34b   :  { %v938_v15 = vrot.slane %v937_v13, 1 }
 0x34c   :  { %v947_v16 = vrot.slane %v946_v14, 1 }
 0x34d   :  { %v939_v18 = vadd.f32 %v938_v15, %v937_v13  ;;  %v1068_v15 = vrot.slane %v817_v11, %v1048_v10 }
 0x34e   :  { %v948_v17 = vadd.f32 %v947_v16, %v946_v14  ;;  %v1064_v14 = vrot.slane %v817_v11, %v6843_v38 }
 0x350   :  { %1013 = vmatprep.mubr.f32.mxu1 %v948_v17 }
 0x351   :  { %1014 = vmatmul.mubr.f32.vlgmr.msra.gmra.mrb[8].mxu1 %v939_v18 }
 0x352   :  { %5749 = vmatpush3.bf16.msra.mxu1 %v5748_v27 }
 0x353   :  { %5751 = vmatprep.subr.bf16.mxu1 %v5750_v29 }
 0x356   :  { %5753 = vmatpush3.bf16.msra.mxu1 %v5752_v36 }
 0x357   :  { %5755 = vmatprep.subr.bf16.mxu1 %v5754_v37 }
 0x35a   :  { %5757 = vmatpush3.bf16.msra.mxu1 %v5756_v3  ;;  %v1089_v3 = vld [vmem:[%s6416_s19] sm:$0xff] }
 0x35b   :  { %5759 = vmatprep.subr.bf16.mxu1 %v5758_v5  ;;  %v1090_v5 = vld [vmem:[%s6416_s19 + $0x8] sm:$0xff]  ;;  %s7392_s19 = sld [smem:[#allocation19_spill]] }
 0x35e   :  { %5761 = vmatpush3.bf16.msra.mxu1 %v5760_v43  ;;  %v1102_v43 = vld [vmem:[%s6421_s24 + $0x58] sm:$0xff] }
 0x35f   :  { %5763 = vmatprep.subr.bf16.mxu1 %v5762_v44  ;;  %v5768_v44 = vpack.c.bf16 %v1102_v43, %v1101_v42  ;;  %v1151_v42 = vld [vmem:[%s6426_s30 + $0xe0] sm:$0xff]  ;;  %v1152_v43 = vld [vmem:[%s6426_s30 + $0xe8] sm:$0xff] }
 0x362   :  { %5765 = vmatpush3.bf16.msra.mxu1 %v5764_v55  ;;  %v5770_v55 = vpack.c.bf16 %v1120_v54, %v1119_v53  ;;  %v5802_v53 = vpack.c.bf16 %v1152_v43, %v1151_v42  ;;  %v1135_v54 = vld [vmem:[%s6426_s30 + $0x60] sm:$0xff] }
 0x363   :  { %5767 = vmatprep.subr.bf16.mxu1 %v5766_v39  ;;  %v1134_v39 = vld [vmem:[%s6426_s30 + $0x58] sm:$0xff] }
 0x366   :  { %5769 = vmatpush3.bf16.msra.mxu1 %v5768_v44  ;;  %v5800_v44 = vpack.c.bf16 %v1134_v39, %v1133_v32  ;;  %v1500_v32 = vld [vmem:[%s7383_s9 + $0x18] sm:$0xff] }
 0x367   :  { %5771 = vmatprep.subr.bf16.mxu1 %v5770_v55  ;;  %v1136_v55 = vld [vmem:[%s6426_s30 + $0x68] sm:$0xff] }
 0x424   :  { %v1015_v56 = vpop.f32.mrb[8].mxu1 }
 0x425   :  { %v1016_v57 = vadd.f32 1e-05, %v1015_v56  ;;  %v1017_v58 = vpop.f32.mrb[9].mxu1  ;;  %v1103_v56 = vld [vmem:[%s6421_s24 + $0x60] sm:$0xff] }
 0x426   :  { %v1018_v59 = vadd.f32 1e-05, %v1017_v58 }
 0x427   :  { %6245 = vrsqrt.f32 %v1016_v57  ;;  %v1104_v57 = vld [vmem:[%s6421_s24 + $0x68] sm:$0xff] }
 0x428   :  { %6247 = vrsqrt.f32 %v1018_v59  ;;  %v5772_v58 = vpack.c.bf16 %v1104_v57, %v1103_v56  ;;  %v1121_v59 = vld [vmem:[%s6421_s24 + $0xf0] sm:$0xff]  ;;  %v1154_v57 = vld [vmem:[%s6426_s30 + $0xf8] sm:$0xff] }
 0x429   :  { %v5774_v61 = vpack.c.bf16 %v1122_v60, %v1121_v59  ;;  %v1153_v56 = vld [vmem:[%s6426_s30 + $0xf0] sm:$0xff] }
 0x42a   :  { %5773 = vmatpush3.bf16.msra.mxu1 %v5772_v58  ;;  %v5804_v58 = vpack.c.bf16 %v1136_v55, %v1135_v54  ;;  %v5806_v59 = vpack.c.bf16 %v1154_v57, %v1153_v56  ;;  %v1137_v60 = vld [vmem:[%s6426_s30 + $0x70] sm:$0xff] }
 0x42b   :  { %5775 = vmatprep.subr.bf16.mxu1 %v5774_v61  ;;  %v1138_v61 = vld [vmem:[%s6426_s30 + $0x78] sm:$0xff]  ;;  %v1503_v57 = vld [vmem:[%s7383_s9 + $0x30] sm:$0xff] }
 0x431   :  { %v6246_v63 = vpop.eup %6245 }
 0x432   :  { %v6248_v4 = vpop.eup %6247 }
 0x433   :  { %v1024_v6 = vcombine.low %v6246_v63, %v6248_v4  ;;  %v1106_v63 = vld [vmem:[%s6421_s24 + $0x78] sm:$0xff]  ;;  %v1139_v4 = vld [vmem:[%s6426_s30 + $0x80] sm:$0xff]  ;;  %s7393_s24 = sld [smem:[#allocation17_spill]] }
 0x435   :  { %v1031_v7 = vrot.slane %v1024_v6, %v1030_v0  ;;  %v1140_v6 = vld [vmem:[%s6426_s30 + $0x88] sm:$0xff] }
 0x437   :  { %v1038_v9 = vrot.slane %v1031_v7, %v1030_v0  ;;  %v5776_v0 = vpack.c.bf16 %v1106_v63, %v1105_v62  ;;  %v5778_v7 = vpack.c.bf16 %v1140_v6, %v1139_v4  ;;  %v5808_v62 = vpack.c.bf16 %v1138_v61, %v1137_v60  ;;  %v1477_v63 = vld [vmem:[%s6431_s6] sm:$0xff]  ;;  %v1482_v4 = vld [vmem:[%s7381_s0 + $0x8] sm:$0xff]  ;;  %v1483_v6 = vld [vmem:[%s7381_s0 + $0x10] sm:$0xff] }
 0x438   :  { %v1505_v60 = vld [vmem:[%s7383_s9 + $0x40] sm:$0xff]  ;;  %v1506_v61 = vld [vmem:[%s7383_s9 + $0x48] sm:$0xff] }
 0x439   :  { %v1040_v12 = vmul.f32 %v1038_v9, %v816_v8  ;;  %5777 = vmatpush3.bf16.msra.mxu1 %v5776_v0  ;;  %v1481_v0 = vld [vmem:[%s7381_s0] sm:$0xff] }
 0x43a   :  { %5779 = vmatprep.subr.bf16.mxu1 %v5778_v7  ;;  %v5814_v7 = vpack.c.bf16 %v1482_v4, %v1481_v0  ;;  %v1508_v0 = vld [vmem:[%s7383_s9 + $0x58] sm:$0xff] }
 0x43b   :  { %v1049_v13 = vrot.slane %v1040_v12, %v1048_v10  ;;  %v1045_v16 = vrot.slane %v1040_v12, %v6843_v38  ;;  %v1123_v12 = vld [vmem:[%s6426_s30] sm:$0xff] }
 0x43d   :  { %v1053_v17 = vmul.f32 %v1049_v13, %v6855_v49  ;;  %v1055_v18 = vmul.f32 %v1049_v13, %v6857_v50  ;;  %v1052_v19 = vmul.f32 %v1045_v16, %v6847_v45  ;;  %v1054_v20 = vmul.f32 %v1045_v16, %v6849_v46 }
 0x43e   :  { %v1057_v22 = vmul.f32 %v1049_v13, %v6859_v51  ;;  %v1059_v33 = vmul.f32 %v1049_v13, %v6861_v52  ;;  %v1056_v23 = vmul.f32 %v1045_v16, %v6851_v47  ;;  %v1058_v24 = vmul.f32 %v1045_v16, %v6853_v48  ;;  %v1124_v13 = vld [vmem:[%s6426_s30 + $0x8] sm:$0xff]  ;;  %v1142_v16 = vld [vmem:[%s6426_s30 + $0x98] sm:$0xff] }
 0x43f   :  { %v1072_v25 = vadd.f32 %v1068_v15, %v1053_v17  ;;  %v1074_v26 = vadd.f32 %v1068_v15, %v1055_v18  ;;  %v1071_v27 = vadd.f32 %v1064_v14, %v1052_v19  ;;  %v1073_v29 = vadd.f32 %v1064_v14, %v1054_v20 }
 0x440   :  { %v1076_v30 = vadd.f32 %v1068_v15, %v1057_v22  ;;  %v1078_v49 = vadd.f32 %v1068_v15, %v1059_v33  ;;  %v1075_v31 = vadd.f32 %v1064_v14, %v1056_v23  ;;  %v1077_v50 = vadd.f32 %v1064_v14, %v1058_v24  ;;  %v1141_v15 = vld [vmem:[%s6426_s30 + $0x90] sm:$0xff]  ;;  %v1126_v23 = vld [vmem:[%s6426_s30 + $0x18] sm:$0xff] }
 0x441   :  { %v1080_v34 = vmax.f32 %v1072_v25, 0.0  ;;  %v1082_v45 = vmax.f32 %v1074_v26, 0.0  ;;  %v1079_v46 = vmax.f32 %v1071_v27, 0.0  ;;  %v1081_v35 = vmax.f32 %v1073_v29, 0.0  ;;  %v1125_v33 = vld [vmem:[%s6426_s30 + $0x10] sm:$0xff]  ;;  %v1143_v25 = vld [vmem:[%s6426_s30 + $0xa0] sm:$0xff] }
 0x442   :  { %v1084_v51 = vmax.f32 %v1076_v30, 0.0  ;;  %v1086_v36 = vmax.f32 %v1078_v49, 0.0  ;;  %v1083_v37 = vmax.f32 %v1075_v31, 0.0  ;;  %v1085_v48 = vmax.f32 %v1077_v50, 0.0  ;;  %v1144_v26 = vld [vmem:[%s6426_s30 + $0xa8] sm:$0xff]  ;;  %v1127_v50 = vld [vmem:[%s6426_s30 + $0x20] sm:$0xff] }
 0x443   :  { %v5730_v52 = vpack.c.bf16 %v1082_v45, %v1080_v34  ;;  %v5732_v47 = vpack.c.bf16 %v1081_v35, %v1079_v46  ;;  %v5780_v20 = vpack.c.bf16 %v1124_v13, %v1123_v12  ;;  %v5782_v22 = vpack.c.bf16 %v1142_v16, %v1141_v15  ;;  %v1128_v34 = vld [vmem:[%s6426_s30 + $0x28] sm:$0xff]  ;;  %v1145_v45 = vld [vmem:[%s6426_s30 + $0xb0] sm:$0xff]  ;;  %v1146_v46 = vld [vmem:[%s6426_s30 + $0xb8] sm:$0xff] }
 0x444   :  { %v5734_v40 = vpack.c.bf16 %v1086_v36, %v1084_v51  ;;  %v5736_v41 = vpack.c.bf16 %v1085_v48, %v1083_v37  ;;  %v5784_v49 = vpack.c.bf16 %v1126_v23, %v1125_v33  ;;  %v5786_v31 = vpack.c.bf16 %v1144_v26, %v1143_v25  ;;  %v1129_v36 = vld [vmem:[%s6426_s30 + $0x30] sm:$0xff]  ;;  %v1148_v37 = vld [vmem:[%s6426_s30 + $0xc8] sm:$0xff]  ;;  %v1489_v16 = vld [vmem:[%s7381_s0 + $0x40] sm:$0xff] }
 0x445   :  { %5731 = vmatprep.subr.bf16.mxu0 %v5730_v52  ;;  %v5788_v35 = vpack.c.bf16 %v1128_v34, %v1127_v50  ;;  %v5790_v51 = vpack.c.bf16 %v1146_v46, %v1145_v45  ;;  %v1487_v13 = vld [vmem:[%s7381_s0 + $0x30] sm:$0xff]  ;;  %v1493_v33 = vld [vmem:[%s7381_s0 + $0x60] sm:$0xff]  ;;  %v1494_v23 = vld [vmem:[%s7381_s0 + $0x68] sm:$0xff] }
 0x446   :  { %5733 = vmatpush1.bf16.msra.mxu0 %v5732_v47  ;;  %v1495_v25 = vld [vmem:[%s7381_s0 + $0x70] sm:$0xff]  ;;  %v1496_v26 = vld [vmem:[%s7381_s0 + $0x78] sm:$0xff] }
 0x447   :  { %5735 = vmatprep.subr.bf16.mxu0 %v5734_v40 }
 0x44a   :  { %5737 = vmatpush1.bf16.msra.mxu0 %v5736_v41 }
 0x44b   :  { %5739 = vmatprep.subr.bf16.mxu0 %v5730_v52  ;;  %v1130_v52 = vld [vmem:[%s6426_s30 + $0x38] sm:$0xff] }
 0x44c   :  { %v5792_v48 = vpack.c.bf16 %v1130_v52, %v1129_v36 }
 0x44d   :  { %4632 = vmatmul.mubr.msk.f32.vlgmr.msra.gmra.mrb[10].mxu0 %vm245_vm0, %v1087_v1  ;;  %v1132_v1 = vld [vmem:[%s6426_s30 + $0x48] sm:$0xff] }
 0x44e   :  { %5741 = vmatpush1.bf16.msra.mxu0 %v5732_v47  ;;  %1231 = vmatprep.mubr.f32.mxu0 %v6350_v21  ;;  %v1147_v47 = vld [vmem:[%s6426_s30 + $0xc0] sm:$0xff] }
 0x44f   :  { %5743 = vmatprep.subr.bf16.mxu0 %v5734_v40  ;;  %v5794_v40 = vpack.c.bf16 %v1148_v37, %v1147_v47 }
 0x451   :  { %4633 = vmatmul.mubr.msk.f32.gmra.mrb[12].mxu0 %vm245_vm0, %v1088_v2  ;;  %v1149_v2 = vld [vmem:[%s6426_s30 + $0xd0] sm:$0xff] }
 0x452   :  { %5745 = vmatpush1.bf16.msra.mxu0 %v5736_v41  ;;  %1308 = vmatprep.mubr.f32.mxu0 %v6350_v21  ;;  %v1131_v41 = vld [vmem:[%s6426_s30 + $0x40] sm:$0xff] }
 0x455   :  { %4634 = vmatmul.mubr.msk.f32.vlgmr.msra.gmra.mrb[14].mxu0 %vm245_vm0, %v1089_v3  ;;  %v1150_v3 = vld [vmem:[%s6426_s30 + $0xd8] sm:$0xff]  ;;  %s7394_s30 = sld [smem:[#allocation18_spill]] }
 0x456   :  { %1314 = vmatprep.mubr.f32.mxu0 %v6350_v21  ;;  %v5798_v28 = vpack.c.bf16 %v1150_v3, %v1149_v2  ;;  %v1497_v2 = vld [vmem:[%s7383_s9] sm:$0xff]  ;;  %v1498_v3 = vld [vmem:[%s7383_s9 + $0x8] sm:$0xff] }
 0x459   :  { %4635 = vmatmul.mubr.msk.f32.gmra.mrb[16].mxu0 %vm245_vm0, %v1090_v5  ;;  %v5796_v5 = vpack.c.bf16 %v1132_v1, %v1131_v41  ;;  %v1479_v41 = vld [vmem:[%s7382_s5] sm:$0xff]  ;;  %v1480_v1 = vld [vmem:[%s7382_s5 + $0x8] sm:$0xff]  ;;  %s7410_s5 = sld [smem:[#allocation34_spill]] }
 0x45a   :  { %5061 = vmatprep.mubr.msk.f32.mxu0 %vm343_vm1, %v1477_v63  ;;  %v1507_v63 = vld [vmem:[%s7383_s9 + $0x50] sm:$0xff] }
 0x45b   :  { %v5866_v4 = vpack.c.bf16 %v1508_v0, %v1507_v63 }
 0x520   :  { %v1227_v8 = vpop.f32.mrb[10].mxu0 }
 0x521   :  { %v1229_v9 = vpop.f32.mrb[11].mxu0 }
 0x524   :  { %v1233_v10 = vpop.f32.mrb[12].mxu0 }
 0x525   :  { %v1235_v11 = vpop.f32.mrb[13].mxu0 }
 0x528   :  { %v1310_v14 = vpop.f32.mrb[14].mxu0 }
 0x529   :  { %v6942_v17 = vmax.f32 %v1227_v8, %v1310_v14  ;;  %v1312_v18 = vpop.f32.mrb[15].mxu0  ;;  %v1484_v8 = vld [vmem:[%s7381_s0 + $0x18] sm:$0xff] }
 0x52a   :  { %v1322_v19 = vmax.f32 %v1229_v9, %v1312_v18  ;;  %v5818_v9 = vpack.c.bf16 %v1484_v8, %v1483_v6  ;;  %v1488_v14 = vld [vmem:[%s7381_s0 + $0x38] sm:$0xff]  ;;  %v1509_v6 = vld [vmem:[%s7383_s9 + $0x60] sm:$0xff] }
 0x52b   :  { %v5826_v15 = vpack.c.bf16 %v1488_v14, %v1487_v13  ;;  %v1514_v13 = vld [vmem:[%s7384_s13 + $0x8] sm:$0xff] }
 0x52c   :  { %v1316_v24 = vpop.f32.mrb[16].mxu0  ;;  %1389 = vmatprep.mubr.f32.mxu1 %v1322_v19 }
 0x52d   :  { %v1323_v27 = vmax.f32 %v1233_v10, %v1316_v24  ;;  %v1318_v29 = vpop.f32.mrb[17].mxu0  ;;  %1390 = vmatmul.mubr.f32.vlgmr.msra.gmra.mrb[10].mxu1 %v6942_v17  ;;  %v1485_v10 = vld [vmem:[%s7381_s0 + $0x20] sm:$0xff]  ;;  %v5838_v24 = vpack.c.bf16 %v1494_v23, %v1493_v33  ;;  %v1520_v33 = vld [vmem:[%s7384_s13 + $0x38] sm:$0xff] }
 0x52e   :  { %v1324_v30 = vmax.f32 %v1235_v11, %v1318_v29  ;;  %5781 = vmatpush3.bf16.msra.mxu1 %v5780_v20  ;;  %v1486_v11 = vld [vmem:[%s7381_s0 + $0x28] sm:$0xff]  ;;  %v1492_v20 = vld [vmem:[%s7381_s0 + $0x58] sm:$0xff] }
 0x52f   :  { %5783 = vmatprep.subr.bf16.mxu1 %v5782_v22  ;;  %v5822_v12 = vpack.c.bf16 %v1486_v11, %v1485_v10  ;;  %v1512_v10 = vld [vmem:[%s7383_s9 + $0x78] sm:$0xff] }
 0x530   :  { %1394 = vmatprep.mubr.f32.mxu1 %v1324_v30 }
 0x531   :  { %1395 = vmatmul.mubr.f32.gmra.mrb[12].mxu1 %v1323_v27 }
 0x532   :  { %5785 = vmatpush3.bf16.msra.mxu1 %v5784_v49  ;;  %1464 = vmatprep.mubr.f32.mxu1 %v1322_v19  ;;  %v1491_v19 = vld [vmem:[%s7381_s0 + $0x50] sm:$0xff] }
 0x533   :  { %5787 = vmatprep.subr.bf16.mxu1 %v5786_v31  ;;  %v5834_v22 = vpack.c.bf16 %v1492_v20, %v1491_v19  ;;  %v1518_v19 = vld [vmem:[%s7384_s13 + $0x28] sm:$0xff] }
 0x536   :  { %5789 = vmatpush3.bf16.msra.mxu1 %v5788_v35 }
 0x537   :  { %5791 = vmatprep.subr.bf16.mxu1 %v5790_v51 }
 0x53a   :  { %5793 = vmatpush3.bf16.msra.mxu1 %v5792_v48 }
 0x53b   :  { %5795 = vmatprep.subr.bf16.mxu1 %v5794_v40  ;;  %v1478_v40 = vld [vmem:[%s6431_s6 + $0x8] sm:$0xff]  ;;  %s7395_s6 = sld [smem:[#allocation20_spill]] }
 0x53e   :  { %5797 = vmatpush3.bf16.msra.mxu1 %v5796_v5  ;;  %v5846_v5 = vpack.c.bf16 %v1498_v3, %v1497_v2  ;;  %v1924_v2 = vld [vmem:[%s7385_s17 + $0x30] sm:$0xff]  ;;  %v1925_v3 = vld [vmem:[%s7385_s17 + $0x38] sm:$0xff] }
 0x53f   :  { %5799 = vmatprep.subr.bf16.mxu1 %v5798_v28  ;;  %v1499_v28 = vld [vmem:[%s7383_s9 + $0x10] sm:$0xff] }
 0x540   :  { %v5850_v43 = vpack.c.bf16 %v1500_v32, %v1499_v28 }
 0x542   :  { %5801 = vmatpush3.bf16.msra.mxu1 %v5800_v44  ;;  %v1501_v44 = vld [vmem:[%s7383_s9 + $0x20] sm:$0xff] }
 0x543   :  { %5803 = vmatprep.subr.bf16.mxu1 %v5802_v53  ;;  %v1502_v53 = vld [vmem:[%s7383_s9 + $0x28] sm:$0xff] }
 0x544   :  { %v5854_v55 = vpack.c.bf16 %v1502_v53, %v1501_v44 }
 0x546   :  { %5805 = vmatpush3.bf16.msra.mxu1 %v5804_v58  ;;  %v1504_v58 = vld [vmem:[%s7383_s9 + $0x38] sm:$0xff] }
 0x547   :  { %5807 = vmatprep.subr.bf16.mxu1 %v5806_v59  ;;  %v5858_v59 = vpack.c.bf16 %v1504_v58, %v1503_v57 }
 0x54a   :  { %5809 = vmatpush3.bf16.msra.mxu1 %v5808_v62  ;;  %v5862_v62 = vpack.c.bf16 %v1506_v61, %v1505_v60 }
 0x54b   :  { %5815 = vmatprep.subr.bf16.mxu1 %v5814_v7 }
 0x54d   :  { %1465 = vmatmul.mubr.f32.vlgmr.msra.gmra.mrb[14].mxu1 %v6942_v17  ;;  %v1490_v17 = vld [vmem:[%s7381_s0 + $0x48] sm:$0xff]  ;;  %s7409_s0 = sld [smem:[#allocation32_spill]] }
 0x54e   :  { %1469 = vmatprep.mubr.f32.mxu1 %v1324_v30  ;;  %5817 = vmatpush3.bf16.msra.mxu1 %v5814_v7  ;;  %v5830_v18 = vpack.c.bf16 %v1490_v17, %v1489_v16  ;;  %v1510_v7 = vld [vmem:[%s7383_s9 + $0x68] sm:$0xff]  ;;  %v1516_v16 = vld [vmem:[%s7384_s13 + $0x18] sm:$0xff] }
 0x54f   :  { %5819 = vmatprep.subr.bf16.mxu1 %v5818_v9  ;;  %v5870_v8 = vpack.c.bf16 %v1510_v7, %v1509_v6 }
 0x551   :  { %1470 = vmatmul.mubr.f32.gmra.mrb[16].mxu1 %v1323_v27  ;;  %v5842_v27 = vpack.c.bf16 %v1496_v26, %v1495_v25  ;;  %v1522_v25 = vld [vmem:[%s7384_s13 + $0x48] sm:$0xff] }
 0x552   :  { %5821 = vmatpush3.bf16.msra.mxu1 %v5818_v9  ;;  %v1511_v9 = vld [vmem:[%s7383_s9 + $0x70] sm:$0xff]  ;;  %s7411_s9 = sld [smem:[#allocation35_spill]] }
 0x553   :  { %5823 = vmatprep.subr.bf16.mxu1 %v5822_v12  ;;  %v5874_v11 = vpack.c.bf16 %v1512_v10, %v1511_v9 }
 0x556   :  { %5825 = vmatpush3.bf16.msra.mxu1 %v5822_v12  ;;  %v1513_v12 = vld [vmem:[%s7384_s13] sm:$0xff] }
 0x557   :  { %5827 = vmatprep.subr.bf16.mxu1 %v5826_v15  ;;  %v5882_v14 = vpack.c.bf16 %v1514_v13, %v1513_v12 }
 0x55a   :  { %5829 = vmatpush3.bf16.msra.mxu1 %v5826_v15  ;;  %v1515_v15 = vld [vmem:[%s7384_s13 + $0x10] sm:$0xff] }
 0x55b   :  { %5831 = vmatprep.subr.bf16.mxu1 %v5830_v18  ;;  %v5886_v17 = vpack.c.bf16 %v1516_v16, %v1515_v15 }
 0x55e   :  { %5833 = vmatpush3.bf16.msra.mxu1 %v5830_v18  ;;  %v1517_v18 = vld [vmem:[%s7384_s13 + $0x20] sm:$0xff] }
 0x55f   :  { %5835 = vmatprep.subr.bf16.mxu1 %v5834_v22  ;;  %v5890_v20 = vpack.c.bf16 %v1518_v19, %v1517_v18 }
 0x562   :  { %5837 = vmatpush3.bf16.msra.mxu1 %v5834_v22  ;;  %v1519_v22 = vld [vmem:[%s7384_s13 + $0x30] sm:$0xff] }
 0x563   :  { %5839 = vmatprep.subr.bf16.mxu1 %v5838_v24  ;;  %v5894_v23 = vpack.c.bf16 %v1520_v33, %v1519_v22  ;;  %v4642_v22 = vld [vmem:[%s7387_s25] ss:$0 sm:$0xff]  ;;  %s7415_s25 = sld [smem:[#allocation39_spill]] }
 0x566   :  { %5841 = vmatpush3.bf16.msra.mxu1 %v5838_v24  ;;  %v1521_v24 = vld [vmem:[%s7384_s13 + $0x40] sm:$0xff] }
 0x567   :  { %5843 = vmatprep.subr.bf16.mxu1 %v5842_v27  ;;  %v5898_v26 = vpack.c.bf16 %v1522_v25, %v1521_v24 }
 0x56a   :  { %5845 = vmatpush3.bf16.msra.mxu1 %v5842_v27  ;;  %v1523_v27 = vld [vmem:[%s7384_s13 + $0x50] sm:$0xff] }
 0x56b   :  { %5847 = vmatprep.subr.bf16.mxu1 %v5846_v5 }
 0x600   :  { %v4729_v29 = vpop.f32.mrb[10].mxu1 }
 0x601   :  { %v4730_v30 = vpop.f32.mrb[11].mxu1 }
 0x602   :  { %v4731_v49 = vadd.f32 %v4730_v30, %v4729_v29  ;;  %v1524_v29 = vld [vmem:[%s7384_s13 + $0x58] sm:$0xff] }
 0x603   :  { %v5902_v30 = vpack.c.bf16 %v1524_v29, %v1523_v27 }
 0x604   :  { %v4732_v31 = vpop.f32.mrb[12].mxu1 }
 0x605   :  { %v4733_v50 = vpop.f32.mrb[13].mxu1 }
 0x606   :  { %v4734_v34 = vadd.f32 %v4733_v50, %v4732_v31  ;;  %v1526_v31 = vld [vmem:[%s7384_s13 + $0x68] sm:$0xff] }
 0x620   :  { %v4767_v45 = vpop.f32.mrb[14].mxu1 }
 0x621   :  { %v4768_v46 = vpop.f32.mrb[15].mxu1 }
 0x622   :  { %v4769_v35 = vadd.f32 %v4768_v46, %v4767_v45  ;;  %v1528_v45 = vld [vmem:[%s7384_s13 + $0x78] sm:$0xff] }
 0x624   :  { %v1475_v51 = vmax.f32 %v4731_v49, %v4769_v35  ;;  %v4770_v36 = vpop.f32.mrb[16].mxu1  ;;  %v1525_v49 = vld [vmem:[%s7384_s13 + $0x60] sm:$0xff] }
 0x625   :  { %v4771_v52 = vpop.f32.mrb[17].mxu1  ;;  %v5906_v50 = vpack.c.bf16 %v1526_v31, %v1525_v49  ;;  %v1918_v35 = vld [vmem:[%s7385_s17] sm:$0xff]  ;;  %v2124_v31 = vld [vmem:[%s7389_s3 + $0x8] sm:$0xff] }
 0x626   :  { %v4772_v47 = vadd.f32 %v4771_v52, %v4770_v36  ;;  %v6352_v52 = vmov 0.0|0.0   ;;  %v2123_v49 = vld [vmem:[%s7389_s3] sm:$0xff] }
 0x628   :  { %v6990_v37 = vmax.f32 %v4734_v34, %v4772_v47  ;;  %v1527_v34 = vld [vmem:[%s7384_s13 + $0x70] sm:$0xff]  ;;  %s7412_s13 = sld [smem:[#allocation37_spill]] }
 0x629   :  { %v5910_v46 = vpack.c.bf16 %v1528_v45, %v1527_v34  ;;  %v1920_v47 = vld [vmem:[%s7385_s17 + $0x10] sm:$0xff]  ;;  %v5945_v34 = vpack.c.bf16 %v2124_v31, %v2123_v49 }
 0x62a   :  { %v5810_v48 = vpack.c.bf16 %v6990_v37, %v1475_v51  ;;  %v2125_v45 = vld [vmem:[%s7389_s3 + $0x10] sm:$0xff] }
 0x62c   :  { %5811 = vmatprep.subr.bf16.mxu0 %v5810_v48 }
 0x62d   :  { %5813 = vmatpush3.bf16.msra.mxu0 %v5810_v48 }
 0x62e   :  { %5879 = vmatprep.subr.bf16.mxu0 %v5810_v48 }
 0x630   :  { %5062 = vmatmul.mubr.msk.f32.vlgmr.msra.gmra.mrb[18].mxu0 %vm343_vm1, %v1478_v40  ;;  %v1922_v40 = vld [vmem:[%s7385_s17 + $0x20] sm:$0xff] }
 0x631   :  { %5881 = vmatpush3.bf16.msra.mxu0 %v5810_v48  ;;  %5138 = vmatprep.mubr.msk.f32.mxu0 %vm343_vm1, %v1479_v41  ;;  %v1923_v41 = vld [vmem:[%s7385_s17 + $0x28] sm:$0xff] }
 0x632   :  { %5914 = vmatprep.subr.bf16.mxu0 %v6352_v52 }
 0x634   :  { %5139 = vmatmul.mubr.msk.f32.vlgmr.msra.gmra.mrb[20].mxu0 %vm343_vm1, %v1480_v1  ;;  %v5921_v1 = vpack.c.bf16 %v1923_v41, %v1922_v40 }
 0x635   :  { %5192 = vmatprep.mubr.msk.f32.mxu0 %vm6353_vm2, %v6350_v21 }
 0x703   :  { %v5063_v39 = vpop.f32.mrb[18].mxu0 }
 0x704   :  { %v1601_v42 = vpop.f32.mrb[19].mxu0 }
 0x705   :  { %5096 = vmatprep.mubr.f32.mxu1 %v1601_v42 }
 0x706   :  { %5097 = vmatmul.mubr.f32.vlgmr.msra.gmra.mrb[18].mxu1 %v5063_v39 }
 0x707   :  { %5849 = vmatpush3.bf16.msra.mxu1 %v5846_v5  ;;  %5131 = vmatprep.mubr.f32.mxu1 %v1475_v51  ;;  %v7005_v54 = vpop.f32.mrb[20].mxu0  ;;  %v1919_v51 = vld [vmem:[%s7385_s17 + $0x8] sm:$0xff]  ;;  %v5924_v5 = vpack.c.bf16 %v1925_v3, %v1924_v2  ;;  %v2131_v2 = vld [vmem:[%s7391_s14] sm:$0xff] }
 0x708   :  { %5851 = vmatprep.subr.bf16.mxu1 %v5850_v43  ;;  %v1832_v56 = vpop.f32.mrb[21].mxu0  ;;  %v5915_v36 = vpack.c.bf16 %v1919_v51, %v1918_v35  ;;  %v2127_v51 = vld [vmem:[%s7389_s3 + $0x20] sm:$0xff]  ;;  %v2132_v3 = vld [vmem:[%s7391_s14 + $0x8] sm:$0xff] }
 0x70a   :  { %5916 = vmatpush3.bf16.msra.mxu0 %v5915_v36 }
 0x70b   :  { %5853 = vmatpush3.bf16.msra.mxu1 %v5850_v43  ;;  %5917 = vmatprep.subr.bf16.mxu0 %v6352_v52 }
 0x70c   :  { %5855 = vmatprep.subr.bf16.mxu1 %v5854_v55 }
 0x70f   :  { %5857 = vmatpush3.bf16.msra.mxu1 %v5854_v55 }
 0x710   :  { %5859 = vmatprep.subr.bf16.mxu1 %v5858_v59 }
 0x713   :  { %5861 = vmatpush3.bf16.msra.mxu1 %v5858_v59 }
 0x714   :  { %5863 = vmatprep.subr.bf16.mxu1 %v5862_v62 }
 0x717   :  { %5865 = vmatpush3.bf16.msra.mxu1 %v5862_v62 }
 0x718   :  { %5867 = vmatprep.subr.bf16.mxu1 %v5866_v4 }
 0x71b   :  { %5869 = vmatpush3.bf16.msra.mxu1 %v5866_v4 }
 0x71c   :  { %5871 = vmatprep.subr.bf16.mxu1 %v5870_v8 }
 0x71f   :  { %5873 = vmatpush3.bf16.msra.mxu1 %v5870_v8 }
 0x720   :  { %5875 = vmatprep.subr.bf16.mxu1 %v5874_v11 }
 0x723   :  { %5877 = vmatpush3.bf16.msra.mxu1 %v5874_v11 }
 0x724   :  { %5883 = vmatprep.subr.bf16.mxu1 %v5882_v14 }
 0x726   :  { %5132 = vmatmul.mubr.f32.vlgmr.msra.gmra.mrb[18].mxu1 %v6990_v37  ;;  %v1921_v37 = vld [vmem:[%s7385_s17 + $0x18] sm:$0xff]  ;;  %s7413_s17 = sld [smem:[#allocation40_spill]] }
 0x727   :  { %5885 = vmatpush3.bf16.msra.mxu1 %v5882_v14  ;;  %5173 = vmatprep.mubr.f32.mxu1 %v1832_v56  ;;  %v5918_v48 = vpack.c.bf16 %v1921_v37, %v1920_v47  ;;  %v2129_v37 = vld [vmem:[%s7389_s3 + $0x30] sm:$0xff] }
 0x728   :  { %5887 = vmatprep.subr.bf16.mxu1 %v5886_v17 }
 0x729   :  { %5919 = vmatpush3.bf16.msra.mxu0 %v5918_v48 }
 0x72a   :  { %5920 = vmatprep.subr.bf16.mxu0 %v6352_v52 }
 0x72b   :  { %5889 = vmatpush3.bf16.msra.mxu1 %v5886_v17  ;;  %v1926_v17 = vld [vmem:[%s7386_s21] sm:$0x1]  ;;  %s7414_s21 = sld [smem:[#allocation38_spill]] }
 0x72c   :  { %5891 = vmatprep.subr.bf16.mxu1 %v5890_v20 }
 0x72d   :  { %5922 = vmatpush3.bf16.msra.mxu0 %v5921_v1 }
 0x72e   :  { %5923 = vmatprep.subr.bf16.mxu0 %v6352_v52 }
 0x72f   :  { %5893 = vmatpush3.bf16.msra.mxu1 %v5890_v20 }
 0x730   :  { %5895 = vmatprep.subr.bf16.mxu1 %v5894_v23 }
 0x731   :  { %5925 = vmatpush3.bf16.msra.mxu0 %v5924_v5 }
 0x732   :  { %5926 = vmatprep.subr.bf16.mxu0 %v6352_v52 }
 0x733   :  { %5897 = vmatpush3.bf16.msra.mxu1 %v5894_v23 }
 0x734   :  { %5899 = vmatprep.subr.bf16.mxu1 %v5898_v26 }
 0x737   :  { %5901 = vmatpush3.bf16.msra.mxu1 %v5898_v26 }
 0x738   :  { %5903 = vmatprep.subr.bf16.mxu1 %v5902_v30 }
 0x73b   :  { %5905 = vmatpush3.bf16.msra.mxu1 %v5902_v30  ;;  %v2121_v30 = vld [vmem:[%s7388_s29] sm:$0xff]  ;;  %s7416_s29 = sld [smem:[#allocation41_spill]] }
 0x73c   :  { %5907 = vmatprep.subr.bf16.mxu1 %v5906_v50 }
 0x73f   :  { %5909 = vmatpush3.bf16.msra.mxu1 %v5906_v50  ;;  %v2122_v50 = vld [vmem:[%s7390_s8] sm:$0xff] }
 0x740   :  { %5911 = vmatprep.subr.bf16.mxu1 %v5910_v46 }
 0x743   :  { %5913 = vmatpush3.bf16.msra.mxu1 %v5910_v46  ;;  %v2126_v46 = vld [vmem:[%s7389_s3 + $0x18] sm:$0xff] }
 0x744   :  { %5293 = vmatprep.subr.mxu1 %v6350_v21  ;;  %v5948_v35 = vpack.c.bf16 %v2126_v46, %v2125_v45 }
 0x746   :  { %5174 = vmatmul.mubr.f32.vlgmr.msra.gmra.mrb[18].mxu1 %v7005_v54 }
 0x747   :  { %5295 = vmatprep.mubr.msk.f32.mxu1 %vm6353_vm2, %v6350_v21 }
 0x819   :  { %v5175_v28 = vpop.f32.mrb[18].mxu1 }
 0x81a   :  { %v1930_v32 = vsel %vm1928_vm3, %v5175_v28, 0.0  ;;  %v1907_v39 = vpop.f32.mrb[19].mxu1 }
 0x81b   :  { %v1929_v42 = vsel %vm1928_vm3, %v1907_v39, 0.0 }
 0x81c   :  { %v1931_v43 = vadd.f32 %v1930_v32, %v1929_v42  ;;  %v2133_v42 = vld [vmem:[%s7391_s14 + $0x10] sm:$0xff] }
 0x81e   :  { %v1932_v44 = vrot.slane %v1931_v43, 4 }
 0x820   :  { %v1933_v53 = vadd.f32 %v1932_v44, %v1931_v43  ;;  %v2134_v43 = vld [vmem:[%s7391_s14 + $0x18] sm:$0xff] }
 0x821   :  { %v5960_v44 = vpack.c.bf16 %v2134_v43, %v2133_v42  ;;  %v3000_v43 = vld [vmem:[%s7398_s10] sm:$0xff] }
 0x822   :  { %v1934_v54 = vrot.slane %v1933_v53, 2 }
 0x824   :  { %v1935_v55 = vadd.f32 %v1934_v54, %v1933_v53  ;;  %v2135_v53 = vld [vmem:[%s7391_s14 + $0x20] sm:$0xff]  ;;  %v2136_v54 = vld [vmem:[%s7391_s14 + $0x28] sm:$0xff] }
 0x826   :  { %v1936_v56 = vrot.slane %v1935_v55, 1 }
 0x828   :  { %v1937_v57 = vadd.f32 %v1936_v56, %v1935_v55  ;;  %v5963_v55 = vpack.c.bf16 %v2136_v54, %v2135_v53  ;;  %v2137_v56 = vld [vmem:[%s7391_s14 + $0x30] sm:$0xff] }
 0x82a   :  { %5193 = vmatmul.mubr.msk.f32.vlgmr.msra.gmra.mrb[22].mxu0 %vm1928_vm3, %v1937_v57  ;;  %v2138_v57 = vld [vmem:[%s7391_s14 + $0x38] sm:$0xff] }
 0x82b   :  { %5928 = vmatpush3.bf16.msra.mxu0 %v5915_v36  ;;  %5211 = vmatprep.mubr.msk.f32.mxu0 %vm6353_vm2, %v6350_v21  ;;  %v2128_v36 = vld [vmem:[%s7389_s3 + $0x28] sm:$0xff] }
 0x82c   :  { %5929 = vmatprep.subr.bf16.mxu0 %v6352_v52  ;;  %v5951_v47 = vpack.c.bf16 %v2128_v36, %v2127_v51 }
 0x82f   :  { %5931 = vmatpush3.bf16.msra.mxu0 %v5918_v48  ;;  %v2130_v48 = vld [vmem:[%s7389_s3 + $0x38] sm:$0xff] }
 0x830   :  { %5932 = vmatprep.subr.bf16.mxu0 %v6352_v52  ;;  %v5954_v40 = vpack.c.bf16 %v2130_v48, %v2129_v37 }
 0x833   :  { %5934 = vmatpush3.bf16.msra.mxu0 %v5921_v1 }
 0x834   :  { %5935 = vmatprep.subr.bf16.mxu0 %v6352_v52 }
 0x837   :  { %5937 = vmatpush3.bf16.msra.mxu0 %v5924_v5 }
 0x838   :  { %5938 = vmatprep.subr.bf16.mxu0 %v6352_v52 }
 0x8fd   :  { %v2007_v58 = vpop.f32.mrb[22].mxu0 }
 0x8fe   :  { %v2014_v59 = vrot.slane %v2007_v58, %v6843_v38  ;;  %v5194_v60 = vpop.f32.mrb[23].mxu0  ;;  %v5966_v58 = vpack.c.bf16 %v2138_v57, %v2137_v56  ;;  %v2813_v57 = vld [vmem:[%s7399_s11] sm:$0x1] }
 0x900   :  { %v2015_v61 = vsub.f32 %v1907_v39, %v2014_v59  ;;  %v2016_v62 = vsub.f32 %v5175_v28, %v2014_v59  ;;  %v5957_v28 = vpack.c.bf16 %v2132_v3, %v2131_v2 }
 0x902   :  { %v2017_v63 = vmul.f32 %v2015_v61, %v2015_v61  ;;  %v2018_v0 = vmul.f32 %v2016_v62, %v2016_v62 }
 0x904   :  { %v2019_v4 = vsel %vm1928_vm3, %v2017_v63, 0.0  ;;  %v2020_v6 = vsel %vm1928_vm3, %v2018_v0, 0.0 }
 0x905   :  { %v2021_v7 = vadd.f32 %v2020_v6, %v2019_v4  ;;  %v2430_v6 = vld [vmem:[%s7393_s24] sm:$0xff] }
 0x907   :  { %v2022_v8 = vrot.slane %v2021_v7, 4 }
 0x909   :  { %v2023_v9 = vadd.f32 %v2022_v8, %v2021_v7  ;;  %v2431_v7 = vld [vmem:[%s7394_s30] sm:$0xff] }
 0x90b   :  { %v2024_v10 = vrot.slane %v2023_v9, 2 }
 0x90d   :  { %v2025_v11 = vadd.f32 %v2024_v10, %v2023_v9  ;;  %v2434_v9 = vld [vmem:[%s7392_s19 + $0x10] sm:$0xff]  ;;  %v2435_v10 = vld [vmem:[%s7392_s19 + $0x18] sm:$0xff] }
 0x90f   :  { %v2026_v12 = vrot.slane %v2025_v11, 1 }
 0x911   :  { %v2027_v13 = vadd.f32 %v2026_v12, %v2025_v11  ;;  %v5972_v11 = vpack.c.bf16 %v2435_v10, %v2434_v9  ;;  %v2436_v12 = vld [vmem:[%s7395_s6] sm:$0xff] }
 0x913   :  { %5212 = vmatmul.mubr.msk.f32.vlgmr.msra.gmra.mrb[24].mxu0 %vm1928_vm3, %v2027_v13  ;;  %v2437_v13 = vld [vmem:[%s7395_s6 + $0x8] sm:$0xff] }
 0x914   :  { %5218 = vmatprep.mubr.msk.f32.mxu0 %vm6353_vm2, %v6350_v21 }
 0x9e6   :  { %v2097_v14 = vpop.f32.mrb[24].mxu0 }
 0x9e7   :  { %v2098_v15 = vadd.f32 1e-05, %v2097_v14  ;;  %v5213_v16 = vpop.f32.mrb[25].mxu0  ;;  %v5975_v14 = vpack.c.bf16 %v2437_v13, %v2436_v12  ;;  %v3004_v12 = vld [vmem:[%s7404_s23] sm:$0xff]  ;;  %v3005_v13 = vld [vmem:[%s7404_s23 + $0x8] sm:$0xff] }
 0x9e8   :  { %v2439_v16 = vld [vmem:[%s7395_s6 + $0x18] sm:$0xff] }
 0x9e9   :  { %6249 = vrsqrt.f32 %v2098_v15  ;;  %v2438_v15 = vld [vmem:[%s7395_s6 + $0x10] sm:$0xff] }
 0x9f3   :  { %v6250_v18 = vpop.eup %6249 }
 0x9f4   :  { %v2102_v19 = vmul.f32 %v6250_v18, %v1926_v17 }
 0x9f6   :  { %v2107_v20 = vrot.slane %v2102_v19, %v6843_v38 }
 0x9f8   :  { %v2109_v33 = vmul.f32 %v2107_v20, %v2015_v61  ;;  %v2110_v23 = vmul.f32 %v2107_v20, %v2016_v62  ;;  %v2432_v61 = vld [vmem:[%s7392_s19] sm:$0xff]  ;;  %v2433_v62 = vld [vmem:[%s7392_s19 + $0x8] sm:$0xff] }
 0x9f9   :  { %v5969_v8 = vpack.c.bf16 %v2433_v62, %v2432_v61  ;;  %v4654_v61 = vld [vmem:[%s7400_s15] ss:$0 sm:$0xff] }
 0x9fa   :  { %v2117_v24 = vadd.f32 %v4642_v22, %v2109_v33  ;;  %v2118_v25 = vadd.f32 %v4642_v22, %v2110_v23  ;;  %v5978_v22 = vpack.c.bf16 %v2439_v16, %v2438_v15  ;;  %v2440_v33 = vld [vmem:[%s7396_s27] sm:$0xff]  ;;  %v2441_v23 = vld [vmem:[%s7396_s27 + $0x8] sm:$0xff]  ;;  %v5999_v16 = vpack.c.bf16 %v3005_v13, %v3004_v12 }
 0x9fb   :  { %v3901_v13 = vld [vmem:[%s7412_s13 + $0x20] sm:$0xff] }
 0x9fc   :  { %v2119_v26 = vmax.f32 %v2117_v24, 0.0  ;;  %v2120_v27 = vmax.f32 %v2118_v25, 0.0  ;;  %v5981_v24 = vpack.c.bf16 %v2441_v23, %v2440_v33  ;;  %v2442_v25 = vld [vmem:[%s7396_s27 + $0x10] sm:$0xff] }
 0x9fe   :  { %v5939_v29 = vpack.c.bf16 %v2120_v27, %v2119_v26  ;;  %v2443_v26 = vld [vmem:[%s7396_s27 + $0x18] sm:$0xff] }
 0x9ff   :  { %v5984_v27 = vpack.c.bf16 %v2443_v26, %v2442_v25 }
 0xa00   :  { %5940 = vmatpush3.bf16.msra.mxu0 %v5939_v29 }
 0xa01   :  { %5941 = vmatprep.subr.bf16.mxu0 %v6352_v52 }
 0xa03   :  { %5219 = vmatmul.mubr.msk.f32.vlgmr.msra.gmra.mrb[26].mxu0 %vm343_vm1, %v2121_v30  ;;  %v2812_v30 = vld [vmem:[%s7397_s7 + $0x8] sm:$0xff] }
 0xa04   :  { %5943 = vmatpush3.bf16.msra.mxu0 %v5939_v29  ;;  %5225 = vmatprep.mubr.msk.f32.mxu0 %vm6353_vm2, %v6350_v21  ;;  %v2811_v29 = vld [vmem:[%s7397_s7] sm:$0xff] }
 0xa05   :  { %5944 = vmatprep.subr.bf16.mxu0 %v6352_v52  ;;  %v5987_v49 = vpack.c.bf16 %v2812_v30, %v2811_v29 }
 0xa07   :  { %5226 = vmatmul.mubr.msk.f32.vlgmr.msra.gmra.mrb[28].mxu0 %vm343_vm1, %v2122_v50 }
 0xa08   :  { %5946 = vmatpush3.bf16.msra.mxu0 %v5945_v34  ;;  %5244 = vmatprep.mubr.msk.f32.mxu0 %vm6353_vm2, %v6350_v21 }
 0xa09   :  { %5947 = vmatprep.subr.bf16.mxu0 %v6352_v52 }
 0xa0c   :  { %5949 = vmatpush3.bf16.msra.mxu0 %v5948_v35 }
 0xa0d   :  { %5950 = vmatprep.subr.bf16.mxu0 %v6352_v52 }
 0xa10   :  { %5952 = vmatpush3.bf16.msra.mxu0 %v5951_v47 }
 0xa11   :  { %5953 = vmatprep.subr.bf16.mxu0 %v6352_v52 }
 0xa14   :  { %5955 = vmatpush3.bf16.msra.mxu0 %v5954_v40 }
 0xa15   :  { %5956 = vmatprep.subr.bf16.mxu0 %v6352_v52 }
 0xad6   :  { %v2208_v41 = vpop.f32.mrb[26].mxu0 }
 0xad7   :  { %v5220_v1 = vpop.f32.mrb[27].mxu0 }
 0xada   :  { %v2281_v5 = vpop.f32.mrb[28].mxu0 }
 0xadb   :  { %v2285_v32 = vmax.f32 %v2208_v41, %v2281_v5  ;;  %v5227_v39 = vpop.f32.mrb[29].mxu0 }
 0xadd   :  { %5245 = vmatmul.mubr.msk.f32.vlgmr.msra.gmra.mrb[30].mxu0 %vm1928_vm3, %v2285_v32 }
 0xade   :  { %5958 = vmatpush3.bf16.msra.mxu0 %v5957_v28  ;;  %5263 = vmatprep.mubr.msk.f32.mxu0 %vm6353_vm2, %v6350_v21 }
 0xadf   :  { %5959 = vmatprep.subr.bf16.mxu0 %v6352_v52 }
 0xae2   :  { %5961 = vmatpush3.bf16.msra.mxu0 %v5960_v44  ;;  %v3001_v44 = vld [vmem:[%s7398_s10 + $0x8] sm:$0xff] }
 0xae3   :  { %5962 = vmatprep.subr.bf16.mxu0 %v6352_v52  ;;  %v5993_v53 = vpack.c.bf16 %v3001_v44, %v3000_v43 }
 0xae6   :  { %5964 = vmatpush3.bf16.msra.mxu0 %v5963_v55 }
 0xae7   :  { %5965 = vmatprep.subr.bf16.mxu0 %v6352_v52 }
 0xaea   :  { %5967 = vmatpush3.bf16.msra.mxu0 %v5966_v58 }
 0xaeb   :  { %5266 = vmatprep.subr.mxu0 %v6350_v21 }
 0xaed   :  { %5264 = vmatmul.mubr.msk.f32.vlgmr.msra.gmra.mrb[32].mxu0 %vm1928_vm3, %v2285_v32 }
 0xaee   :  { %5268 = vmatprep.mubr.msk.f32.mxu0 %vm6353_vm2, %v6350_v21 }
 0xbb0   :  { %v2355_v59 = vpop.f32.mrb[30].mxu0 }
 0xbb1   :  { %v5246_v60 = vpop.f32.mrb[31].mxu0 }
 0xbc0   :  { %v2425_v63 = vpop.f32.mrb[32].mxu0 }
 0xbc1   :  { %v2429_v0 = vmax.f32 %v2355_v59, %v2425_v63  ;;  %v5265_v4 = vpop.f32.mrb[33].mxu0 }
 0xbc2   :  { %v2998_v4 = vld [vmem:[%s7401_s16] sm:$0xff] }
 0xbc3   :  { %5267 = vmatpush3.msra.mxu0 %v2429_v0  ;;  %5294 = vmatpush3.msra.mxu1 %v2429_v0 }
 0xbc4   :  { %5269 = vmatmul.mubr.msk.f32.vlgmr.msra.gmra.mrb[34].mxu0 %vm2444_vm4, %v2430_v6  ;;  %5296 = vmatmul.mubr.msk.f32.vlgmr.msra.gmra.mrb[20].mxu1 %vm2444_vm4, %v2431_v7  ;;  %v2999_v6 = vld [vmem:[%s7402_s18] sm:$0xff] }
 0xbc5   :  { %5968 = vmatprep.subr.bf16.mxu0 %v6352_v52  ;;  %5279 = vmatprep.mubr.msk.f32.mxu0 %vm6353_vm2, %v6350_v21  ;;  %v3002_v7 = vld [vmem:[%s7403_s22] sm:$0xff] }
 0xbc6   :  { %5970 = vmatpush3.bf16.msra.mxu0 %v5969_v8  ;;  %5986 = vmatprep.subr.bf16.mxu1 %v6352_v52  ;;  %v3003_v8 = vld [vmem:[%s7403_s22 + $0x8] sm:$0xff] }
 0xbc7   :  { %5971 = vmatprep.subr.bf16.mxu0 %v6352_v52  ;;  %5313 = vmatprep.mubr.msk.f32.mxu1 %vm6353_vm2, %v6350_v21  ;;  %v5996_v9 = vpack.c.bf16 %v3003_v8, %v3002_v7  ;;  %v3897_v7 = vld [vmem:[%s7412_s13] sm:$0xff]  ;;  %v3898_v8 = vld [vmem:[%s7412_s13 + $0x8] sm:$0xff] }
 0xbc8   :  { %5988 = vmatpush3.bf16.msra.mxu1 %v5987_v49 }
 0xbc9   :  { %5989 = vmatprep.subr.bf16.mxu1 %v6352_v52 }
 0xbca   :  { %5973 = vmatpush3.bf16.msra.mxu0 %v5972_v11 }
 0xbcb   :  { %5974 = vmatprep.subr.bf16.mxu0 %v6352_v52 }
 0xc97   :  { %v2514_v17 = vpop.f32.mrb[34].mxu0  ;;  %v2733_v18 = vpop.f32.mrb[20].mxu1 }
 0xc98   :  { %5280 = vmatmul.mubr.msk.f32.vlgmr.msra.gmra.mrb[36].mxu0 %vm245_vm0, %v2514_v17  ;;  %v5270_v19 = vpop.f32.mrb[35].mxu0  ;;  %v5297_v20 = vpop.f32.mrb[21].mxu1  ;;  %v3372_v17 = vld [vmem:[%s7405_s26] sm:$0xff] }
 0xc99   :  { %5976 = vmatpush3.bf16.msra.mxu0 %v5975_v14  ;;  %5290 = vmatprep.mubr.msk.f32.mxu0 %vm6353_vm2, %v6350_v21  ;;  %v3374_v20 = vld [vmem:[%s7405_s26 + $0x10] sm:$0xff] }
 0xc9a   :  { %5977 = vmatprep.subr.bf16.mxu0 %v6352_v52 }
 0xc9d   :  { %5979 = vmatpush3.bf16.msra.mxu0 %v5978_v22  ;;  %v3375_v22 = vld [vmem:[%s7405_s26 + $0x18] sm:$0xff] }
 0xc9e   :  { %5980 = vmatprep.subr.bf16.mxu0 %v6352_v52  ;;  %v6005_v33 = vpack.c.bf16 %v3375_v22, %v3374_v20  ;;  %v3567_v22 = vld [vmem:[%s7411_s9 + $0x10] sm:$0xff] }
 0xca0   :  { %5291 = vmatmul.mubr.msk.f32.vlgmr.msra.gmra.mrb[36].mxu0 %vm245_vm0, %v2429_v0 }
 0xca1   :  { %5982 = vmatpush3.bf16.msra.mxu0 %v5981_v24  ;;  %5306 = vmatprep.mubr.msk.f32.mxu0 %vm6353_vm2, %v6350_v21 }
 0xca2   :  { %5983 = vmatprep.subr.bf16.mxu0 %v6352_v52 }
 0xca5   :  { %5985 = vmatpush3.bf16.msra.mxu0 %v5984_v27 }
 0xca6   :  { %5323 = vmatprep.subr.mxu0 %v6350_v21 }
 0xca8   :  { %5307 = vmatmul.mubr.msk.f32.vlgmr.msra.gmra.mrb[36].mxu0 %vm245_vm0, %v2733_v18  ;;  %v3373_v18 = vld [vmem:[%s7405_s26 + $0x8] sm:$0xff] }
 0xca9   :  { %5325 = vmatprep.mubr.msk.f32.mxu0 %vm6353_vm2, %v6350_v21  ;;  %v6002_v19 = vpack.c.bf16 %v3373_v18, %v3372_v17  ;;  %v3904_v17 = vld [vmem:[%s7412_s13 + $0x38] sm:$0xff] }
 0xd7b   :  { %v2806_v31 = vpop.f32.mrb[36].mxu0 }
 0xd7c   :  { %v2815_v50 = vsel %vm343_vm1, %v2806_v31, 0.0  ;;  %v5308_v34 = vpop.f32.mrb[37].mxu0 }
 0xd7d   :  { %v2816_v45 = vrot.slane %v2815_v50, 4 }
 0xd7f   :  { %v2817_v46 = vadd.f32 %v2816_v45, %v2815_v50 }
 0xd81   :  { %v2818_v35 = vrot.slane %v2817_v46, 2 }
 0xd83   :  { %v2819_v51 = vadd.f32 %v2818_v35, %v2817_v46 }
 0xd85   :  { %v2820_v36 = vrot.slane %v2819_v51, 1 }
 0xd87   :  { %v2821_v47 = vadd.f32 %v2820_v36, %v2819_v51 }
 0xd89   :  { %5314 = vmatmul.mubr.msk.f32.vlgmr.msra.gmra.mrb[22].mxu1 %vm343_vm1, %v2821_v47 }
 0xd8a   :  { %5991 = vmatpush3.bf16.msra.mxu1 %v5987_v49  ;;  %5320 = vmatprep.mubr.msk.f32.mxu1 %vm6353_vm2, %v6350_v21 }
 0xd8b   :  { %5992 = vmatprep.subr.bf16.mxu1 %v6352_v52 }
 0xe5c   :  { %v2891_v37 = vpop.f32.mrb[22].mxu1 }
 0xe5d   :  { %v2898_v48 = vrot.slane %v2891_v37, %v6843_v38  ;;  %v5315_v40 = vpop.f32.mrb[23].mxu1 }
 0xe5f   :  { %v2899_v41 = vsub.f32 %v2806_v31, %v2898_v48 }
 0xe61   :  { %v2900_v1 = vmul.f32 %v2899_v41, %v2899_v41 }
 0xe63   :  { %v2901_v2 = vsel %vm343_vm1, %v2900_v1, 0.0  ;;  %v3561_v1 = vld [vmem:[%s7406_s1] sm:$0xff] }
 0xe64   :  { %v2902_v3 = vrot.slane %v2901_v2, 4 }
 0xe66   :  { %v2903_v5 = vadd.f32 %v2902_v3, %v2901_v2  ;;  %v3569_v2 = vld [vmem:[%s7407_s28] sm:$0xff]  ;;  %v3570_v3 = vld [vmem:[%s7407_s28 + $0x8] sm:$0xff] }
 0xe68   :  { %v2904_v28 = vrot.slane %v2903_v5, 2 }
 0xe6a   :  { %v2905_v32 = vadd.f32 %v2904_v28, %v2903_v5  ;;  %v6013_v5 = vpack.c.bf16 %v3570_v3, %v3569_v2 }
 0xe6c   :  { %v2906_v39 = vrot.slane %v2905_v32, 1 }
 0xe6e   :  { %v2907_v42 = vadd.f32 %v2906_v39, %v2905_v32 }
 0xe70   :  { %5321 = vmatmul.mubr.msk.f32.vlgmr.msra.gmra.mrb[24].mxu1 %vm343_vm1, %v2907_v42  ;;  %v3376_v42 = vld [vmem:[%s7408_s2] sm:$0x1] }
 0xe71   :  { %5332 = vmatprep.mubr.msk.f32.mxu1 %vm6353_vm2, %v6350_v21  ;;  %5994 = vmatpush3.bf16.msra.mxu1 %v5993_v53 }
 0xe72   :  { %5995 = vmatprep.subr.bf16.mxu1 %v6352_v52 }
 0xf43   :  { %v2977_v54 = vpop.f32.mrb[24].mxu1 }
 0xf44   :  { %v2978_v55 = vadd.f32 1e-05, %v2977_v54  ;;  %v5322_v56 = vpop.f32.mrb[25].mxu1  ;;  %v4662_v54 = vld [vmem:[%s7409_s0] ss:$0 sm:$0xff] }
 0xf46   :  { %6251 = vrsqrt.f32 %v2978_v55 }
 0xf50   :  { %v6252_v58 = vpop.eup %6251 }
 0xf51   :  { %v2982_v59 = vmul.f32 %v6252_v58, %v2813_v57  ;;  %v3562_v58 = vld [vmem:[%s7406_s1 + $0x8] sm:$0xff] }
 0xf53   :  { %v2987_v60 = vrot.slane %v2982_v59, %v6843_v38  ;;  %v3563_v59 = vld [vmem:[%s7410_s5] sm:$0xff] }
 0xf55   :  { %v2989_v62 = vmul.f32 %v2987_v60, %v2899_v41  ;;  %v3564_v60 = vld [vmem:[%s7410_s5 + $0x8] sm:$0xff] }
 0xf57   :  { %v2996_v63 = vadd.f32 %v4654_v61, %v2989_v62  ;;  %v3571_v61 = vld [vmem:[%s7407_s28 + $0x10] sm:$0xff]  ;;  %v3572_v62 = vld [vmem:[%s7407_s28 + $0x18] sm:$0xff] }
 0xf59   :  { %v2997_v0 = vmax.f32 %v2996_v63, 0.0  ;;  %v6017_v63 = vpack.c.bf16 %v3572_v62, %v3571_v61  ;;  %v3913_v62 = vld [vmem:[%s7414_s21] sm:$0x1] }
 0xf5b   :  { %5324 = vmatpush3.msra.mxu0 %v2997_v0 }
 0xf5c   :  { %5326 = vmatmul.mubr.msk.f32.vlgmr.msra.gmra.mrb[38].mxu0 %vm2444_vm4, %v2998_v4  ;;  %5342 = vmatprep.subr.mxu0 %v6350_v21  ;;  %v3566_v4 = vld [vmem:[%s7411_s9 + $0x8] sm:$0xff] }
 0xf5d   :  { %5343 = vmatpush3.msra.mxu0 %v2997_v0  ;;  %5344 = vmatprep.mubr.msk.f32.mxu0 %vm6353_vm2, %v6350_v21 }
 0xf5e   :  { %6001 = vmatprep.subr.bf16.mxu0 %v6352_v52 }
 0xf60   :  { %5345 = vmatmul.mubr.msk.f32.vlgmr.msra.gmra.mrb[40].mxu0 %vm2444_vm4, %v2999_v6 }
 0xf61   :  { %5362 = vmatprep.mubr.msk.f32.mxu0 %vm6353_vm2, %v6350_v21  ;;  %6003 = vmatpush3.bf16.msra.mxu0 %v6002_v19 }
 0xf62   :  { %6004 = vmatprep.subr.bf16.mxu0 %v6352_v52 }
 0xf65   :  { %6006 = vmatpush3.bf16.msra.mxu0 %v6005_v33 }
0x102f   :  { %v3075_v10 = vpop.f32.mrb[38].mxu0 }
0x1030   :  { %5333 = vmatmul.mubr.msk.f32.vlgmr.msra.gmra.mrb[26].mxu1 %vm343_vm1, %v3075_v10  ;;  %v5327_v11 = vpop.f32.mrb[39].mxu0  ;;  %v6030_v10 = vpack.c.bf16 %v3898_v8, %v3897_v7 }
0x1031   :  { %5997 = vmatpush3.bf16.msra.mxu1 %v5996_v9  ;;  %5339 = vmatprep.mubr.msk.f32.mxu1 %vm6353_vm2, %v6350_v21  ;;  %v3899_v9 = vld [vmem:[%s7412_s13 + $0x10] sm:$0xff]  ;;  %v3900_v11 = vld [vmem:[%s7412_s13 + $0x18] sm:$0xff] }
0x1032   :  { %5998 = vmatprep.subr.bf16.mxu1 %v6352_v52  ;;  %v6033_v12 = vpack.c.bf16 %v3900_v11, %v3899_v9 }
0x1033   :  { %v3294_v14 = vpop.f32.mrb[40].mxu0 }
0x1034   :  { %v5346_v15 = vpop.f32.mrb[41].mxu0 }
0x1038   :  { %5340 = vmatmul.mubr.msk.f32.vlgmr.msra.gmra.mrb[26].mxu1 %vm343_vm1, %v2997_v0  ;;  %v3565_v0 = vld [vmem:[%s7411_s9] sm:$0xff] }
0x1039   :  { %6000 = vmatpush3.bf16.msra.mxu1 %v5999_v16  ;;  %5351 = vmatprep.mubr.msk.f32.mxu1 %vm6353_vm2, %v6350_v21  ;;  %v6021_v6 = vpack.c.bf16 %v3566_v4, %v3565_v0  ;;  %v3903_v16 = vld [vmem:[%s7412_s13 + $0x30] sm:$0xff] }
0x103a   :  { %6007 = vmatprep.subr.bf16.mxu1 %v6352_v52  ;;  %v6039_v18 = vpack.c.bf16 %v3904_v17, %v3903_v16  ;;  %v4098_v16 = vld [vmem:[%s7413_s17 + $0x8] sm:$0xff] }
0x1040   :  { %5352 = vmatmul.mubr.msk.f32.vlgmr.msra.gmra.mrb[26].mxu1 %vm343_vm1, %v3294_v14  ;;  %v3902_v14 = vld [vmem:[%s7412_s13 + $0x28] sm:$0xff] }
0x1041   :  { %5373 = vmatprep.mubr.msk.f32.mxu1 %vm6353_vm2, %v6350_v21  ;;  %6009 = vmatpush3.bf16.msra.mxu1 %v6002_v19  ;;  %v6036_v15 = vpack.c.bf16 %v3902_v14, %v3901_v13  ;;  %v4121_v14 = vld [vmem:[%s6621_s20] sm:$0xff] }
0x1042   :  { %6010 = vmatprep.subr.bf16.mxu1 %v6352_v52 }
0x1045   :  { %6012 = vmatpush3.bf16.msra.mxu1 %v6005_v33  ;;  %v3568_v33 = vld [vmem:[%s7411_s9 + $0x18] sm:$0xff] }
0x1046   :  { %6014 = vmatprep.subr.bf16.mxu1 %v6013_v5 }
0x1113   :  { %v3367_v23 = vpop.f32.mrb[26].mxu1 }
0x1114   :  { %v3378_v24 = vsel %vm245_vm0, %v3367_v23, 0.0  ;;  %v5353_v25 = vpop.f32.mrb[27].mxu1 }
0x1115   :  { %v3379_v26 = vrot.slane %v3378_v24, 4  ;;  %v6025_v25 = vpack.c.bf16 %v3568_v33, %v3567_v22  ;;  %v4124_v22 = vld [vmem:[%s6621_s20 + $0x18] sm:$0xff]  ;;  %v4102_v33 = vld [vmem:[%s7416_s29 + $0x8] sm:$0xff] }
0x1117   :  { %v3380_v27 = vadd.f32 %v3379_v26, %v3378_v24  ;;  %v3905_v26 = vld [vmem:[%s7412_s13 + $0x40] sm:$0xff] }
0x1119   :  { %v3381_v29 = vrot.slane %v3380_v27, 2 }
0x111b   :  { %v3382_v30 = vadd.f32 %v3381_v29, %v3380_v27  ;;  %v3906_v27 = vld [vmem:[%s7412_s13 + $0x48] sm:$0xff] }
0x111c   :  { %v6042_v29 = vpack.c.bf16 %v3906_v27, %v3905_v26  ;;  %v4126_v26 = vld [vmem:[%s6621_s20 + $0x28] sm:$0xff]  ;;  %v4104_v27 = vld [vmem:[%s7416_s29 + $0x18] sm:$0xff] }
0x111d   :  { %v3383_v49 = vrot.slane %v3382_v30, 1 }
0x111f   :  { %v3384_v31 = vadd.f32 %v3383_v49, %v3382_v30  ;;  %v3908_v30 = vld [vmem:[%s7412_s13 + $0x58] sm:$0xff] }
0x1121   :  { %5363 = vmatmul.mubr.msk.f32.vlgmr.msra.gmra.mrb[42].mxu0 %vm245_vm0, %v3384_v31  ;;  %v3909_v31 = vld [vmem:[%s7412_s13 + $0x60] sm:$0xff] }
0x1122   :  { %5378 = vmatprep.mubr.msk.f32.mxu0 %vm2444_vm4, %v3561_v1 }
0x11f4   :  { %v3454_v50 = vpop.f32.mrb[42].mxu0 }
0x11f5   :  { %v3461_v34 = vrot.slane %v3454_v50, %v6843_v38  ;;  %v5364_v45 = vpop.f32.mrb[43].mxu0  ;;  %v3910_v50 = vld [vmem:[%s7412_s13 + $0x68] sm:$0xff] }
0x11f6   :  { %v3911_v45 = vld [vmem:[%s7412_s13 + $0x70] sm:$0xff] }
0x11f7   :  { %v3462_v46 = vsub.f32 %v3367_v23, %v3461_v34  ;;  %v6048_v34 = vpack.c.bf16 %v3910_v50, %v3909_v31  ;;  %v4129_v31 = vld [vmem:[%s6621_s20 + $0x40] sm:$0xff]  ;;  %v4130_v50 = vld [vmem:[%s6621_s20 + $0x48] sm:$0xff] }
0x11f9   :  { %v3463_v35 = vmul.f32 %v3462_v46, %v3462_v46 }
0x11fb   :  { %v3464_v51 = vsel %vm245_vm0, %v3463_v35, 0.0 }
0x11fc   :  { %v3465_v36 = vrot.slane %v3464_v51, 4 }
0x11fe   :  { %v3466_v47 = vadd.f32 %v3465_v36, %v3464_v51 }
0x1200   :  { %v3467_v37 = vrot.slane %v3466_v47, 2 }
0x1202   :  { %v3468_v48 = vadd.f32 %v3467_v37, %v3466_v47 }
0x1204   :  { %v3469_v40 = vrot.slane %v3468_v48, 1 }
0x1206   :  { %v3470_v41 = vadd.f32 %v3469_v40, %v3468_v48 }
0x1208   :  { %5374 = vmatmul.mubr.msk.f32.vlgmr.msra.gmra.mrb[28].mxu1 %vm245_vm0, %v3470_v41 }
0x1209   :  { %6016 = vmatpush3.bf16.msra.mxu1 %v6013_v5 }
0x120a   :  { %6018 = vmatprep.subr.bf16.mxu1 %v6017_v63 }
0x120d   :  { %6020 = vmatpush3.bf16.msra.mxu1 %v6017_v63 }
0x120e   :  { %6022 = vmatprep.subr.bf16.mxu1 %v6021_v6 }
0x12db   :  { %v3540_v28 = vpop.f32.mrb[28].mxu1 }
0x12dc   :  { %v3541_v32 = vadd.f32 1e-05, %v3540_v28  ;;  %v5375_v39 = vpop.f32.mrb[29].mxu1 }
0x12de   :  { %6253 = vrsqrt.f32 %v3541_v32 }
0x12e8   :  { %v6254_v43 = vpop.eup %6253 }
0x12e9   :  { %v3545_v44 = vmul.f32 %v6254_v43, %v3376_v42 }
0x12eb   :  { %v3550_v53 = vrot.slane %v3545_v44, %v6843_v38 }
0x12ed   :  { %v3552_v55 = vmul.f32 %v3550_v53, %v3462_v46  ;;  %v3912_v46 = vld [vmem:[%s7412_s13 + $0x78] sm:$0xff] }
0x12ee   :  { %v6051_v35 = vpack.c.bf16 %v3912_v46, %v3911_v45  ;;  %v4131_v45 = vld [vmem:[%s6621_s20 + $0x50] sm:$0xff]  ;;  %v4132_v46 = vld [vmem:[%s6621_s20 + $0x58] sm:$0xff] }
0x12ef   :  { %v3559_v56 = vadd.f32 %v4662_v54, %v3552_v55 }
0x12f1   :  { %v3560_v57 = vmax.f32 %v3559_v56, 0.0 }
0x12f3   :  { %5376 = vmatprep.subr.mxu0 %v3560_v57 }
0x12f4   :  { %5377 = vmatpush3.msra.mxu0 %v3560_v57 }
0x12f5   :  { %5379 = vmatmul.mubr.msk.f32.vlgmr.msra.gmra.mrb[44].mxu0 %vm2444_vm4, %v3562_v58  ;;  %5381 = vmatprep.subr.mxu0 %v3560_v57  ;;  %v4097_v58 = vld [vmem:[%s7413_s17] sm:$0xff] }
0x12f6   :  { %5382 = vmatpush3.msra.mxu0 %v3560_v57  ;;  %5383 = vmatprep.mubr.msk.f32.mxu0 %vm2444_vm4, %v3563_v59 }
0x12f7   :  { %6029 = vmatprep.subr.bf16.mxu0 %v6352_v52 }
0x12f9   :  { %5384 = vmatmul.mubr.msk.f32.vlgmr.msra.gmra.mrb[46].mxu0 %vm2444_vm4, %v3564_v60 }
0x12fa   :  { %5440 = vmatprep.mubr.msk.f32.mxu0 %vm6353_vm2, %v6350_v21  ;;  %6031 = vmatpush3.bf16.msra.mxu0 %v6030_v10 }
0x12fb   :  { %6032 = vmatprep.subr.bf16.mxu0 %v6352_v52 }
0x12fe   :  { %6034 = vmatpush3.bf16.msra.mxu0 %v6033_v12 }
0x12ff   :  { %6035 = vmatprep.subr.bf16.mxu0 %v6352_v52 }
0x1302   :  { %6037 = vmatpush3.bf16.msra.mxu0 %v6036_v15 }
0x1303   :  { %6038 = vmatprep.subr.bf16.mxu0 %v6352_v52 }
0x1306   :  { %6040 = vmatpush3.bf16.msra.mxu0 %v6039_v18 }
0x1307   :  { %6041 = vmatprep.subr.bf16.mxu0 %v6352_v52 }
0x130a   :  { %6043 = vmatpush3.bf16.msra.mxu0 %v6042_v29 }
0x130b   :  { %6044 = vmatprep.subr.bf16.mxu0 %v6352_v52 }
0x13c8   :  { %v5380_v19 = vpop.f32.mrb[44].mxu0 }
0x13c9   :  { %v3645_v20 = vpop.f32.mrb[45].mxu0 }
0x13cc   :  { %v5385_v23 = vpop.f32.mrb[46].mxu0 }
0x13cd   :  { %v3726_v24 = vpop.f32.mrb[47].mxu0 }
0x13ce   :  { %5394 = vmatprep.mubr.msk.f32.mxu1 %vm245_vm0, %v3726_v24 }
0x13cf   :  { %5395 = vmatmul.mubr.msk.f32.vlgmr.msra.gmra.mrb[30].mxu1 %vm245_vm0, %v5385_v23  ;;  %v4103_v23 = vld [vmem:[%s7416_s29 + $0x10] sm:$0xff] }
0x13d0   :  { %6024 = vmatpush3.bf16.msra.mxu1 %v6021_v6  ;;  %5405 = vmatprep.mubr.msk.f32.mxu1 %vm245_vm0, %v3645_v20  ;;  %v4671_v6 = vld [vmem:[%s7415_s25] ss:$0 sm:$0xff]  ;;  %v4123_v20 = vld [vmem:[%s6621_s20 + $0x10] sm:$0xff] }
0x13d1   :  { %6026 = vmatprep.subr.bf16.mxu1 %v6025_v25  ;;  %v6089_v24 = vpack.c.bf16 %v4124_v22, %v4123_v20 }
0x13d4   :  { %6028 = vmatpush3.bf16.msra.mxu1 %v6025_v25  ;;  %v4125_v25 = vld [vmem:[%s6621_s20 + $0x20] sm:$0xff] }
0x13d5   :  { %6053 = vmatprep.subr.bf16.mxu1 %v6352_v52 }
0x13d7   :  { %5406 = vmatmul.mubr.msk.f32.vlgmr.msra.gmra.mrb[30].mxu1 %vm245_vm0, %v5380_v19  ;;  %v4101_v19 = vld [vmem:[%s7416_s29] sm:$0xff] }
0x13d8   :  { %6055 = vmatpush3.bf16.msra.mxu1 %v6030_v10  ;;  %5475 = vmatprep.mubr.msk.f32.mxu1 %vm6353_vm2, %v6350_v21  ;;  %v3907_v21 = vld [vmem:[%s7412_s13 + $0x50] sm:$0xff] }
0x13d9   :  { %6056 = vmatprep.subr.bf16.mxu1 %v6352_v52  ;;  %v6045_v49 = vpack.c.bf16 %v3908_v30, %v3907_v21  ;;  %v4127_v21 = vld [vmem:[%s6621_s20 + $0x30] sm:$0xff]  ;;  %v4128_v30 = vld [vmem:[%s6621_s20 + $0x38] sm:$0xff] }
0x13db   :  { %6046 = vmatpush3.bf16.msra.mxu0 %v6045_v49 }
0x13dc   :  { %6058 = vmatpush3.bf16.msra.mxu1 %v6033_v12  ;;  %6047 = vmatprep.subr.bf16.mxu0 %v6352_v52 }
0x13dd   :  { %6059 = vmatprep.subr.bf16.mxu1 %v6352_v52 }
0x13df   :  { %6049 = vmatpush3.bf16.msra.mxu0 %v6048_v34 }
0x13e0   :  { %6061 = vmatpush3.bf16.msra.mxu1 %v6036_v15  ;;  %6050 = vmatprep.subr.bf16.mxu0 %v6352_v52  ;;  %v4122_v15 = vld [vmem:[%s6621_s20 + $0x8] sm:$0xff] }
0x13e1   :  { %6062 = vmatprep.subr.bf16.mxu1 %v6352_v52  ;;  %v6085_v17 = vpack.c.bf16 %v4122_v15, %v4121_v14 }
0x13e3   :  { %6052 = vmatpush3.bf16.msra.mxu0 %v6051_v35 }
0x13e4   :  { %6064 = vmatpush3.bf16.msra.mxu1 %v6039_v18  ;;  %v4100_v18 = vld [vmem:[%s7413_s17 + $0x18] sm:$0xff] }
0x13e5   :  { %6065 = vmatprep.subr.bf16.mxu1 %v6352_v52 }
0x13e8   :  { %6067 = vmatpush3.bf16.msra.mxu1 %v6042_v29  ;;  %v6093_v29 = vpack.c.bf16 %v4126_v26, %v4125_v25 }
0x13e9   :  { %6068 = vmatprep.subr.bf16.mxu1 %v6352_v52 }
0x13ec   :  { %6070 = vmatpush3.bf16.msra.mxu1 %v6045_v49  ;;  %v6097_v49 = vpack.c.bf16 %v4128_v30, %v4127_v21 }
0x13ed   :  { %6071 = vmatprep.subr.bf16.mxu1 %v6352_v52 }
0x13f0   :  { %6073 = vmatpush3.bf16.msra.mxu1 %v6048_v34  ;;  %v6101_v34 = vpack.c.bf16 %v4130_v50, %v4129_v31 }
0x13f1   :  { %6074 = vmatprep.subr.bf16.mxu1 %v6352_v52 }
0x13f4   :  { %6076 = vmatpush3.bf16.msra.mxu1 %v6051_v35  ;;  %v6105_v35 = vpack.c.bf16 %v4132_v46, %v4131_v45 }
0x14aa   :  { %v5407_v51 = vpop.f32.mrb[30].mxu1 }
0x14ab   :  { %v3888_v36 = vpop.f32.mrb[31].mxu1 }
0x14ac   :  { %v3915_v47 = vadd.f32 %v5407_v51, %v3888_v36 }
0x14ae   :  { %v3916_v37 = vrot.slane %v3915_v47, 4 }
0x14b0   :  { %v3917_v48 = vadd.f32 %v3916_v37, %v3915_v47  ;;  %v4135_v37 = vld [vmem:[%s6621_s20 + $0x70] sm:$0xff] }
0x14b2   :  { %v3918_v40 = vrot.slane %v3917_v48, 2 }
0x14b4   :  { %v3919_v41 = vadd.f32 %v3918_v40, %v3917_v48  ;;  %v4136_v48 = vld [vmem:[%s6621_s20 + $0x78] sm:$0xff] }
0x14b5   :  { %v6113_v40 = vpack.c.bf16 %v4136_v48, %v4135_v37 }
0x14b6   :  { %v3920_v1 = vrot.slane %v3919_v41, 1 }
0x14b8   :  { %v3921_v2 = vadd.f32 %v3920_v1, %v3919_v41  ;;  %v4105_v41 = vld [vmem:[%s6616_s12] sm:$0xff]  ;;  %v4106_v1 = vld [vmem:[%s6616_s12 + $0x8] sm:$0xff] }
0x14ba   :  { %5441 = vmatmul.mubr.f32.vlgmr.msra.gmra.mrb[48].mxu0 %v3921_v2  ;;  %v6117_v2 = vpack.c.bf16 %v4106_v1, %v4105_v41 }
0x14bb   :  { %5482 = vmatprep.mubr.msk.f32.mxu0 %vm343_vm1, %v4097_v58 }
0x158d   :  { %v3988_v3 = vpop.f32.mrb[48].mxu0 }
0x158e   :  { %v3995_v5 = vrot.slane %v3988_v3, %v6843_v38  ;;  %v5442_v28 = vpop.f32.mrb[49].mxu0  ;;  %v4680_v3 = vld [vmem:[#allocation2] ss:$0 sm:$0xff] }
0x1590   :  { %v3996_v32 = vsub.f32 %v3888_v36, %v3995_v5  ;;  %v3997_v52 = vsub.f32 %v5407_v51, %v3995_v5  ;;  %v4133_v51 = vld [vmem:[%s6621_s20 + $0x60] sm:$0xff]  ;;  %v4134_v36 = vld [vmem:[%s6621_s20 + $0x68] sm:$0xff]  ;;  %v6354_v5 = vmov 0  }
0x1591   :  { %v6109_v47 = vpack.c.bf16 %v4134_v36, %v4133_v51  ;;  %6244 = vset.pattern.permute.xlu0 %v6354_v5 }
0x1592   :  { %v3998_v39 = vmul.f32 %v3996_v32, %v3996_v32  ;;  %v3999_v42 = vmul.f32 %v3997_v52, %v3997_v52  ;;  %4508 = vperm.xlu0 %6244, %v4680_v3  }
0x1594   :  { %v4000_v43 = vadd.f32 %v3999_v42, %v3998_v39  ;;  %v4107_v42 = vld [vmem:[%s6616_s12 + $0x10] sm:$0xff] }
0x1596   :  { %v4001_v44 = vrot.slane %v4000_v43, 4 }
0x1598   :  { %v4002_v53 = vadd.f32 %v4001_v44, %v4000_v43  ;;  %v4108_v43 = vld [vmem:[%s6616_s12 + $0x18] sm:$0xff] }
0x159a   :  { %v4003_v54 = vrot.slane %v4002_v53, 2 }
0x159c   :  { %v4004_v55 = vadd.f32 %v4003_v54, %v4002_v53  ;;  %v6121_v54 = vpack.c.bf16 %v4108_v43, %v4107_v42 }
0x159e   :  { %v4005_v56 = vrot.slane %v4004_v55, 1 }
0x15a0   :  { %v4006_v57 = vadd.f32 %v4005_v56, %v4004_v55  ;;  %v4109_v55 = vld [vmem:[%s6616_s12 + $0x20] sm:$0xff]  ;;  %v4110_v56 = vld [vmem:[%s6616_s12 + $0x28] sm:$0xff] }
0x15a2   :  { %5476 = vmatmul.mubr.f32.vlgmr.msra.gmra.mrb[32].mxu1 %v4006_v57 }
0x1611   :  { %v4509_v15 = vpop.permute.xlu0 %4508 }
0x1675   :  { %v4073_v59 = vpop.f32.mrb[32].mxu1 }
0x1676   :  { %v4074_v60 = vadd.f32 1e-05, %v4073_v59  ;;  %v5477_v61 = vpop.f32.mrb[33].mxu1  ;;  %v6125_v59 = vpack.c.bf16 %v4110_v56, %v4109_v55 }
0x1677   :  { %v4112_v61 = vld [vmem:[%s6616_s12 + $0x38] sm:$0xff] }
0x1678   :  { %6255 = vrsqrt.f32 %v4074_v60  ;;  %v4111_v60 = vld [vmem:[%s6616_s12 + $0x30] sm:$0xff] }
0x1682   :  { %v6256_v63 = vpop.eup %6255 }
0x1683   :  { %v4078_v0 = vmul.f32 %v6256_v63, %v3913_v62  ;;  %v6129_v62 = vpack.c.bf16 %v4112_v61, %v4111_v60  ;;  %v4113_v63 = vld [vmem:[%s6616_s12 + $0x40] sm:$0xff] }
0x1685   :  { %v4083_v4 = vrot.slane %v4078_v0, %v6843_v38  ;;  %v4099_v38 = vld [vmem:[%s7413_s17 + $0x10] sm:$0xff]  ;;  %v4114_v0 = vld [vmem:[%s6616_s12 + $0x48] sm:$0xff] }
0x1687   :  { %v4085_v7 = vmul.f32 %v4083_v4, %v3996_v32  ;;  %v4086_v8 = vmul.f32 %v4083_v4, %v3997_v52  ;;  %v6133_v4 = vpack.c.bf16 %v4114_v0, %v4113_v63 }
0x1689   :  { %v4093_v9 = vadd.f32 %v4671_v6, %v4085_v7  ;;  %v4094_v10 = vadd.f32 %v4671_v6, %v4086_v8  ;;  %v4115_v6 = vld [vmem:[%s6616_s12 + $0x50] sm:$0xff]  ;;  %v4116_v7 = vld [vmem:[%s6616_s12 + $0x58] sm:$0xff] }
0x168a   :  { %v6137_v8 = vpack.c.bf16 %v4116_v7, %v4115_v6 }
0x168b   :  { %v4095_v11 = vmax.f32 %v4093_v9, 0.0  ;;  %v4096_v12 = vmax.f32 %v4094_v10, 0.0  ;;  %v4117_v9 = vld [vmem:[%s6616_s12 + $0x60] sm:$0xff]  ;;  %v4118_v10 = vld [vmem:[%s6616_s12 + $0x68] sm:$0xff] }
0x168d   :  { %v6077_v13 = vpack.c.bf16 %v4096_v12, %v4095_v11  ;;  %v6141_v11 = vpack.c.bf16 %v4118_v10, %v4117_v9  ;;  %v4119_v12 = vld [vmem:[%s6616_s12 + $0x70] sm:$0xff] }
0x168f   :  { %6078 = vmatprep.subr.bf16.mxu0 %v6077_v13 }
0x1690   :  { %6080 = vmatpush3.bf16.msra.mxu0 %v6077_v13 }
0x1691   :  { %6082 = vmatprep.subr.bf16.mxu0 %v6077_v13 }
0x1693   :  { %5483 = vmatmul.mubr.msk.f32.vlgmr.msra.gmra.mrb[50].mxu0 %vm343_vm1, %v4098_v16 }
0x1694   :  { %6084 = vmatpush3.bf16.msra.mxu0 %v6077_v13  ;;  %5485 = vmatprep.mubr.msk.f32.mxu0 %vm343_vm1, %v4099_v38  ;;  %v4120_v13 = vld [vmem:[%s6616_s12 + $0x78] sm:$0xff]  ;;  %s6355_s12 = smov [#allocation3]  }
0x1695   :  { %6086 = vmatprep.subr.bf16.mxu0 %v6085_v17  ;;  %v6145_v14 = vpack.c.bf16 %v4120_v13, %v4119_v12  ;;  %s4548_s20 = sshll.u32 %s6355_s12, 4  ;;  %s4549_s20 = int_to_ptr.vmem [resolvable:$true] %s4548_s20 }
0x1696   :  { %s6273_s3 = scalar_lea.vmem %s4549_s20, 512  ;;  %p6278_p1 = scmp.lt.s32.totalorder %s4549_s20, %s4549_s20 }
0x1697   :  { %5486 = vmatmul.mubr.msk.f32.gmra.mrb[52].mxu0 %vm343_vm1, %v4100_v18  ;;  %p6274_p0 = scmp.ne.s32.totalorder %s4549_s20, %s6273_s3  ;;  %p6279_p2 = scmp.lt.s32.totalorder %s6273_s3, %s6273_s3 }
0x1698   :  { %5492 = vmatprep.mubr.msk.f32.mxu0 %vm343_vm1, %v4101_v19 }
0x1699   :  { %p6280_p3 = por %p6279_p2, %p6278_p1 }
0x169b   :  { %5493 = vmatmul.mubr.msk.f32.vlgmr.msra.gmra.mrb[54].mxu0 %vm343_vm1, %v4102_v33  ;;  %p6281_p4 = pnand %p6280_p3, %p6274_p0 }
0x169c   :  { %5495 = vmatprep.mubr.msk.f32.mxu0 %vm343_vm1, %v4103_v23  ;;  %6088 = vmatpush3.bf16.msra.mxu0 %v6085_v17 }
0x169d   :  { %6090 = vmatprep.subr.bf16.mxu0 %v6089_v24 }
0x169f   :  { %5496 = vmatmul.mubr.msk.f32.gmra.mrb[56].mxu0 %vm343_vm1, %v4104_v27 }
0x16a0   :  { %6092 = vmatpush3.bf16.msra.mxu0 %v6089_v24 }
0x16a1   :  { %6094 = vmatprep.subr.bf16.mxu0 %v6093_v29 }
0x16a4   :  { %6096 = vmatpush3.bf16.msra.mxu0 %v6093_v29 }
0x16a5   :  { %6098 = vmatprep.subr.bf16.mxu0 %v6097_v49 }
0x16a8   :  { %6100 = vmatpush3.bf16.msra.mxu0 %v6097_v49 }
0x16a9   :  { %6102 = vmatprep.subr.bf16.mxu0 %v6101_v34 }
0x16ac   :  { %6104 = vmatpush3.bf16.msra.mxu0 %v6101_v34 }
0x16ad   :  { %6106 = vmatprep.subr.bf16.mxu0 %v6105_v35 }
0x16b0   :  { %6108 = vmatpush3.bf16.msra.mxu0 %v6105_v35 }
0x16b1   :  { %6110 = vmatprep.subr.bf16.mxu0 %v6109_v47 }
0x16b4   :  { %6112 = vmatpush3.bf16.msra.mxu0 %v6109_v47 }
0x16b5   :  { %6114 = vmatprep.subr.bf16.mxu0 %v6113_v40 }
0x16b8   :  { %6116 = vmatpush3.bf16.msra.mxu0 %v6113_v40 }
0x16b9   :  { %6118 = vmatprep.subr.bf16.mxu0 %v6117_v2 }
0x1766   :  { %v5484_v28 = vpop.f32.mrb[50].mxu0 }
0x1767   :  { %v4215_v32 = vpop.f32.mrb[51].mxu0 }
0x176a   :  { %v5487_v52 = vpop.f32.mrb[52].mxu0 }
0x176b   :  { %v4225_v39 = vpop.f32.mrb[53].mxu0 }
0x176e   :  { %v5494_v44 = vpop.f32.mrb[54].mxu0 }
0x176f   :  { %v4312_v53 = vpop.f32.mrb[55].mxu0 }
0x1770   :  { %5530 = vmatprep.mubr.f32.mxu0 %v4312_v53 }
0x1771   :  { %5531 = vmatmul.mubr.f32.vlgmr.msra.gmra.mrb[58].mxu0 %v5494_v44 }
0x1772   :  { %6120 = vmatpush3.bf16.msra.mxu0 %v6117_v2  ;;  %v5497_v57 = vpop.f32.mrb[56].mxu0 }
0x1773   :  { %v4322_v58 = vpop.f32.mrb[57].mxu0  ;;  %6122 = vmatprep.subr.bf16.mxu0 %v6121_v54 }
0x1774   :  { %5533 = vmatprep.mubr.f32.mxu0 %v4322_v58 }
0x1775   :  { %5534 = vmatmul.mubr.f32.gmra.mrb[60].mxu0 %v5497_v57 }
0x1776   :  { %6124 = vmatpush3.bf16.msra.mxu0 %v6121_v54  ;;  %5568 = vmatprep.mubr.f32.mxu0 %v4215_v32 }
0x1777   :  { %6126 = vmatprep.subr.bf16.mxu0 %v6125_v59 }
0x177a   :  { %6128 = vmatpush3.bf16.msra.mxu0 %v6125_v59 }
0x177b   :  { %6130 = vmatprep.subr.bf16.mxu0 %v6129_v62 }
0x177e   :  { %6132 = vmatpush3.bf16.msra.mxu0 %v6129_v62 }
0x177f   :  { %6134 = vmatprep.subr.bf16.mxu0 %v6133_v4 }
0x1782   :  { %6136 = vmatpush3.bf16.msra.mxu0 %v6133_v4 }
0x1783   :  { %6138 = vmatprep.subr.bf16.mxu0 %v6137_v8 }
0x1786   :  { %6140 = vmatpush3.bf16.msra.mxu0 %v6137_v8 }
0x1787   :  { %6142 = vmatprep.subr.bf16.mxu0 %v6141_v11 }
0x178a   :  { %6144 = vmatpush3.bf16.msra.mxu0 %v6141_v11 }
0x178b   :  { %6146 = vmatprep.subr.bf16.mxu0 %v6145_v14 }
0x178e   :  { %6148 = vmatpush3.bf16.msra.mxu0 %v6145_v14 }
0x1791   :  { %5569 = vmatmul.mubr.f32.vlgmr.msra.gmra.mrb[58].mxu0 %v5484_v28 }
0x1792   :  { %5571 = vmatprep.mubr.f32.mxu0 %v4225_v39 }
0x1795   :  { %5572 = vmatmul.mubr.f32.gmra.mrb[60].mxu0 %v5487_v52 }
0x1864   :  { %v5570_v16 = vpop.f32.mrb[58].mxu0 }
0x1865   :  { %v4512_v38 = vadd.f32 %v5570_v16, %v4509_v15  ;;  %v4482_v17 = vpop.f32.mrb[59].mxu0 }
0x1866   :  { %v4511_v18 = vadd.f32 %v4509_v15, %v4482_v17 }
0x1867   :  { %v4516_v19 = vsub.f32 0.0, %v4512_v38 }
0x1868   :  { %v4515_v20 = vsub.f32 0.0, %v4511_v18  ;;  %v5573_v22 = vpop.f32.mrb[60].mxu0 }
0x1869   :  { %v4521_v33 = vmul.f32 1.442695, %v4516_v19  ;;  %v4514_v23 = vadd.f32 %v5573_v22, %v4509_v15  ;;  %v4492_v24 = vpop.f32.mrb[61].mxu0 }
0x186a   :  { %v4519_v25 = vmul.f32 1.442695, %v4515_v20  ;;  %v4513_v26 = vadd.f32 %v4509_v15, %v4492_v24 }
0x186b   :  { %6257 = vpow2.f32 %v4521_v33  ;;  %v4518_v27 = vsub.f32 0.0, %v4514_v23 }
0x186c   :  { %6259 = vpow2.f32 %v4519_v25  ;;  %v4517_v29 = vsub.f32 0.0, %v4513_v26 }
0x186d   :  { %v4525_v21 = vmul.f32 1.442695, %v4518_v27 }
0x186e   :  { %v4523_v30 = vmul.f32 1.442695, %v4517_v29 }
0x186f   :  { %6261 = vpow2.f32 %v4525_v21 }
0x1870   :  { %6263 = vpow2.f32 %v4523_v30 }
0x1875   :  { %v6258_v49 = vpop.eup %6257 }
0x1876   :  { %v6260_v31 = vpop.eup %6259  ;;  %v4528_v50 = vadd.f32 1.0, %v6258_v49 }
0x1877   :  { %v4527_v34 = vadd.f32 1.0, %v6260_v31 }
0x1878   :  { %6265 = vrcp.f32 %v4528_v50 }
0x1879   :  { %v6262_v45 = vpop.eup %6261  ;;  %6267 = vrcp.f32 %v4527_v34 }
0x187a   :  { %v6264_v46 = vpop.eup %6263  ;;  %v4530_v35 = vadd.f32 1.0, %v6262_v45 }
0x187b   :  { %v4529_v51 = vadd.f32 1.0, %v6264_v46 }
0x187c   :  { %6269 = vrcp.f32 %v4530_v35 }
0x187d   :  { %6271 = vrcp.f32 %v4529_v51 }
0x1882   :  { %v6266_v36 = vpop.eup %6265 }
0x1883   :  { %v6268_v47 = vpop.eup %6267  ;;  %4540 = vst.msk [vmem:[#allocation3 + $0x8] sm:$0xff] %vm343_vm1, %v6266_v36 }
0x1884   :  { %4539 = vst.msk [vmem:[#allocation3] sm:$0xff] %vm343_vm1, %v6268_v47 }
0x1886   :  { %v6270_v37 = vpop.eup %6269 }
0x1887   :  { %v6272_v48 = vpop.eup %6271  ;;  %4542 = vst.msk [vmem:[#allocation3 + $0x18] sm:$0xff] %vm343_vm1, %v6270_v37 }
0x1888   :  { %4541 = vst.msk [vmem:[#allocation3 + $0x10] sm:$0xff] %vm343_vm1, %v6272_v48 }
0x1889   :  { %6284 = shalt.err (!%p6281_p4)
}
0x188a   :  { %s6285_s8 = scalar_lea.hbm %s6629_s4, 512 }
0x188b   :  { %p6286_p5 = scmp.ne.s32.totalorder %s6629_s4, %s6285_s8  ;;  %p6289_p6 = scmp.lt.u32.totalorder %s6285_s8, %s6629_s4 }
0x188d   :  { %p6291_p7 = pnand %p6289_p6, %p6286_p5 }
0x188f   :  { %6294 = shalt.err (!%p6291_p7)
}
0x1890   :  { %s6356_s14 = smov 128   ;;  %s6357_s19 = smov 8  }
0x1891   :  { %4554 = dma.vmem_to_hbm [thread:$0]  %s4549_s20, 512, %s6629_s4, [#allocation4], %s6356_s14, %s6356_s14, %s6357_s19  }
0x1892   :  { %6295 = dma.done.wait [#allocation4], 512  }
0x1893   :  { %6296 = vsyncadd [#allocation4], 4294966784 }
0x1894   :  { %4558 = vsyncpa [#allocation4], 1 }

</bundles_post_ra>
